<compile_context>
chip_gen: v5e
topology: v5e:2x2
jax: 0.10.0
libtpu: 0.0.40
codegen_flags: <defaults>
</compile_context>

<pallas_src>
import functools

import jax
import jax.numpy as jnp
from jax.experimental import pallas as pl
from jax.experimental.pallas import tpu as pltpu

LN_EPS = 1e-5  # torch.nn.LayerNorm default


def _normalize(x):
    """LayerNorm without affine (gamma/beta are folded into the next matmul)."""
    mu = jnp.mean(x, axis=-1, keepdims=True)
    # single-pass variance: E[x^2] - mean^2 (guard tiny negative from cancellation)
    var = jnp.maximum(jnp.mean(x * x, axis=-1, keepdims=True) - mu * mu, 0.0)
    return (x - mu) * jax.lax.rsqrt(var + LN_EPS)


def _gelu_exact(x):
    # torch.nn.GELU() default = exact erf formulation
    # TODO(synk): consider jax.nn.gelu(approximate=True) on v6e/v7x if VALU-bound.
    return 0.5 * x * (1.0 + jax.lax.erf(x * (1.0 / jnp.sqrt(2.0).astype(x.dtype))))


def bert_layer_kernel(
    x_ref,
    w_attn_ref, b_attn_ref,   # LN1 affine folded in
    w_int_ref, b_int_ref,     # LN2 affine folded in
    w_out_ref, b_out_ref,
    o_ref,
):
    x = x_ref[...].astype(jnp.float32)

    # --- attention-output sub-block ---
    n1 = _normalize(x)
    attn = jnp.dot(n1.astype(w_attn_ref.dtype), w_attn_ref[...],
                   preferred_element_type=jnp.float32) + b_attn_ref[...]
    x = x + attn

    # --- feed-forward sub-block ---
    n2 = _normalize(x)
    inter = jnp.dot(n2.astype(w_int_ref.dtype), w_int_ref[...],
                    preferred_element_type=jnp.float32) + b_int_ref[...]
    inter = _gelu_exact(inter)
    ff = jnp.dot(inter.astype(w_out_ref.dtype), w_out_ref[...],
                 preferred_element_type=jnp.float32) + b_out_ref[...]

    o_ref[...] = (x + ff).astype(o_ref.dtype)


def _tpu_config():
    """Return (mxu_rows, vmem_cap_bytes) for the current TPU generation."""
    try:
        kind = jax.devices()[0].device_kind.lower()
    except Exception:
        kind = ""
    if "v7" in kind or "7x" in kind:
        return 256, 48 << 20    # v7x: 64 MiB physical VMEM; leave Mosaic headroom
    if "v6" in kind:
        return 256, 100 << 20   # v6e: 128 MiB physical VMEM
    if "v5" in kind:
        return 128, 100 << 20   # v5e: 4x128^2 MXU, 128 MiB physical VMEM
    return 128, 48 << 20        # unknown: conservative


def _vmem_bytes(tm, H, I, single_buffer_weights=True):
    """VMEM working-set estimate (bytes)."""
    wbuf = 1 if single_buffer_weights else 2
    weights = wbuf * (H * H + H * I + I * H) * 2   # bf16 weights
    biases = wbuf * (2 * H + I) * 4                # folded biases (f32)
    io = 2 * 2 * tm * H * 4                        # double-buffered x tile + out tile (f32)
    acts = tm * I * 4 + 6 * tm * H * 4             # FFN intermediate + f32 temporaries
    return weights + biases + io + acts


def _choose_tm(M, H, I, mxu_rows, vmem_cap):
    """MXU-row-aligned token tile, capped by VMEM; tiny M => one grid step."""
    if M <= mxu_rows:
        # single grid step; multiple of 16 for bf16 sublane packing
        return ((max(M, 8) + 15) // 16) * 16
    m_cap = ((M + mxu_rows - 1) // mxu_rows) * mxu_rows   # no point exceeding padded M
    for mult in (8, 4, 2, 1):
        tm = mxu_rows * mult
        if tm <= 1024 and tm <= m_cap and _vmem_bytes(tm, H, I) <= vmem_cap:
            return tm
    return mxu_rows


@functools.partial(jax.jit,
                   static_argnames=("tm", "vmem_cap", "single_buffer_weights"))
def _bert_layer_2d(x2d, params, tm, vmem_cap, single_buffer_weights):
    M, H = x2d.shape
    I = params["w_int"].shape[1]

    # Fold the LayerNorm affine into the following Linear:
    #   LN(x) @ W + b == norm(x) @ (diag(gamma) @ W) + (beta @ W + b)
    w_attn = (params["ln1_g"].reshape(H, 1) * params["w_attn"]).astype(jnp.bfloat16)
    b_attn = params["b_attn"] + params["ln1_b"] @ params["w_attn"]
    w_int = (params["ln2_g"].reshape(H, 1) * params["w_int"]).astype(jnp.bfloat16)
    b_int = params["b_int"] + params["ln2_b"] @ params["w_int"]
    w_out = params["w_out"].astype(jnp.bfloat16)
    b_out = params["b_out"]

    if single_buffer_weights:
        invariant = lambda shape: pl.BlockSpec(shape, lambda i: (0, 0),
                                               pipeline_mode=pl.Buffered(1))
    else:
        invariant = lambda shape: pl.BlockSpec(shape, lambda i: (0, 0))

    est = _vmem_bytes(tm, H, I, single_buffer_weights)
    vmem_limit = min(max(32 << 20, int(est * 1.2) + (2 << 20)), vmem_cap)

    cost = pl.CostEstimate(
        flops=2 * M * (H * H + 2 * H * I),
        transcendentals=M * I,                                    # erf on the (M, I) tensor
        bytes_accessed=(H * H + 2 * H * I) * 2 + 2 * M * H * 4 + (2 * H + I) * 4,
    )

    out2d = pl.pallas_call(
        bert_layer_kernel,
        out_shape=jax.ShapeDtypeStruct((M, H), x2d.dtype),
        grid=(pl.cdiv(M, tm),),                                   # partial final block OK: all ops are row-wise
        in_specs=[
            pl.BlockSpec((tm, H), lambda i: (i, 0)),              # x tile (double-buffered)
            invariant((H, H)), invariant((1, H)),                 # folded attention_output W', b'
            invariant((H, I)), invariant((1, I)),                 # folded intermediate W', b'
            invariant((I, H)), invariant((1, H)),                 # output W, b
        ],
        out_specs=pl.BlockSpec((tm, H), lambda i: (i, 0)),
        compiler_params=pltpu.CompilerParams(
            dimension_semantics=("parallel",),
            vmem_limit_bytes=vmem_limit,
        ),
        cost_estimate=cost,
    )(x2d, w_attn, b_attn, w_int, b_int, w_out, b_out)
    return out2d


def simple_bert_layer(x, params, tm=None):
    """x: (B, S, H) float32. params: dict of weights. Returns (B, S, H)."""
    B, S, H = x.shape
    M = B * S
    I = params["w_int"].shape[1]
    mxu_rows, vmem_cap = _tpu_config()
    if tm is None:
        tm = _choose_tm(M, H, I, mxu_rows, vmem_cap)
    x2d = x.reshape(M, H)
    try:
        out2d = jax.block_until_ready(
            _bert_layer_2d(x2d, params, tm, vmem_cap, True))
    except Exception:
        # TODO(synk): drop this fallback once pl.Buffered(1) pipeline_mode is
        # supported on all deployed JAX versions.
        out2d = _bert_layer_2d(x2d, params, tm, vmem_cap, False)
    return out2d.reshape(B, S, H)


def init_params(key, hidden, intermediate):
    ks = jax.random.split(key, 6)
    scale = 0.02
    return {
        "ln1_g": jnp.ones((1, hidden), jnp.float32),
        "ln1_b": jnp.zeros((1, hidden), jnp.float32),
        "ln2_g": jnp.ones((1, hidden), jnp.float32),
        "ln2_b": jnp.zeros((1, hidden), jnp.float32),
        # stored as (in, out) == torch weight (out, in) transposed
        "w_attn": scale * jax.random.normal(ks[0], (hidden, hidden), jnp.float32),
        "b_attn": scale * jax.random.normal(ks[1], (1, hidden), jnp.float32),
        "w_int":  scale * jax.random.normal(ks[2], (hidden, intermediate), jnp.float32),
        "b_int":  scale * jax.random.normal(ks[3], (1, intermediate), jnp.float32),
        "w_out":  scale * jax.random.normal(ks[4], (intermediate, hidden), jnp.float32),
        "b_out":  scale * jax.random.normal(ks[5], (1, hidden), jnp.float32),
    }


def reference(x, p):
    """Pure-JAX f32 reference with the original module's semantics."""
    def ln(v, g, b):
        mu = jnp.mean(v, -1, keepdims=True)
        var = jnp.mean((v - mu) ** 2, -1, keepdims=True)
        return (v - mu) * jax.lax.rsqrt(var + LN_EPS) * g + b
    a = ln(x, p["ln1_g"][0], p["ln1_b"][0]) @ p["w_attn"] + p["b_attn"][0]
    x = x + a
    h = ln(x, p["ln2_g"][0], p["ln2_b"][0]) @ p["w_int"] + p["b_int"][0]
    h = jax.nn.gelu(h, approximate=False)
    f = h @ p["w_out"] + p["b_out"][0]
    return x + f


if __name__ == "__main__":
    # small shapes consistent with the module: batch=2, seq=8, hidden=256, intermediate=512
    B, S, H, I = 2, 8, 256, 512
    key = jax.random.PRNGKey(0)
    kx, kp = jax.random.split(key)
    x = jax.random.normal(kx, (B, S, H), jnp.float32)
    params = init_params(kp, H, I)

    out = simple_bert_layer(x, params)
    out = jax.block_until_ready(out)

    ref = reference(x, params)
    assert out.shape == (B, S, H)
    # bf16 matmul operands (f32 accumulation) => loosened tolerance vs f32 reference
    assert jnp.allclose(out, ref, atol=2e-2, rtol=2e-2), "mismatch vs reference"
    print("KERNEL_OK")
</pallas_src>

<mosaic_0001>
module attributes {stable_mosaic.version = 11 : i64} {
  func.func @bert_layer_kernel(%arg0: i32, %arg1: memref<16x256xf32, #tpu.memory_space<vmem>>, %arg2: memref<256x256xbf16, #tpu.memory_space<vmem>>, %arg3: memref<1x256xf32, #tpu.memory_space<vmem>>, %arg4: memref<256x512xbf16, #tpu.memory_space<vmem>>, %arg5: memref<1x512xf32, #tpu.memory_space<vmem>>, %arg6: memref<512x256xbf16, #tpu.memory_space<vmem>>, %arg7: memref<1x256xf32, #tpu.memory_space<vmem>>, %arg8: memref<16x256xf32, #tpu.memory_space<vmem>>) attributes {dimension_semantics = [#tpu.dimension_semantics<parallel>], iteration_bounds = array<i64: 1>, scalar_prefetch = 0 : i64, scratch_operands = 0 : i64, tpu.core_type = #tpu.core_type<tc>, window_params = [{transform_indices = @transform_0, window_bounds = array<i64: 16, 256>}, {pipeline_mode = #tpu.pipeline_mode<synchronous>, transform_indices = @transform_1, window_bounds = array<i64: 256, 256>}, {pipeline_mode = #tpu.pipeline_mode<synchronous>, transform_indices = @transform_2, window_bounds = array<i64: 1, 256>}, {pipeline_mode = #tpu.pipeline_mode<synchronous>, transform_indices = @transform_3, window_bounds = array<i64: 256, 512>}, {pipeline_mode = #tpu.pipeline_mode<synchronous>, transform_indices = @transform_4, window_bounds = array<i64: 1, 512>}, {pipeline_mode = #tpu.pipeline_mode<synchronous>, transform_indices = @transform_5, window_bounds = array<i64: 512, 256>}, {pipeline_mode = #tpu.pipeline_mode<synchronous>, transform_indices = @transform_6, window_bounds = array<i64: 1, 256>}, {transform_indices = @transform_7, window_bounds = array<i64: 16, 256>}]} {
    %c0 = arith.constant 0 : index
    %c0_0 = arith.constant 0 : index
    %0 = vector.load %arg1[%c0, %c0_0] : memref<16x256xf32, #tpu.memory_space<vmem>>, vector<16x256xf32>
    %cst = arith.constant dense<0.000000e+00> : vector<16xf32>
    %1 = vector.multi_reduction <add>, %0, %cst [1] : vector<16x256xf32> to vector<16xf32>
    %2 = vector.shape_cast %1 : vector<16xf32> to vector<16x1xf32>
    %cst_1 = arith.constant 2.560000e+02 : f32
    %3 = vector.broadcast %cst_1 : f32 to vector<16x1xf32>
    %4 = arith.divf %2, %3 : vector<16x1xf32>
    %5 = arith.mulf %0, %0 : vector<16x256xf32>
    %cst_2 = arith.constant dense<0.000000e+00> : vector<16xf32>
    %6 = vector.multi_reduction <add>, %5, %cst_2 [1] : vector<16x256xf32> to vector<16xf32>
    %7 = vector.shape_cast %6 : vector<16xf32> to vector<16x1xf32>
    %cst_3 = arith.constant 2.560000e+02 : f32
    %8 = vector.broadcast %cst_3 : f32 to vector<16x1xf32>
    %9 = arith.divf %7, %8 : vector<16x1xf32>
    %10 = arith.mulf %4, %4 : vector<16x1xf32>
    %11 = arith.subf %9, %10 : vector<16x1xf32>
    %cst_4 = arith.constant 0.000000e+00 : f32
    %12 = vector.broadcast %cst_4 : f32 to vector<16x1xf32>
    %13 = arith.maximumf %11, %12 : vector<16x1xf32>
    %14 = vector.broadcast %4 : vector<16x1xf32> to vector<16x256xf32>
    %15 = arith.subf %0, %14 : vector<16x256xf32>
    %cst_5 = arith.constant 9.99999974E-6 : f32
    %16 = vector.broadcast %cst_5 : f32 to vector<16x1xf32>
    %17 = arith.addf %13, %16 : vector<16x1xf32>
    %18 = math.rsqrt %17 : vector<16x1xf32>
    %19 = vector.broadcast %18 : vector<16x1xf32> to vector<16x256xf32>
    %20 = arith.mulf %15, %19 : vector<16x256xf32>
    %21 = arith.truncf %20 : vector<16x256xf32> to vector<16x256xbf16>
    %c0_6 = arith.constant 0 : index
    %c0_7 = arith.constant 0 : index
    %22 = vector.load %arg2[%c0_6, %c0_7] : memref<256x256xbf16, #tpu.memory_space<vmem>>, vector<256x256xbf16>
    %cst_8 = arith.constant dense<0.000000e+00> : vector<16x256xf32>
    %23 = tpu.matmul %21, %22, %cst_8 {dimension_numbers = #tpu.dot_dimension_numbers<[1], [0], [0], [1], [0, 0, 1, 1], [], []>} : vector<16x256xbf16>, vector<256x256xbf16>, vector<16x256xf32> -> vector<16x256xf32>
    %c0_9 = arith.constant 0 : index
    %c0_10 = arith.constant 0 : index
    %24 = vector.load %arg3[%c0_9, %c0_10] : memref<1x256xf32, #tpu.memory_space<vmem>>, vector<1x256xf32>
    %25 = vector.broadcast %24 : vector<1x256xf32> to vector<16x256xf32>
    %26 = arith.addf %23, %25 : vector<16x256xf32>
    %27 = arith.addf %0, %26 : vector<16x256xf32>
    %cst_11 = arith.constant dense<0.000000e+00> : vector<16xf32>
    %28 = vector.multi_reduction <add>, %27, %cst_11 [1] : vector<16x256xf32> to vector<16xf32>
    %29 = vector.shape_cast %28 : vector<16xf32> to vector<16x1xf32>
    %cst_12 = arith.constant 2.560000e+02 : f32
    %30 = vector.broadcast %cst_12 : f32 to vector<16x1xf32>
    %31 = arith.divf %29, %30 : vector<16x1xf32>
    %32 = arith.mulf %27, %27 : vector<16x256xf32>
    %cst_13 = arith.constant dense<0.000000e+00> : vector<16xf32>
    %33 = vector.multi_reduction <add>, %32, %cst_13 [1] : vector<16x256xf32> to vector<16xf32>
    %34 = vector.shape_cast %33 : vector<16xf32> to vector<16x1xf32>
    %cst_14 = arith.constant 2.560000e+02 : f32
    %35 = vector.broadcast %cst_14 : f32 to vector<16x1xf32>
    %36 = arith.divf %34, %35 : vector<16x1xf32>
    %37 = arith.mulf %31, %31 : vector<16x1xf32>
    %38 = arith.subf %36, %37 : vector<16x1xf32>
    %cst_15 = arith.constant 0.000000e+00 : f32
    %39 = vector.broadcast %cst_15 : f32 to vector<16x1xf32>
    %40 = arith.maximumf %38, %39 : vector<16x1xf32>
    %41 = vector.broadcast %31 : vector<16x1xf32> to vector<16x256xf32>
    %42 = arith.subf %27, %41 : vector<16x256xf32>
    %cst_16 = arith.constant 9.99999974E-6 : f32
    %43 = vector.broadcast %cst_16 : f32 to vector<16x1xf32>
    %44 = arith.addf %40, %43 : vector<16x1xf32>
    %45 = math.rsqrt %44 : vector<16x1xf32>
    %46 = vector.broadcast %45 : vector<16x1xf32> to vector<16x256xf32>
    %47 = arith.mulf %42, %46 : vector<16x256xf32>
    %48 = arith.truncf %47 : vector<16x256xf32> to vector<16x256xbf16>
    %c0_17 = arith.constant 0 : index
    %c0_18 = arith.constant 0 : index
    %49 = vector.load %arg4[%c0_17, %c0_18] : memref<256x512xbf16, #tpu.memory_space<vmem>>, vector<256x512xbf16>
    %cst_19 = arith.constant dense<0.000000e+00> : vector<16x512xf32>
    %50 = tpu.matmul %48, %49, %cst_19 {dimension_numbers = #tpu.dot_dimension_numbers<[1], [0], [0], [1], [0, 0, 1, 1], [], []>} : vector<16x256xbf16>, vector<256x512xbf16>, vector<16x512xf32> -> vector<16x512xf32>
    %c0_20 = arith.constant 0 : index
    %c0_21 = arith.constant 0 : index
    %51 = vector.load %arg5[%c0_20, %c0_21] : memref<1x512xf32, #tpu.memory_space<vmem>>, vector<1x512xf32>
    %52 = vector.broadcast %51 : vector<1x512xf32> to vector<16x512xf32>
    %53 = arith.addf %50, %52 : vector<16x512xf32>
    %cst_22 = arith.constant 5.000000e-01 : f32
    %54 = vector.broadcast %cst_22 : f32 to vector<16x512xf32>
    %55 = arith.mulf %54, %53 : vector<16x512xf32>
    %cst_23 = arith.constant 2.000000e+00 : f32
    %56 = math.sqrt %cst_23 : f32
    %cst_24 = arith.constant 1.000000e+00 : f32
    %57 = arith.divf %cst_24, %56 : f32
    %58 = vector.broadcast %57 : f32 to vector<16x512xf32>
    %59 = arith.mulf %53, %58 : vector<16x512xf32>
    %60 = math.erf %59 : vector<16x512xf32>
    %cst_25 = arith.constant 1.000000e+00 : f32
    %61 = vector.broadcast %cst_25 : f32 to vector<16x512xf32>
    %62 = arith.addf %61, %60 : vector<16x512xf32>
    %63 = arith.mulf %55, %62 : vector<16x512xf32>
    %64 = arith.truncf %63 : vector<16x512xf32> to vector<16x512xbf16>
    %c0_26 = arith.constant 0 : index
    %c0_27 = arith.constant 0 : index
    %65 = vector.load %arg6[%c0_26, %c0_27] : memref<512x256xbf16, #tpu.memory_space<vmem>>, vector<512x256xbf16>
    %cst_28 = arith.constant dense<0.000000e+00> : vector<16x256xf32>
    %66 = tpu.matmul %64, %65, %cst_28 {dimension_numbers = #tpu.dot_dimension_numbers<[1], [0], [0], [1], [0, 0, 1, 1], [], []>} : vector<16x512xbf16>, vector<512x256xbf16>, vector<16x256xf32> -> vector<16x256xf32>
    %c0_29 = arith.constant 0 : index
    %c0_30 = arith.constant 0 : index
    %67 = vector.load %arg7[%c0_29, %c0_30] : memref<1x256xf32, #tpu.memory_space<vmem>>, vector<1x256xf32>
    %68 = vector.broadcast %67 : vector<1x256xf32> to vector<16x256xf32>
    %69 = arith.addf %66, %68 : vector<16x256xf32>
    %70 = arith.addf %27, %69 : vector<16x256xf32>
    %c0_31 = arith.constant 0 : index
    %c0_32 = arith.constant 0 : index
    %71 = vector.load %arg8[%c0_31, %c0_32] : memref<16x256xf32, #tpu.memory_space<vmem>>, vector<16x256xf32>
    tpu.vector_store %arg8[%c0_31, %c0_32], %70 {strides = array<i32>} : memref<16x256xf32, #tpu.memory_space<vmem>>, vector<16x256xf32>,
    return
  }
  func.func @transform_0(%arg0: i32) -> (i32, i32) {
    %c0_i32 = arith.constant 0 : i32
    %c0_i32_0 = arith.constant 0 : i32
    return %arg0, %c0_i32 : i32, i32
  }
  func.func @transform_1(%arg0: i32) -> (i32, i32) {
    %c0_i32 = arith.constant 0 : i32
    %c0_i32_0 = arith.constant 0 : i32
    %c0_i32_1 = arith.constant 0 : i32
    return %c0_i32, %c0_i32_0 : i32, i32
  }
  func.func @transform_2(%arg0: i32) -> (i32, i32) {
    %c0_i32 = arith.constant 0 : i32
    %c0_i32_0 = arith.constant 0 : i32
    %c0_i32_1 = arith.constant 0 : i32
    return %c0_i32, %c0_i32_0 : i32, i32
  }
  func.func @transform_3(%arg0: i32) -> (i32, i32) {
    %c0_i32 = arith.constant 0 : i32
    %c0_i32_0 = arith.constant 0 : i32
    %c0_i32_1 = arith.constant 0 : i32
    return %c0_i32, %c0_i32_0 : i32, i32
  }
  func.func @transform_4(%arg0: i32) -> (i32, i32) {
    %c0_i32 = arith.constant 0 : i32
    %c0_i32_0 = arith.constant 0 : i32
    %c0_i32_1 = arith.constant 0 : i32
    return %c0_i32, %c0_i32_0 : i32, i32
  }
  func.func @transform_5(%arg0: i32) -> (i32, i32) {
    %c0_i32 = arith.constant 0 : i32
    %c0_i32_0 = arith.constant 0 : i32
    %c0_i32_1 = arith.constant 0 : i32
    return %c0_i32, %c0_i32_0 : i32, i32
  }
  func.func @transform_6(%arg0: i32) -> (i32, i32) {
    %c0_i32 = arith.constant 0 : i32
    %c0_i32_0 = arith.constant 0 : i32
    %c0_i32_1 = arith.constant 0 : i32
    return %c0_i32, %c0_i32_0 : i32, i32
  }
  func.func @transform_7(%arg0: i32) -> (i32, i32) {
    %c0_i32 = arith.constant 0 : i32
    %c0_i32_0 = arith.constant 0 : i32
    return %arg0, %c0_i32 : i32, i32
  }
}

module attributes {stable_mosaic.version = 11 : i64} {
  func.func @bert_layer_kernel(%arg0: i32, %arg1: memref<16x256xf32, #tpu.memory_space<vmem>>, %arg2: memref<256x256xbf16, #tpu.memory_space<vmem>>, %arg3: memref<1x256xf32, #tpu.memory_space<vmem>>, %arg4: memref<256x512xbf16, #tpu.memory_space<vmem>>, %arg5: memref<1x512xf32, #tpu.memory_space<vmem>>, %arg6: memref<512x256xbf16, #tpu.memory_space<vmem>>, %arg7: memref<1x256xf32, #tpu.memory_space<vmem>>, %arg8: memref<16x256xf32, #tpu.memory_space<vmem>>) attributes {dimension_semantics = [#tpu.dimension_semantics<parallel>], iteration_bounds = array<i64: 1>, scalar_prefetch = 0 : i64, scratch_operands = 0 : i64, tpu.core_type = #tpu.core_type<tc>, window_params = [{transform_indices = @transform_0, window_bounds = array<i64: 16, 256>}, {pipeline_mode = #tpu.pipeline_mode<synchronous>, transform_indices = @transform_1, window_bounds = array<i64: 256, 256>}, {pipeline_mode = #tpu.pipeline_mode<synchronous>, transform_indices = @transform_2, window_bounds = array<i64: 1, 256>}, {pipeline_mode = #tpu.pipeline_mode<synchronous>, transform_indices = @transform_3, window_bounds = array<i64: 256, 512>}, {pipeline_mode = #tpu.pipeline_mode<synchronous>, transform_indices = @transform_4, window_bounds = array<i64: 1, 512>}, {pipeline_mode = #tpu.pipeline_mode<synchronous>, transform_indices = @transform_5, window_bounds = array<i64: 512, 256>}, {pipeline_mode = #tpu.pipeline_mode<synchronous>, transform_indices = @transform_6, window_bounds = array<i64: 1, 256>}, {transform_indices = @transform_7, window_bounds = array<i64: 16, 256>}]} {
    %c0 = arith.constant 0 : index
    %c0_0 = arith.constant 0 : index
    %0 = vector.load %arg1[%c0, %c0_0] : memref<16x256xf32, #tpu.memory_space<vmem>>, vector<16x256xf32>
    %cst = arith.constant dense<0.000000e+00> : vector<16xf32>
    %1 = vector.multi_reduction <add>, %0, %cst [1] : vector<16x256xf32> to vector<16xf32>
    %2 = vector.shape_cast %1 : vector<16xf32> to vector<16x1xf32>
    %cst_1 = arith.constant 2.560000e+02 : f32
    %3 = vector.broadcast %cst_1 : f32 to vector<16x1xf32>
    %4 = arith.divf %2, %3 : vector<16x1xf32>
    %5 = arith.mulf %0, %0 : vector<16x256xf32>
    %cst_2 = arith.constant dense<0.000000e+00> : vector<16xf32>
    %6 = vector.multi_reduction <add>, %5, %cst_2 [1] : vector<16x256xf32> to vector<16xf32>
    %7 = vector.shape_cast %6 : vector<16xf32> to vector<16x1xf32>
    %cst_3 = arith.constant 2.560000e+02 : f32
    %8 = vector.broadcast %cst_3 : f32 to vector<16x1xf32>
    %9 = arith.divf %7, %8 : vector<16x1xf32>
    %10 = arith.mulf %4, %4 : vector<16x1xf32>
    %11 = arith.subf %9, %10 : vector<16x1xf32>
    %cst_4 = arith.constant 0.000000e+00 : f32
    %12 = vector.broadcast %cst_4 : f32 to vector<16x1xf32>
    %13 = arith.maximumf %11, %12 : vector<16x1xf32>
    %14 = vector.broadcast %4 : vector<16x1xf32> to vector<16x256xf32>
    %15 = arith.subf %0, %14 : vector<16x256xf32>
    %cst_5 = arith.constant 9.99999974E-6 : f32
    %16 = vector.broadcast %cst_5 : f32 to vector<16x1xf32>
    %17 = arith.addf %13, %16 : vector<16x1xf32>
    %18 = math.rsqrt %17 : vector<16x1xf32>
    %19 = vector.broadcast %18 : vector<16x1xf32> to vector<16x256xf32>
    %20 = arith.mulf %15, %19 : vector<16x256xf32>
    %21 = arith.truncf %20 : vector<16x256xf32> to vector<16x256xbf16>
    %c0_6 = arith.constant 0 : index
    %c0_7 = arith.constant 0 : index
    %22 = vector.load %arg2[%c0_6, %c0_7] : memref<256x256xbf16, #tpu.memory_space<vmem>>, vector<256x256xbf16>
    %cst_8 = arith.constant dense<0.000000e+00> : vector<16x256xf32>
    %23 = tpu.matmul %21, %22, %cst_8 {dimension_numbers = #tpu.dot_dimension_numbers<[1], [0], [0], [1], [0, 0, 1, 1], [], []>} : vector<16x256xbf16>, vector<256x256xbf16>, vector<16x256xf32> -> vector<16x256xf32>
    %c0_9 = arith.constant 0 : index
    %c0_10 = arith.constant 0 : index
    %24 = vector.load %arg3[%c0_9, %c0_10] : memref<1x256xf32, #tpu.memory_space<vmem>>, vector<1x256xf32>
    %25 = vector.broadcast %24 : vector<1x256xf32> to vector<16x256xf32>
    %26 = arith.addf %23, %25 : vector<16x256xf32>
    %27 = arith.addf %0, %26 : vector<16x256xf32>
    %cst_11 = arith.constant dense<0.000000e+00> : vector<16xf32>
    %28 = vector.multi_reduction <add>, %27, %cst_11 [1] : vector<16x256xf32> to vector<16xf32>
    %29 = vector.shape_cast %28 : vector<16xf32> to vector<16x1xf32>
    %cst_12 = arith.constant 2.560000e+02 : f32
    %30 = vector.broadcast %cst_12 : f32 to vector<16x1xf32>
    %31 = arith.divf %29, %30 : vector<16x1xf32>
    %32 = arith.mulf %27, %27 : vector<16x256xf32>
    %cst_13 = arith.constant dense<0.000000e+00> : vector<16xf32>
    %33 = vector.multi_reduction <add>, %32, %cst_13 [1] : vector<16x256xf32> to vector<16xf32>
    %34 = vector.shape_cast %33 : vector<16xf32> to vector<16x1xf32>
    %cst_14 = arith.constant 2.560000e+02 : f32
    %35 = vector.broadcast %cst_14 : f32 to vector<16x1xf32>
    %36 = arith.divf %34, %35 : vector<16x1xf32>
    %37 = arith.mulf %31, %31 : vector<16x1xf32>
    %38 = arith.subf %36, %37 : vector<16x1xf32>
    %cst_15 = arith.constant 0.000000e+00 : f32
    %39 = vector.broadcast %cst_15 : f32 to vector<16x1xf32>
    %40 = arith.maximumf %38, %39 : vector<16x1xf32>
    %41 = vector.broadcast %31 : vector<16x1xf32> to vector<16x256xf32>
    %42 = arith.subf %27, %41 : vector<16x256xf32>
    %cst_16 = arith.constant 9.99999974E-6 : f32
    %43 = vector.broadcast %cst_16 : f32 to vector<16x1xf32>
    %44 = arith.addf %40, %43 : vector<16x1xf32>
    %45 = math.rsqrt %44 : vector<16x1xf32>
    %46 = vector.broadcast %45 : vector<16x1xf32> to vector<16x256xf32>
    %47 = arith.mulf %42, %46 : vector<16x256xf32>
    %48 = arith.truncf %47 : vector<16x256xf32> to vector<16x256xbf16>
    %c0_17 = arith.constant 0 : index
    %c0_18 = arith.constant 0 : index
    %49 = vector.load %arg4[%c0_17, %c0_18] : memref<256x512xbf16, #tpu.memory_space<vmem>>, vector<256x512xbf16>
    %cst_19 = arith.constant dense<0.000000e+00> : vector<16x512xf32>
    %50 = tpu.matmul %48, %49, %cst_19 {dimension_numbers = #tpu.dot_dimension_numbers<[1], [0], [0], [1], [0, 0, 1, 1], [], []>} : vector<16x256xbf16>, vector<256x512xbf16>, vector<16x512xf32> -> vector<16x512xf32>
    %c0_20 = arith.constant 0 : index
    %c0_21 = arith.constant 0 : index
    %51 = vector.load %arg5[%c0_20, %c0_21] : memref<1x512xf32, #tpu.memory_space<vmem>>, vector<1x512xf32>
    %52 = vector.broadcast %51 : vector<1x512xf32> to vector<16x512xf32>
    %53 = arith.addf %50, %52 : vector<16x512xf32>
    %cst_22 = arith.constant 5.000000e-01 : f32
    %54 = vector.broadcast %cst_22 : f32 to vector<16x512xf32>
    %55 = arith.mulf %54, %53 : vector<16x512xf32>
    %cst_23 = arith.constant 2.000000e+00 : f32
    %56 = math.sqrt %cst_23 : f32
    %cst_24 = arith.constant 1.000000e+00 : f32
    %57 = arith.divf %cst_24, %56 : f32
    %58 = vector.broadcast %57 : f32 to vector<16x512xf32>
    %59 = arith.mulf %53, %58 : vector<16x512xf32>
    %60 = math.erf %59 : vector<16x512xf32>
    %cst_25 = arith.constant 1.000000e+00 : f32
    %61 = vector.broadcast %cst_25 : f32 to vector<16x512xf32>
    %62 = arith.addf %61, %60 : vector<16x512xf32>
    %63 = arith.mulf %55, %62 : vector<16x512xf32>
    %64 = arith.truncf %63 : vector<16x512xf32> to vector<16x512xbf16>
    %c0_26 = arith.constant 0 : index
    %c0_27 = arith.constant 0 : index
    %65 = vector.load %arg6[%c0_26, %c0_27] : memref<512x256xbf16, #tpu.memory_space<vmem>>, vector<512x256xbf16>
    %cst_28 = arith.constant dense<0.000000e+00> : vector<16x256xf32>
    %66 = tpu.matmul %64, %65, %cst_28 {dimension_numbers = #tpu.dot_dimension_numbers<[1], [0], [0], [1], [0, 0, 1, 1], [], []>} : vector<16x512xbf16>, vector<512x256xbf16>, vector<16x256xf32> -> vector<16x256xf32>
    %c0_29 = arith.constant 0 : index
    %c0_30 = arith.constant 0 : index
    %67 = vector.load %arg7[%c0_29, %c0_30] : memref<1x256xf32, #tpu.memory_space<vmem>>, vector<1x256xf32>
    %68 = vector.broadcast %67 : vector<1x256xf32> to vector<16x256xf32>
    %69 = arith.addf %66, %68 : vector<16x256xf32>
    %70 = arith.addf %27, %69 : vector<16x256xf32>
    %c0_31 = arith.constant 0 : index
    %c0_32 = arith.constant 0 : index
    %71 = vector.load %arg8[%c0_31, %c0_32] : memref<16x256xf32, #tpu.memory_space<vmem>>, vector<16x256xf32>
    tpu.vector_store %arg8[%c0_31, %c0_32], %70 {strides = array<i32>} : memref<16x256xf32, #tpu.memory_space<vmem>>, vector<16x256xf32>,
    return
  }
  func.func @transform_0(%arg0: i32) -> (i32, i32) {
    %c0_i32 = arith.constant 0 : i32
    %c0_i32_0 = arith.constant 0 : i32
    return %arg0, %c0_i32 : i32, i32
  }
  func.func @transform_1(%arg0: i32) -> (i32, i32) {
    %c0_i32 = arith.constant 0 : i32
    %c0_i32_0 = arith.constant 0 : i32
    %c0_i32_1 = arith.constant 0 : i32
    return %c0_i32, %c0_i32_0 : i32, i32
  }
  func.func @transform_2(%arg0: i32) -> (i32, i32) {
    %c0_i32 = arith.constant 0 : i32
    %c0_i32_0 = arith.constant 0 : i32
    %c0_i32_1 = arith.constant 0 : i32
    return %c0_i32, %c0_i32_0 : i32, i32
  }
  func.func @transform_3(%arg0: i32) -> (i32, i32) {
    %c0_i32 = arith.constant 0 : i32
    %c0_i32_0 = arith.constant 0 : i32
    %c0_i32_1 = arith.constant 0 : i32
    return %c0_i32, %c0_i32_0 : i32, i32
  }
  func.func @transform_4(%arg0: i32) -> (i32, i32) {
    %c0_i32 = arith.constant 0 : i32
    %c0_i32_0 = arith.constant 0 : i32
    %c0_i32_1 = arith.constant 0 : i32
    return %c0_i32, %c0_i32_0 : i32, i32
  }
  func.func @transform_5(%arg0: i32) -> (i32, i32) {
    %c0_i32 = arith.constant 0 : i32
    %c0_i32_0 = arith.constant 0 : i32
    %c0_i32_1 = arith.constant 0 : i32
    return %c0_i32, %c0_i32_0 : i32, i32
  }
  func.func @transform_6(%arg0: i32) -> (i32, i32) {
    %c0_i32 = arith.constant 0 : i32
    %c0_i32_0 = arith.constant 0 : i32
    %c0_i32_1 = arith.constant 0 : i32
    return %c0_i32, %c0_i32_0 : i32, i32
  }
  func.func @transform_7(%arg0: i32) -> (i32, i32) {
    %c0_i32 = arith.constant 0 : i32
    %c0_i32_0 = arith.constant 0 : i32
    return %arg0, %c0_i32 : i32, i32
  }
}

</mosaic_0001>

<bundles_post_ra>
// kernel: _bert_layer_2d.1
= control target key start
LH: loop header
LB: loop body
LE: loop exit
PB: predicated region body
PF: predicated region fallthrough
CT: control target
= control target key end

     0   :  { %s4240_s0 = inlined_call_operand.vmem [shape: f32[16,256], index: 0, kind: input, shape index: {}]   ;;  %s4241_s1 = inlined_call_operand.vmem [shape: bf16[256,256], index: 1, kind: input, shape index: {}]   ;;  %s4242_s2 = inlined_call_operand.vmem [shape: f32[1,256], index: 2, kind: input, shape index: {}]   ;;  %s4243_s3 = inlined_call_operand.vmem [shape: bf16[256,512], index: 3, kind: input, shape index: {}]   ;;  %s4244_s4 = inlined_call_operand.vmem [shape: f32[1,512], index: 4, kind: input, shape index: {}]   ;;  %s4245_s5 = inlined_call_operand.vmem [shape: bf16[512,256], index: 5, kind: input, shape index: {}]   ;;  %s4246_s6 = inlined_call_operand.vmem [shape: f32[1,256], index: 6, kind: input, shape index: {}]   ;;  %s4247_s7 = inlined_call_operand.hbm [shape: f32[16,256], index: 7, kind: output, shape index: {}]  }
   0x1   :  { %v2713_v0 = vld [vmem:[%s4240_s0] sm:$0xff]  ;;  %v2718_v1 = vld [vmem:[%s4240_s0 + $0x8] sm:$0xff] }
   0x2   :  { %v31_v2 = vadd.f32 %v2718_v1, %v2713_v0  ;;  %v46_v3 = vmul.f32 %v2713_v0, %v2713_v0  ;;  %v47_v4 = vmul.f32 %v2718_v1, %v2718_v1 }
   0x3   :  { %12 = vsyncpa [#allocation3], 0  ;;  %v2729_v5 = vld [vmem:[%s4240_s0 + $0x10] sm:$0xff]  ;;  %v2734_v6 = vld [vmem:[%s4240_s0 + $0x18] sm:$0xff]  ;;  %v2666_v12 = vmov 256.0   ;;  %s1790_s21 = sshll.u32 %s4247_s7, 4  ;;  %s1791_s21 = int_to_ptr.hbm [resolvable:$true] %s1790_s21 }
   0x4   :  { %32 = vadd.xlane.f32.xlu0 %v31_v2  ;;  %v50_v7 = vadd.f32 %v47_v4, %v46_v3  ;;  %v48_v8 = vmul.f32 %v2729_v5, %v2729_v5  ;;  %v49_v9 = vmul.f32 %v2734_v6, %v2734_v6  ;;  %v34_v10 = vadd.f32 %v2734_v6, %v2729_v5  ;;  %v1860_v13 = vld [vmem:[%s4241_s1 + $0x70] sm:$0xf]  ;;  %v2465_v14 = vld [vmem:[%s4241_s1 + $0x74] sm:$0xf0]  ;;  %v2464_v18 = vld [vmem:[%s4241_s1 + $0x74] sm:$0xf] }
   0x5   :  { %2614 = vrcp.f32 %v2666_v12  ;;  %v1924_v15 = vld [vmem:[%s4241_s1 + $0xf0] sm:$0xf]  ;;  %v1861_v16 = vor.u32 %v2465_v14, %v1860_v13  ;;  %v2481_v17 = vld [vmem:[%s4241_s1 + $0xf4] sm:$0xf0]  ;;  %v1862_v19 = vld [vmem:[%s4241_s1 + $0x78] sm:$0xf0] }
   0x6   :  { %51 = vadd.xlane.f32.xlu1 %v50_v7  ;;  %v53_v11 = vadd.f32 %v49_v9, %v48_v8  ;;  %v1925_v20 = vor.u32 %v2481_v17, %v1924_v15  ;;  %v1865_v21 = vor.u32 %v2464_v18, %v1862_v19  ;;  %v2480_v22 = vld [vmem:[%s4241_s1 + $0xf4] sm:$0xf]  ;;  %v1926_v23 = vld [vmem:[%s4241_s1 + $0xf8] sm:$0xf0]  ;;  %v1852_v26 = vld [vmem:[%s4241_s1 + $0x60] sm:$0xf] }
   0x7   :  { %294 = vmatpush.bf16.msra.mxu0 %v1861_v16  ;;  %v1929_v24 = vor.u32 %v2480_v22, %v1926_v23  ;;  %v2463_v27 = vld [vmem:[%s4241_s1 + $0x64] sm:$0xf0]  ;;  %v1916_v28 = vld [vmem:[%s4241_s1 + $0xe0] sm:$0xf]  ;;  %v2462_v31 = vld [vmem:[%s4241_s1 + $0x64] sm:$0xf] }
   0x8   :  { %308 = vmatpush.bf16.msra.mxu1 %v1925_v20  ;;  %322 = vmatpush.bf16.msra.mxu2 %v1865_v21  ;;  %v1853_v29 = vor.u32 %v2463_v27, %v1852_v26  ;;  %v2479_v30 = vld [vmem:[%s4241_s1 + $0xe4] sm:$0xf0]  ;;  %v1854_v32 = vld [vmem:[%s4241_s1 + $0x68] sm:$0xf0]  ;;  %v2478_v36 = vld [vmem:[%s4241_s1 + $0xe4] sm:$0xf] }
   0x9   :  { %336 = vmatpush.bf16.msra.mxu3 %v1929_v24  ;;  %v1917_v34 = vor.u32 %v2479_v30, %v1916_v28  ;;  %v1857_v35 = vor.u32 %v2462_v31, %v1854_v32  ;;  %v1918_v37 = vld [vmem:[%s4241_s1 + $0xe8] sm:$0xf0]  ;;  %v1844_v39 = vld [vmem:[%s4241_s1 + $0x50] sm:$0xf]  ;;  %v2461_v40 = vld [vmem:[%s4241_s1 + $0x54] sm:$0xf0] }
   0xa   :  { %v1921_v38 = vor.u32 %v2478_v36, %v1918_v37  ;;  %v1908_v41 = vld [vmem:[%s4241_s1 + $0xd0] sm:$0xf]  ;;  %v1845_v42 = vor.u32 %v2461_v40, %v1844_v39  ;;  %v2477_v43 = vld [vmem:[%s4241_s1 + $0xd4] sm:$0xf0]  ;;  %v2460_v44 = vld [vmem:[%s4241_s1 + $0x54] sm:$0xf] }
   0xb   :  { %v2766_v25 = vpop.eup %2614  ;;  %295 = vmatpush.bf16.msra.mxu0 %v1853_v29  ;;  %v1846_v45 = vld [vmem:[%s4241_s1 + $0x58] sm:$0xf0]  ;;  %v1909_v47 = vor.u32 %v2477_v43, %v1908_v41  ;;  %v2476_v49 = vld [vmem:[%s4241_s1 + $0xd4] sm:$0xf]  ;;  %v1836_v52 = vld [vmem:[%s4241_s1 + $0x40] sm:$0xf] }
   0xc   :  { %35 = vadd.xlane.f32.xlu0 %v34_v10  ;;  %v38_v33 = vmul.f32 256.0, %v2766_v25  ;;  %309 = vmatpush.bf16.msra.mxu1 %v1917_v34  ;;  %v1849_v48 = vor.u32 %v2460_v44, %v1846_v45  ;;  %v1910_v50 = vld [vmem:[%s4241_s1 + $0xd8] sm:$0xf0]  ;;  %v2459_v53 = vld [vmem:[%s4241_s1 + $0x44] sm:$0xf0]  ;;  %vm42_vm0 = vweird.f32 %v2766_v25  ;;  %s2668_s22 = smov 256  }
   0xd   :  { %323 = vmatpush.bf16.msra.mxu2 %v1857_v35  ;;  %337 = vmatpush.bf16.msra.mxu3 %v1921_v38  ;;  %v1913_v51 = vor.u32 %v2476_v49, %v1910_v50  ;;  %v1900_v54 = vld [vmem:[%s4241_s1 + $0xc0] sm:$0xf]  ;;  %v1837_v55 = vor.u32 %v2459_v53, %v1836_v52  ;;  %v2475_v56 = vld [vmem:[%s4241_s1 + $0xc4] sm:$0xf0]  ;;  %v2458_v57 = vld [vmem:[%s4241_s1 + $0x44] sm:$0xf] }
   0xe   :  { %54 = vadd.xlane.f32.xlu1 %v53_v11  ;;  %v39_v46 = vsub.f32 1.0, %v38_v33  ;;  %v1838_v58 = vld [vmem:[%s4241_s1 + $0x48] sm:$0xf0]  ;;  %v1901_v60 = vor.u32 %v2475_v56, %v1900_v54  ;;  %v2474_v62 = vld [vmem:[%s4241_s1 + $0xc4] sm:$0xf]  ;;  %s2669_s23 = smov 16  }
   0xf   :  { %296 = vmatpush.bf16.msra.mxu0 %v1845_v42  ;;  %v1841_v61 = vor.u32 %v2458_v57, %v1838_v58  ;;  %v1902_v63 = vld [vmem:[%s4241_s1 + $0xc8] sm:$0xf0]  ;;  %v1828_v3 = vld [vmem:[%s4241_s1 + $0x30] sm:$0xf]  ;;  %v2457_v4 = vld [vmem:[%s4241_s1 + $0x34] sm:$0xf0] }
  0x10   :  { %310 = vmatpush.bf16.msra.mxu1 %v1909_v47  ;;  %v40_v59 = vmul.f32 %v2766_v25, %v39_v46  ;;  %v1905_v2 = vor.u32 %v2474_v62, %v1902_v63  ;;  %v1892_v7 = vld [vmem:[%s4241_s1 + $0xb0] sm:$0xf]  ;;  %v1829_v8 = vor.u32 %v2457_v4, %v1828_v3  ;;  %v2473_v9 = vld [vmem:[%s4241_s1 + $0xb4] sm:$0xf0]  ;;  %v2456_v10 = vld [vmem:[%s4241_s1 + $0x34] sm:$0xf] }
  0x11   :  { %324 = vmatpush.bf16.msra.mxu2 %v1849_v48  ;;  %338 = vmatpush.bf16.msra.mxu3 %v1913_v51  ;;  %v1830_v11 = vld [vmem:[%s4241_s1 + $0x38] sm:$0xf0]  ;;  %v1893_v13 = vor.u32 %v2473_v9, %v1892_v7  ;;  %v2472_v15 = vld [vmem:[%s4241_s1 + $0xb4] sm:$0xf]  ;;  %v1820_v18 = vld [vmem:[%s4241_s1 + $0x20] sm:$0xf] }
  0x12   :  { %v41_v12 = vadd.f32 %v2766_v25, %v40_v59  ;;  %v1833_v14 = vor.u32 %v2456_v10, %v1830_v11  ;;  %v1894_v16 = vld [vmem:[%s4241_s1 + $0xb8] sm:$0xf0]  ;;  %v2455_v19 = vld [vmem:[%s4241_s1 + $0x24] sm:$0xf0]  ;;  %v1884_v20 = vld [vmem:[%s4241_s1 + $0xa0] sm:$0xf] }
  0x13   :  { %297 = vmatpush.bf16.msra.mxu0 %v1837_v55  ;;  %v1897_v17 = vor.u32 %v2472_v15, %v1894_v16  ;;  %v1821_v21 = vor.u32 %v2455_v19, %v1820_v18  ;;  %v2471_v22 = vld [vmem:[%s4241_s1 + $0xa4] sm:$0xf0]  ;;  %v2454_v23 = vld [vmem:[%s4241_s1 + $0x24] sm:$0xf]  ;;  %v1822_v24 = vld [vmem:[%s4241_s1 + $0x28] sm:$0xf0] }
  0x14   :  { %311 = vmatpush.bf16.msra.mxu1 %v1901_v60  ;;  %v2887_v26 = vsel %vm42_vm0, %v2766_v25, %v41_v12  ;;  %v1885_v27 = vor.u32 %v2471_v22, %v1884_v20  ;;  %v1825_v28 = vor.u32 %v2454_v23, %v1822_v24  ;;  %v2470_v29 = vld [vmem:[%s4241_s1 + $0xa4] sm:$0xf]  ;;  %v1886_v30 = vld [vmem:[%s4241_s1 + $0xa8] sm:$0xf0]  ;;  %v1812_v32 = vld [vmem:[%s4241_s1 + $0x10] sm:$0xf] }
  0x15   :  { %325 = vmatpush.bf16.msra.mxu2 %v1841_v61  ;;  %339 = vmatpush.bf16.msra.mxu3 %v1905_v2  ;;  %v1889_v31 = vor.u32 %v2470_v29, %v1886_v30  ;;  %v2453_v25 = vld [vmem:[%s4241_s1 + $0x14] sm:$0xf0]  ;;  %v1876_v33 = vld [vmem:[%s4241_s1 + $0x90] sm:$0xf]  ;;  %v2452_v37 = vld [vmem:[%s4241_s1 + $0x14] sm:$0xf] }
  0x16   :  { %v1813_v35 = vor.u32 %v2453_v25, %v1812_v32  ;;  %v2469_v36 = vld [vmem:[%s4241_s1 + $0x94] sm:$0xf0]  ;;  %v1814_v38 = vld [vmem:[%s4241_s1 + $0x18] sm:$0xf0]  ;;  %v2468_v42 = vld [vmem:[%s4241_s1 + $0x94] sm:$0xf] }
  0x17   :  { %298 = vmatpush.bf16.msra.mxu0 %v1829_v8  ;;  %v1877_v40 = vor.u32 %v2469_v36, %v1876_v33  ;;  %v1817_v41 = vor.u32 %v2452_v37, %v1814_v38  ;;  %v1878_v43 = vld [vmem:[%s4241_s1 + $0x98] sm:$0xf0]  ;;  %v1804_v44 = vld [vmem:[%s4241_s1] sm:$0xf]  ;;  %v2451_v47 = vld [vmem:[%s4241_s1 + $0x4] sm:$0xf0] }
  0x18   :  { %312 = vmatpush.bf16.msra.mxu1 %v1893_v13  ;;  %v1881_v46 = vor.u32 %v2468_v42, %v1878_v43  ;;  %v1868_v48 = vld [vmem:[%s4241_s1 + $0x80] sm:$0xf]  ;;  %v2467_v49 = vld [vmem:[%s4241_s1 + $0x84] sm:$0xf0]  ;;  %v2450_v52 = vld [vmem:[%s4241_s1 + $0x4] sm:$0xf]  ;;  %v1805_v55 = vor.u32 %v2451_v47, %v1804_v44 }
  0x19   :  { %326 = vmatpush.bf16.msra.mxu2 %v1833_v14  ;;  %340 = vmatpush.bf16.msra.mxu3 %v1897_v17  ;;  %v1806_v53 = vld [vmem:[%s4241_s1 + $0x8] sm:$0xf0]  ;;  %v2466_v54 = vld [vmem:[%s4241_s1 + $0x84] sm:$0xf]  ;;  %v1869_v56 = vor.u32 %v2467_v49, %v1868_v48  ;;  %v128_v36 = vld [vmem:[%s4242_s2] sm:$0x3] }
  0x1a   :  { %v1809_v57 = vor.u32 %v2450_v52, %v1806_v53  ;;  %v1870_v58 = vld [vmem:[%s4241_s1 + $0x88] sm:$0xf0]  ;;  %v2044_v37 = vld [vmem:[%s4243_s3 + $0xe0] sm:$0xf]  ;;  %v2512_v38 = vld [vmem:[%s4243_s3 + $0xec] sm:$0xf0] }
  0x1b   :  { %299 = vmatpush.bf16.msra.mxu0 %v1821_v21  ;;  %v1873_v60 = vor.u32 %v2466_v54, %v1870_v58  ;;  %v2510_v42 = vld [vmem:[%s4243_s3 + $0xe4] sm:$0xf]  ;;  %v2046_v43 = vld [vmem:[%s4243_s3 + $0xf0] sm:$0xf0]  ;;  %v130_v49 = vperm.slane %v128_v36, 0  ;;  %v131_v53 = vperm.slane %v128_v36, 1 }
  0x1c   :  { %313 = vmatpush.bf16.msra.mxu1 %v1885_v27  ;;  %v2174_v47 = vld [vmem:[%s4243_s3 + $0x1f0] sm:$0xf0] }
  0x1d   :  { %327 = vmatpush.bf16.msra.mxu2 %v1825_v28  ;;  %341 = vmatpush.bf16.msra.mxu3 %v1889_v31 }
  0x1f   :  { %300 = vmatpush.bf16.msra.mxu0 %v1813_v35 }
  0x20   :  { %314 = vmatpush.bf16.msra.mxu1 %v1877_v40  ;;  %v2045_v40 = vor.u32 %v2512_v38, %v2044_v37  ;;  %v2534_v37 = vld [vmem:[%s4243_s3 + $0x1a4] sm:$0xf]  ;;  %v2142_v38 = vld [vmem:[%s4243_s3 + $0x1b0] sm:$0xf0] }
  0x21   :  { %328 = vmatpush.bf16.msra.mxu2 %v1817_v41  ;;  %342 = vmatpush.bf16.msra.mxu3 %v1881_v46  ;;  %v2544_v41 = vld [vmem:[%s4243_s3 + $0x1ec] sm:$0xf0]  ;;  %v2542_v46 = vld [vmem:[%s4243_s3 + $0x1e4] sm:$0xf] }
  0x22   :  { %v2177_v48 = vor.u32 %v2542_v46, %v2174_v47  ;;  %v1998_v46 = vld [vmem:[%s4243_s3 + $0x90] sm:$0xf0] }
  0x23   :  { %301 = vmatpush.bf16.msra.mxu0 %v1805_v55 }
  0x24   :  { %315 = vmatpush.bf16.msra.mxu1 %v1869_v56 }
  0x25   :  { %329 = vmatpush.bf16.msra.mxu2 %v1809_v57  ;;  %343 = vmatpush.bf16.msra.mxu3 %v1873_v60 }
  0x27   :  { %806 = vmatpush.bf16.msrb.mxu0 %v2045_v40  ;;  %v1996_v40 = vld [vmem:[%s4243_s3 + $0x80] sm:$0xf] }
  0x29   :  { %848 = vmatpush.bf16.msrb.mxu3 %v2177_v48 }
  0x77   :  { %v33_v34 = vpop.xlane.xlu0 %32 }
  0x78   :  { %v2914_v39 = vmul.f32 %v2887_v26, %v33_v34 }
  0x79   :  { %v52_v45 = vpop.xlane.xlu1 %51 }
  0x7a   :  { %v56_v50 = vmul.f32 %v52_v45, %v2887_v26  ;;  %v58_v51 = vmul.f32 %v2914_v39, %v2914_v39  ;;  %v64_v24 = vsub.f32 %v2713_v0, %v2914_v39  ;;  %v65_v27 = vsub.f32 %v2718_v1, %v2914_v39  ;;  %v2172_v39 = vld [vmem:[%s4243_s3 + $0x1e0] sm:$0xf] }
  0x7b   :  { %v2173_v44 = vor.u32 %v2544_v41, %v2172_v39  ;;  %v2049_v45 = vor.u32 %v2510_v42, %v2046_v43  ;;  %v2145_v39 = vor.u32 %v2534_v37, %v2142_v38  ;;  %v2500_v41 = vld [vmem:[%s4243_s3 + $0x8c] sm:$0xf0]  ;;  %v2124_v42 = vld [vmem:[%s4243_s3 + $0x180] sm:$0xf]  ;;  %v2514_v38 = vld [vmem:[%s4243_s3 + $0x104] sm:$0xf] }
  0x7c   :  { %v60_v59 = vsub.f32 %v56_v50, %v58_v51  ;;  %v1997_v43 = vor.u32 %v2500_v41, %v1996_v40  ;;  %v2052_v40 = vld [vmem:[%s4243_s3 + $0xe8] sm:$0xf] }
  0x7d   :  { %820 = vmatpush.bf16.msrb.mxu1 %v2173_v44  ;;  %834 = vmatpush.bf16.msrb.mxu2 %v2049_v45  ;;  %v2532_v44 = vld [vmem:[%s4243_s3 + $0x18c] sm:$0xf0]  ;;  %v2498_v45 = vld [vmem:[%s4243_s3 + $0x84] sm:$0xf] }
  0x7e   :  { %v62_v61 = vmax.f32 %v60_v59, 0.0  ;;  %v2125_v47 = vor.u32 %v2532_v44, %v2124_v42  ;;  %v2001_v48 = vor.u32 %v2498_v45, %v1998_v46  ;;  %v2513_v42 = vld [vmem:[%s4243_s3 + $0xf4] sm:$0xf0] }
  0x7f   :  { %v36_v62 = vpop.xlane.xlu0 %35  ;;  %v2545_v44 = vld [vmem:[%s4243_s3 + $0x1f4] sm:$0xf0]  ;;  %v2053_v45 = vor.u32 %v2513_v42, %v2052_v40  ;;  %v1988_v40 = vld [vmem:[%s4243_s3 + $0x68] sm:$0xf] }
  0x80   :  { %v68_v63 = vadd.f32 1e-05, %v62_v61  ;;  %v45_v2 = vmul.f32 %v2887_v26, %v36_v62 }
  0x81   :  { %v55_v3 = vpop.xlane.xlu1 %54 }
  0x82   :  { %2616 = vrsqrt.f32 %v68_v63  ;;  %v57_v4 = vmul.f32 %v55_v3, %v2887_v26  ;;  %v59_v7 = vmul.f32 %v45_v2, %v45_v2  ;;  %vm76_vm2 = vweird.f32 %v68_v63 }
  0x83   :  { %v66_v28 = vsub.f32 %v2729_v5, %v45_v2  ;;  %v67_v29 = vsub.f32 %v2734_v6, %v45_v2 }
  0x84   :  { %v61_v8 = vsub.f32 %v57_v4, %v59_v7 }
  0x86   :  { %v63_v9 = vmax.f32 %v61_v8, 0.0 }
  0x88   :  { %v2617_v10 = vpop.eup %2616  ;;  %v69_v12 = vadd.f32 1e-05, %v63_v9 }
  0x89   :  { %v71_v11 = vmul.f32 %v2617_v10, %v68_v63  ;;  %vm77_vm1 = vweird.f32 %v2617_v10 }
  0x8a   :  { %2618 = vrsqrt.f32 %v69_v12  ;;  %vm78_vm4 = vmor %vm76_vm2, %vm77_vm1  ;;  %vm86_vm5 = vweird.f32 %v69_v12 }
  0x8b   :  { %v72_v13 = vmul.f32 %v2617_v10, %v71_v11 }
  0x8d   :  { %v73_v14 = vmul.f32 0.5, %v72_v13 }
  0x8f   :  { %v74_v17 = vsub.f32 1.5, %v73_v14 }
  0x90   :  { %v2619_v15 = vpop.eup %2618 }
  0x91   :  { %v81_v16 = vmul.f32 %v2619_v15, %v69_v12  ;;  %v75_v20 = vmul.f32 %v2617_v10, %v74_v17  ;;  %vm87_vm3 = vweird.f32 %v2619_v15  ;;  %v2156_v17 = vld [vmem:[%s4243_s3 + $0x1c0] sm:$0xf] }
  0x92   :  { %vm88_vm6 = vmor %vm86_vm5, %vm87_vm3 }
  0x93   :  { %v82_v18 = vmul.f32 %v2619_v15, %v81_v16  ;;  %v79_v22 = vsel %vm78_vm4, %v2617_v10, %v75_v20  ;;  %v2506_v20 = vld [vmem:[%s4243_s3 + $0xc4] sm:$0xf] }
  0x94   :  { %v90_v31 = vmul.f32 %v79_v22, %v64_v24  ;;  %v91_v25 = vmul.f32 %v79_v22, %v65_v27  ;;  %v2538_v24 = vld [vmem:[%s4243_s3 + $0x1c4] sm:$0xf]  ;;  %v2158_v27 = vld [vmem:[%s4243_s3 + $0x1d0] sm:$0xf0] }
  0x95   :  { %v83_v19 = vmul.f32 0.5, %v82_v18 }
  0x97   :  { %v84_v21 = vsub.f32 1.5, %v83_v19  ;;  %v2540_v19 = vld [vmem:[%s4243_s3 + $0x1cc] sm:$0xf0] }
  0x98   :  { %v2157_v22 = vor.u32 %v2540_v19, %v2156_v17  ;;  %v2488_v17 = vld [vmem:[%s4243_s3 + $0x2c] sm:$0xf0] }
  0x99   :  { %v85_v23 = vmul.f32 %v2619_v15, %v84_v21  ;;  %v2030_v21 = vld [vmem:[%s4243_s3 + $0xd0] sm:$0xf0] }
  0x9a   :  { %821 = vmatpush.bf16.msrb.mxu1 %v2157_v22  ;;  %v1950_v22 = vld [vmem:[%s4243_s3 + $0x30] sm:$0xf0] }
  0x9b   :  { %v89_v30 = vsel %vm88_vm6, %v2619_v15, %v85_v23  ;;  %v2033_v23 = vor.u32 %v2506_v20, %v2030_v21  ;;  %v2520_v20 = vld [vmem:[%s4243_s3 + $0x12c] sm:$0xf0]  ;;  %v2486_v21 = vld [vmem:[%s4243_s3 + $0x24] sm:$0xf] }
  0x9c   :  { %v92_v32 = vmul.f32 %v89_v30, %v66_v28  ;;  %v93_v33 = vmul.f32 %v89_v30, %v67_v29  ;;  %v2161_v28 = vor.u32 %v2538_v24, %v2158_v27  ;;  %v2012_v29 = vld [vmem:[%s4243_s3 + $0xa0] sm:$0xf]  ;;  %v2504_v30 = vld [vmem:[%s4243_s3 + $0xac] sm:$0xf0]  ;;  %v1953_v24 = vor.u32 %v2486_v21, %v1950_v22  ;;  %v2518_v27 = vld [vmem:[%s4243_s3 + $0x124] sm:$0xf] }
  0x9d   :  { %835 = vmatpush.bf16.msrb.mxu2 %v2033_v23  ;;  %v2004_v21 = vld [vmem:[%s4243_s3 + $0x88] sm:$0xf]  ;;  %v2501_v22 = vld [vmem:[%s4243_s3 + $0x94] sm:$0xf0] }
  0x9e   :  { %v94_v34 = vpack.c.bf16 %v92_v32, %v90_v31  ;;  %v95_v35 = vpack.c.bf16 %v93_v33, %v91_v25  ;;  %v2140_v31 = vld [vmem:[%s4243_s3 + $0x1a0] sm:$0xf]  ;;  %849 = vmatpush.bf16.msrb.mxu3 %v2161_v28  ;;  %v2013_v32 = vor.u32 %v2504_v30, %v2012_v29  ;;  %v2536_v25 = vld [vmem:[%s4243_s3 + $0x1ac] sm:$0xf0]  ;;  %v2502_v33 = vld [vmem:[%s4243_s3 + $0xa4] sm:$0xf] }
  0x9f   :  { %v2078_v28 = vld [vmem:[%s4243_s3 + $0x130] sm:$0xf0]  ;;  %v1932_v30 = vld [vmem:[%s4243_s3] sm:$0xf] }
  0xa0   :  { %302 = vmatmul.bf16.vlgmr.msra.gmra.mxu0 %v94_v34  ;;  %316 = vmatmul.bf16.vlgmr.msra.gmra.mxu1 %v95_v35  ;;  %v2081_v29 = vor.u32 %v2518_v27, %v2078_v28  ;;  %v2533_v27 = vld [vmem:[%s4243_s3 + $0x194] sm:$0xf0]  ;;  %v2499_v28 = vld [vmem:[%s4243_s3 + $0x8c] sm:$0xf] }
  0xa1   :  { %330 = vmatmul.bf16.vlgmr.msra.gmra.mxu2 %v94_v34  ;;  %344 = vmatmul.bf16.vlgmr.msra.gmra.mxu3 %v95_v35  ;;  %v2014_v34 = vld [vmem:[%s4243_s3 + $0xb0] sm:$0xf0]  ;;  %v2141_v35 = vor.u32 %v2536_v25, %v2140_v31  ;;  %v2484_v31 = vld [vmem:[%s4243_s3 + $0xc] sm:$0xf0] }
  0xa2   :  { %v2017_v36 = vor.u32 %v2502_v33, %v2014_v34  ;;  %850 = vmatpush.bf16.msrb.mxu3 %v2145_v39  ;;  %v1933_v25 = vor.u32 %v2484_v31, %v1932_v30  ;;  %v2516_v33 = vld [vmem:[%s4243_s3 + $0x10c] sm:$0xf0]  ;;  %v2482_v34 = vld [vmem:[%s4243_s3 + $0x4] sm:$0xf]  ;;  %v2062_v39 = vld [vmem:[%s4243_s3 + $0x110] sm:$0xf0]  ;;  %v2005_v31 = vor.u32 %v2501_v22, %v2004_v21 }
  0xa3   :  { %822 = vmatpush.bf16.msrb.mxu1 %v2141_v35  ;;  %v1934_v35 = vld [vmem:[%s4243_s3 + $0x10] sm:$0xf0]  ;;  %v2065_v41 = vor.u32 %v2514_v38, %v2062_v39 }
  0xa4   :  { %836 = vmatpush.bf16.msrb.mxu2 %v2017_v36  ;;  %v1937_v37 = vor.u32 %v2482_v34, %v1934_v35 }
  0xa7   :  { %823 = vmatpush.bf16.msrb.mxu1 %v2125_v47  ;;  %v2511_v47 = vld [vmem:[%s4243_s3 + $0xec] sm:$0xf] }
  0xa8   :  { %837 = vmatpush.bf16.msrb.mxu2 %v2001_v48  ;;  %v2054_v48 = vld [vmem:[%s4243_s3 + $0xf8] sm:$0xf0] }
 0x11d   :  { %v303_v50 = vpop.f32.mrf.mxu0  ;;  %v317_v52 = vpop.f32.mrf.mxu1 }
 0x11e   :  { %v304_v51 = vadd.f32 %v303_v50, %v130_v49  ;;  %v2126_v50 = vld [vmem:[%s4243_s3 + $0x190] sm:$0xf0] }
 0x120   :  { %v318_v54 = vadd.f32 %v317_v52, %v304_v51  ;;  %v1980_v52 = vld [vmem:[%s4243_s3 + $0x60] sm:$0xf] }
 0x122   :  { %v2985_v59 = vadd.f32 %v318_v54, %v2713_v0  ;;  %v2108_v54 = vld [vmem:[%s4243_s3 + $0x160] sm:$0xf] }
 0x124   :  { %v331_v55 = vpop.f32.mrf.mxu2  ;;  %v345_v56 = vpop.f32.mrf.mxu3  ;;  %v362_v4 = vmul.f32 %v2985_v59, %v2985_v59 }
 0x125   :  { %v332_v57 = vadd.f32 %v331_v55, %v131_v53  ;;  %v305_v58 = vpop.f32.mrf.mxu0  ;;  %v319_v63 = vpop.f32.mrf.mxu1 }
 0x126   :  { %v306_v61 = vadd.f32 %v305_v58, %v130_v49  ;;  %v2530_v49 = vld [vmem:[%s4243_s3 + $0x184] sm:$0xf]  ;;  %v1982_v58 = vld [vmem:[%s4243_s3 + $0x70] sm:$0xf0] }
 0x127   :  { %v346_v60 = vadd.f32 %v345_v56, %v332_v57  ;;  %v2129_v51 = vor.u32 %v2530_v49, %v2126_v50  ;;  %v2528_v56 = vld [vmem:[%s4243_s3 + $0x16c] sm:$0xf0]  ;;  %v2494_v57 = vld [vmem:[%s4243_s3 + $0x64] sm:$0xf]  ;;  %v2543_v49 = vld [vmem:[%s4243_s3 + $0x1ec] sm:$0xf]  ;;  %v2057_v50 = vor.u32 %v2511_v47, %v2054_v48 }
 0x128   :  { %v320_v2 = vadd.f32 %v319_v63, %v306_v61  ;;  %v1985_v61 = vor.u32 %v2494_v57, %v1982_v58  ;;  %v2526_v63 = vld [vmem:[%s4243_s3 + $0x164] sm:$0xf]  ;;  %v2541_v57 = vld [vmem:[%s4243_s3 + $0x1d4] sm:$0xf0]  ;;  %v2507_v58 = vld [vmem:[%s4243_s3 + $0xcc] sm:$0xf] }
 0x129   :  { %v2988_v62 = vadd.f32 %v346_v60, %v2718_v1  ;;  %851 = vmatpush.bf16.msrb.mxu3 %v2129_v51  ;;  %v2109_v60 = vor.u32 %v2528_v56, %v2108_v54  ;;  %v2182_v51 = vld [vmem:[%s4243_s3 + $0x1f8] sm:$0xf0]  ;;  %v2164_v56 = vld [vmem:[%s4243_s3 + $0x1c8] sm:$0xf]  ;;  %v2527_v48 = vld [vmem:[%s4243_s3 + $0x16c] sm:$0xf] }
 0x12a   :  { %v2997_v11 = vadd.f32 %v320_v2, %v2729_v5  ;;  %v2028_v5 = vld [vmem:[%s4243_s3 + $0xc0] sm:$0xf]  ;;  %v2110_v2 = vld [vmem:[%s4243_s3 + $0x170] sm:$0xf0]  ;;  %838 = vmatpush.bf16.msrb.mxu2 %v1985_v61  ;;  %v2185_v54 = vor.u32 %v2543_v49, %v2182_v51  ;;  %v2038_v61 = vld [vmem:[%s4243_s3 + $0xd8] sm:$0xf0] }
 0x12b   :  { %v354_v3 = vadd.f32 %v2988_v62, %v2985_v59  ;;  %v363_v7 = vmul.f32 %v2988_v62, %v2988_v62  ;;  %824 = vmatpush.bf16.msrb.mxu1 %v2109_v60  ;;  %v2165_v60 = vor.u32 %v2541_v57, %v2164_v56  ;;  %v1990_v47 = vld [vmem:[%s4243_s3 + $0x78] sm:$0xf0]  ;;  %v2100_v56 = vld [vmem:[%s4243_s3 + $0x148] sm:$0xf] }
 0x12c   :  { %v333_v8 = vpop.f32.mrf.mxu2  ;;  %v347_v10 = vpop.f32.mrf.mxu3  ;;  %v364_v14 = vmul.f32 %v2997_v11, %v2997_v11  ;;  %v2118_v49 = vld [vmem:[%s4243_s3 + $0x178] sm:$0xf0] }
 0x12d   :  { %v334_v9 = vadd.f32 %v333_v8, %v131_v53  ;;  %355 = vadd.xlane.f32.xlu2 %v354_v3  ;;  %v366_v0 = vadd.f32 %v363_v7, %v362_v4  ;;  %v2496_v53 = vld [vmem:[%s4243_s3 + $0x6c] sm:$0xf0]  ;;  %v2113_v3 = vor.u32 %v2526_v63, %v2110_v2  ;;  %v1964_v4 = vld [vmem:[%s4243_s3 + $0x40] sm:$0xf]  ;;  %v2539_v63 = vld [vmem:[%s4243_s3 + $0x1cc] sm:$0xf]  ;;  %v2121_v57 = vor.u32 %v2527_v48, %v2118_v49 }
 0x12e   :  { %v1981_v55 = vor.u32 %v2496_v53, %v1980_v52  ;;  %v2492_v7 = vld [vmem:[%s4243_s3 + $0x4c] sm:$0xf0]  ;;  %v2092_v8 = vld [vmem:[%s4243_s3 + $0x140] sm:$0xf]  ;;  %v2036_v52 = vld [vmem:[%s4243_s3 + $0xc8] sm:$0xf] }
 0x12f   :  { %v348_v1 = vadd.f32 %v347_v10, %v334_v9  ;;  %367 = vadd.xlane.f32.xlu0 %v366_v0  ;;  %852 = vmatpush.bf16.msrb.mxu3 %v2113_v3  ;;  %v1965_v9 = vor.u32 %v2492_v7, %v1964_v4  ;;  %v2524_v0 = vld [vmem:[%s4243_s3 + $0x14c] sm:$0xf0]  ;;  %v2490_v10 = vld [vmem:[%s4243_s3 + $0x44] sm:$0xf]  ;;  %v2509_v53 = vld [vmem:[%s4243_s3 + $0xd4] sm:$0xf0]  ;;  %v2041_v3 = vor.u32 %v2507_v58, %v2038_v61 }
 0x130   :  { %v2166_v2 = vld [vmem:[%s4243_s3 + $0x1d8] sm:$0xf0]  ;;  %v2525_v58 = vld [vmem:[%s4243_s3 + $0x154] sm:$0xf0] }
 0x131   :  { %v3000_v12 = vadd.f32 %v348_v1, %v2734_v6  ;;  %v2508_v6 = vld [vmem:[%s4243_s3 + $0xcc] sm:$0xf0]  ;;  %v1966_v1 = vld [vmem:[%s4243_s3 + $0x50] sm:$0xf0]  ;;  %v2169_v4 = vor.u32 %v2539_v63, %v2166_v2  ;;  %v1974_v61 = vld [vmem:[%s4243_s3 + $0x58] sm:$0xf0]  ;;  %v2101_v2 = vor.u32 %v2525_v58, %v2100_v56 }
 0x132   :  { %v2029_v18 = vor.u32 %v2508_v6, %v2028_v5  ;;  %v1948_v6 = vld [vmem:[%s4243_s3 + $0x20] sm:$0xf] }
 0x133   :  { %v357_v13 = vadd.f32 %v3000_v12, %v2997_v11  ;;  %v365_v15 = vmul.f32 %v3000_v12, %v3000_v12  ;;  %v1949_v19 = vor.u32 %v2488_v17, %v1948_v6  ;;  %v2535_v17 = vld [vmem:[%s4243_s3 + $0x1ac] sm:$0xf] }
 0x134   :  { %807 = vmatpush.bf16.msrb.mxu0 %v2029_v18  ;;  %v2076_v18 = vld [vmem:[%s4243_s3 + $0x120] sm:$0xf] }
 0x135   :  { %358 = vadd.xlane.f32.xlu2 %v357_v13  ;;  %v369_v16 = vadd.f32 %v365_v15, %v364_v14  ;;  %v2093_v13 = vor.u32 %v2524_v0, %v2092_v8  ;;  %v1969_v14 = vor.u32 %v2490_v10, %v1966_v1  ;;  %v2522_v15 = vld [vmem:[%s4243_s3 + $0x144] sm:$0xf]  ;;  %v2077_v23 = vor.u32 %v2520_v20, %v2076_v18  ;;  %v2020_v8 = vld [vmem:[%s4243_s3 + $0xa8] sm:$0xf]  ;;  %v2150_v18 = vld [vmem:[%s4243_s3 + $0x1b8] sm:$0xf0] }
 0x136   :  { %v2148_v0 = vld [vmem:[%s4243_s3 + $0x1a8] sm:$0xf] }
 0x137   :  { %370 = vadd.xlane.f32.xlu1 %v369_v16  ;;  %v2094_v16 = vld [vmem:[%s4243_s3 + $0x150] sm:$0xf0]  ;;  %825 = vmatpush.bf16.msrb.mxu1 %v2093_v13  ;;  %v2537_v13 = vld [vmem:[%s4243_s3 + $0x1b4] sm:$0xf0] }
 0x138   :  { %808 = vmatpush.bf16.msrb.mxu0 %v2013_v32  ;;  %v2097_v5 = vor.u32 %v2522_v15, %v2094_v16  ;;  %839 = vmatpush.bf16.msrb.mxu2 %v1969_v14  ;;  %v2060_v32 = vld [vmem:[%s4243_s3 + $0x100] sm:$0xf]  ;;  %v2503_v14 = vld [vmem:[%s4243_s3 + $0xac] sm:$0xf]  ;;  %v2022_v15 = vld [vmem:[%s4243_s3 + $0xb8] sm:$0xf0] }
 0x139   :  { %v2061_v36 = vor.u32 %v2516_v33, %v2060_v32  ;;  %v2025_v6 = vor.u32 %v2503_v14, %v2022_v15  ;;  %v2134_v33 = vld [vmem:[%s4243_s3 + $0x198] sm:$0xf0]  ;;  %v2487_v15 = vld [vmem:[%s4243_s3 + $0x2c] sm:$0xf] }
 0x13a   :  { %853 = vmatpush.bf16.msrb.mxu3 %v2097_v5  ;;  %v2149_v5 = vor.u32 %v2537_v13, %v2148_v0  ;;  %v2489_v0 = vld [vmem:[%s4243_s3 + $0x34] sm:$0xf0] }
 0x13b   :  { %826 = vmatpush.bf16.msrb.mxu1 %v2077_v23  ;;  %v2132_v23 = vld [vmem:[%s4243_s3 + $0x188] sm:$0xf]  ;;  %v2521_v13 = vld [vmem:[%s4243_s3 + $0x134] sm:$0xf0] }
 0x13c   :  { %809 = vmatpush.bf16.msrb.mxu0 %v1997_v43  ;;  %840 = vmatpush.bf16.msrb.mxu2 %v1953_v24  ;;  %v2180_v43 = vld [vmem:[%s4243_s3 + $0x1e8] sm:$0xf]  ;;  %v2153_v24 = vor.u32 %v2535_v17, %v2150_v18  ;;  %v2133_v32 = vor.u32 %v2533_v27, %v2132_v23  ;;  %v2519_v17 = vld [vmem:[%s4243_s3 + $0x12c] sm:$0xf]  ;;  %v2086_v18 = vld [vmem:[%s4243_s3 + $0x138] sm:$0xf0] }
 0x13d   :  { %v2181_v46 = vor.u32 %v2545_v44, %v2180_v43  ;;  %v2116_v44 = vld [vmem:[%s4243_s3 + $0x168] sm:$0xf]  ;;  %v2089_v27 = vor.u32 %v2519_v17, %v2086_v18 }
 0x13e   :  { %854 = vmatpush.bf16.msrb.mxu3 %v2081_v29  ;;  %v2006_v29 = vld [vmem:[%s4243_s3 + $0x98] sm:$0xf0]  ;;  %v1940_v23 = vld [vmem:[%s4243_s3 + $0x8] sm:$0xf] }
 0x13f   :  { %827 = vmatpush.bf16.msrb.mxu1 %v2061_v36  ;;  %v2009_v34 = vor.u32 %v2499_v28, %v2006_v29  ;;  %v2068_v28 = vld [vmem:[%s4243_s3 + $0x108] sm:$0xf]  ;;  %v2517_v29 = vld [vmem:[%s4243_s3 + $0x114] sm:$0xf0] }
 0x140   :  { %810 = vmatpush.bf16.msrb.mxu0 %v1981_v55  ;;  %841 = vmatpush.bf16.msrb.mxu2 %v1937_v37  ;;  %v2037_v55 = vor.u32 %v2509_v53, %v2036_v52 }
 0x142   :  { %855 = vmatpush.bf16.msrb.mxu3 %v2065_v41  ;;  %v2497_v41 = vld [vmem:[%s4243_s3 + $0x74] sm:$0xf0] }
 0x143   :  { %876 = vmatpush.bf16.msra.mxu1 %v2181_v46  ;;  %v1989_v43 = vor.u32 %v2497_v41, %v1988_v40  ;;  %v2495_v46 = vld [vmem:[%s4243_s3 + $0x6c] sm:$0xf] }
 0x144   :  { %811 = vmatpush.bf16.msrb.mxu0 %v1965_v9  ;;  %890 = vmatpush.bf16.msra.mxu2 %v2057_v50  ;;  %v2505_v9 = vld [vmem:[%s4243_s3 + $0xb4] sm:$0xf0]  ;;  %v1993_v53 = vor.u32 %v2495_v46, %v1990_v47 }
 0x145   :  { %v2021_v1 = vor.u32 %v2505_v9, %v2020_v8  ;;  %v1956_v8 = vld [vmem:[%s4243_s3 + $0x28] sm:$0xf] }
 0x146   :  { %904 = vmatpush.bf16.msra.mxu3 %v2185_v54  ;;  %v1972_v54 = vld [vmem:[%s4243_s3 + $0x48] sm:$0xf] }
 0x147   :  { %877 = vmatpush.bf16.msra.mxu1 %v2165_v60  ;;  %v2491_v60 = vld [vmem:[%s4243_s3 + $0x4c] sm:$0xf] }
 0x148   :  { %812 = vmatpush.bf16.msrb.mxu0 %v1949_v19  ;;  %891 = vmatpush.bf16.msra.mxu2 %v2041_v3  ;;  %v1977_v3 = vor.u32 %v2491_v60, %v1974_v61 }
 0x14a   :  { %905 = vmatpush.bf16.msra.mxu3 %v2169_v4  ;;  %v2523_v4 = vld [vmem:[%s4243_s3 + $0x14c] sm:$0xf] }
 0x14b   :  { %878 = vmatpush.bf16.msra.mxu1 %v2149_v5 }
 0x14c   :  { %813 = vmatpush.bf16.msrb.mxu0 %v1933_v25  ;;  %v2531_v25 = vld [vmem:[%s4243_s3 + $0x18c] sm:$0xf]  ;;  %892 = vmatpush.bf16.msra.mxu2 %v2025_v6  ;;  %v1957_v6 = vor.u32 %v2489_v0, %v1956_v8 }
 0x14d   :  { %v2137_v36 = vor.u32 %v2531_v25, %v2134_v33  ;;  %v2515_v25 = vld [vmem:[%s4243_s3 + $0x10c] sm:$0xf]  ;;  %v2070_v33 = vld [vmem:[%s4243_s3 + $0x118] sm:$0xf0] }
 0x14e   :  { %906 = vmatpush.bf16.msra.mxu3 %v2153_v24  ;;  %v2485_v24 = vld [vmem:[%s4243_s3 + $0x14] sm:$0xf0]  ;;  %v2073_v40 = vor.u32 %v2515_v25, %v2070_v33 }
 0x14f   :  { %879 = vmatpush.bf16.msra.mxu1 %v2133_v32  ;;  %v1942_v32 = vld [vmem:[%s4243_s3 + $0x18] sm:$0xf0] }
 0x150   :  { %862 = vmatpush.bf16.msra.mxu0 %v2053_v45  ;;  %893 = vmatpush.bf16.msra.mxu2 %v2009_v34  ;;  %v2529_v45 = vld [vmem:[%s4243_s3 + $0x174] sm:$0xf0]  ;;  %v1941_v34 = vor.u32 %v2485_v24, %v1940_v23 }
 0x151   :  { %v2117_v52 = vor.u32 %v2529_v45, %v2116_v44 }
 0x152   :  { %907 = vmatpush.bf16.msra.mxu3 %v2137_v36 }
 0x153   :  { %880 = vmatpush.bf16.msra.mxu1 %v2117_v52 }
 0x154   :  { %863 = vmatpush.bf16.msra.mxu0 %v2037_v55  ;;  %v2493_v55 = vld [vmem:[%s4243_s3 + $0x54] sm:$0xf0]  ;;  %894 = vmatpush.bf16.msra.mxu2 %v1993_v53 }
 0x156   :  { %908 = vmatpush.bf16.msra.mxu3 %v2121_v57 }
 0x157   :  { %881 = vmatpush.bf16.msra.mxu1 %v2101_v2 }
 0x158   :  { %864 = vmatpush.bf16.msra.mxu0 %v2021_v1  ;;  %v2084_v1 = vld [vmem:[%s4243_s3 + $0x128] sm:$0xf]  ;;  %895 = vmatpush.bf16.msra.mxu2 %v1977_v3 }
 0x159   :  { %v2085_v21 = vor.u32 %v2521_v13, %v2084_v1 }
 0x15b   :  { %882 = vmatpush.bf16.msra.mxu1 %v2085_v21 }
 0x15c   :  { %865 = vmatpush.bf16.msra.mxu0 %v2005_v31 }
 0x160   :  { %866 = vmatpush.bf16.msra.mxu0 %v1989_v43 }
 0x1a0   :  { %v356_v7 = vpop.xlane.xlu2 %355 }
 0x1a1   :  { %v3234_v10 = vmul.f32 %v356_v7, %v2887_v26  ;;  %v2102_v7 = vld [vmem:[%s4243_s3 + $0x158] sm:$0xf0] }
 0x1a2   :  { %v368_v16 = vpop.xlane.xlu0 %367  ;;  %v2105_v9 = vor.u32 %v2523_v4, %v2102_v7 }
 0x1a3   :  { %v372_v19 = vmul.f32 %v368_v16, %v2887_v26  ;;  %v374_v20 = vmul.f32 %v3234_v10, %v3234_v10  ;;  %v1958_v16 = vld [vmem:[%s4243_s3 + $0x38] sm:$0xf0] }
 0x1a4   :  { %v1961_v22 = vor.u32 %v2487_v15, %v1958_v16  ;;  %909 = vmatpush.bf16.msra.mxu3 %v2105_v9 }
 0x1a5   :  { %v376_v30 = vsub.f32 %v372_v19, %v374_v20 }
 0x1a6   :  { %896 = vmatpush.bf16.msra.mxu2 %v1961_v22 }
 0x1a7   :  { %v378_v35 = vmax.f32 %v376_v30, 0.0  ;;  %v2483_v30 = vld [vmem:[%s4243_s3 + $0xc] sm:$0xf] }
 0x1a8   :  { %v359_v37 = vpop.xlane.xlu2 %358  ;;  %v1945_v36 = vor.u32 %v2483_v30, %v1942_v32  ;;  %910 = vmatpush.bf16.msra.mxu3 %v2089_v27 }
 0x1a9   :  { %v3278_v38 = vadd.f32 1e-05, %v378_v35  ;;  %v3281_v39 = vmul.f32 %v359_v37, %v2887_v26  ;;  %v2069_v35 = vor.u32 %v2517_v29, %v2068_v28 }
 0x1aa   :  { %v371_v42 = vpop.xlane.xlu1 %370  ;;  %897 = vmatpush.bf16.msra.mxu2 %v1945_v36 }
 0x1ab   :  { %2620 = vrsqrt.f32 %v3278_v38  ;;  %v373_v50 = vmul.f32 %v371_v42, %v2887_v26  ;;  %v375_v51 = vmul.f32 %v3281_v39, %v3281_v39  ;;  %v1973_v26 = vor.u32 %v2493_v55, %v1972_v54  ;;  %883 = vmatpush.bf16.msra.mxu1 %v2069_v35 }
 0x1ac   :  { %911 = vmatpush.bf16.msra.mxu3 %v2073_v40  ;;  %vm392_vm8 = vweird.f32 %v3278_v38  ;;  %v382_v52 = vsub.f32 %v2997_v11, %v3281_v39  ;;  %v383_v53 = vsub.f32 %v3000_v12, %v3281_v39 }
 0x1ad   :  { %v377_v63 = vsub.f32 %v373_v50, %v375_v51  ;;  %867 = vmatpush.bf16.msra.mxu0 %v1973_v26  ;;  %v380_v50 = vsub.f32 %v2985_v59, %v3234_v10  ;;  %v381_v51 = vsub.f32 %v2988_v62, %v3234_v10  ;;  %v3396_v10 = vld [vmem:[%s4244_s4] sm:$0xf] }
 0x1ae   :  { %v478_v39 = vperm.slane %v3396_v10, 0  ;;  %v479_v3 = vperm.slane %v3396_v10, 1  ;;  %v480_v28 = vperm.slane %v3396_v10, 2 }
 0x1af   :  { %v379_v14 = vmax.f32 %v377_v63, 0.0 }
 0x1b1   :  { %v2621_v5 = vpop.eup %2620  ;;  %v385_v20 = vadd.f32 1e-05, %v379_v14  ;;  %868 = vmatpush.bf16.msra.mxu0 %v1957_v6 }
 0x1b2   :  { %v387_v19 = vmul.f32 %v2621_v5, %v3278_v38  ;;  %vm393_vm7 = vweird.f32 %v2621_v5 }
 0x1b3   :  { %2622 = vrsqrt.f32 %v385_v20  ;;  %vm394_vm10 = vmor %vm392_vm8, %vm393_vm7  ;;  %vm402_vm11 = vweird.f32 %v385_v20 }
 0x1b4   :  { %v388_v31 = vmul.f32 %v2621_v5, %v387_v19 }
 0x1b5   :  { %869 = vmatpush.bf16.msra.mxu0 %v1941_v34  ;;  %v2252_v34 = vld [vmem:[%s4245_s5 + $0x70] sm:$0xf] }
 0x1b6   :  { %v389_v37 = vmul.f32 0.5, %v388_v31 }
 0x1b8   :  { %v390_v42 = vsub.f32 1.5, %v389_v37 }
 0x1b9   :  { %v2623_v41 = vpop.eup %2622 }
 0x1ba   :  { %v397_v43 = vmul.f32 %v2623_v41, %v385_v20  ;;  %v391_v45 = vmul.f32 %v2621_v5, %v390_v42  ;;  %vm403_vm9 = vweird.f32 %v2623_v41 }
 0x1bb   :  { %vm404_vm12 = vmor %vm402_vm11, %vm403_vm9 }
 0x1bc   :  { %v398_v44 = vmul.f32 %v2623_v41, %v397_v43  ;;  %v395_v49 = vsel %vm394_vm10, %v2621_v5, %v391_v45 }
 0x1bd   :  { %v406_v54 = vmul.f32 %v395_v49, %v380_v50  ;;  %v407_v56 = vmul.f32 %v395_v49, %v381_v51 }
 0x1be   :  { %v399_v46 = vmul.f32 0.5, %v398_v44  ;;  %v2561_v44 = vld [vmem:[%s4245_s5 + $0x74] sm:$0xf0] }
 0x1c0   :  { %v400_v47 = vsub.f32 1.5, %v399_v46 }
 0x1c2   :  { %v401_v48 = vmul.f32 %v2623_v41, %v400_v47 }
 0x1c4   :  { %v405_v38 = vsel %vm404_vm12, %v2623_v41, %v401_v48  ;;  %v2253_v48 = vor.u32 %v2561_v44, %v2252_v34 }
 0x1c5   :  { %v408_v55 = vmul.f32 %v405_v38, %v382_v52  ;;  %v409_v57 = vmul.f32 %v405_v38, %v383_v53 }
 0x1c7   :  { %v410_v26 = vpack.c.bf16 %v408_v55, %v406_v54  ;;  %v411_v58 = vpack.c.bf16 %v409_v57, %v407_v56 }
 0x1c9   :  { %814 = vmatmul.bf16.vlgmr.msrb.gmra.mxu0 %v410_v26  ;;  %828 = vmatmul.bf16.vlgmr.msrb.gmra.mxu1 %v411_v58 }
 0x1ca   :  { %842 = vmatmul.bf16.vlgmr.msrb.gmra.mxu2 %v410_v26  ;;  %856 = vmatmul.bf16.vlgmr.msrb.gmra.mxu3 %v411_v58 }
 0x1cb   :  { %1664 = vmatpush.bf16.msrb.mxu0 %v2253_v48 }
 0x1d9   :  { %870 = vmatmul.bf16.vlgmr.msra.gmra.mxu0 %v410_v26  ;;  %884 = vmatmul.bf16.vlgmr.msra.gmra.mxu1 %v411_v58 }
 0x1da   :  { %898 = vmatmul.bf16.vlgmr.msra.gmra.mxu2 %v410_v26  ;;  %912 = vmatmul.bf16.vlgmr.msra.gmra.mxu3 %v411_v58 }
 0x246   :  { %v815_v60 = vpop.f32.mrf.mxu0  ;;  %v829_v61 = vpop.f32.mrf.mxu1 }
 0x247   :  { %v816_v63 = vadd.f32 %v815_v60, %v478_v39 }
 0x249   :  { %v3399_v2 = vadd.f32 %v829_v61, %v816_v63 }
 0x24b   :  { %v3403_v4 = vmul.f32 0.70710677, %v3399_v2 }
 0x24d   :  { %v934_v7 = vmul.f32 %v3403_v4, %v3403_v4  ;;  %v843_v8 = vpop.f32.mrf.mxu2  ;;  %v857_v0 = vpop.f32.mrf.mxu3 }
 0x24e   :  { %v844_v9 = vadd.f32 %v843_v8, %v479_v3  ;;  %v817_v1 = vpop.f32.mrf.mxu0  ;;  %v831_v16 = vpop.f32.mrf.mxu1 }
 0x24f   :  { %v3407_v13 = vmin.f32 %v934_v7, 16.0  ;;  %v818_v14 = vadd.f32 %v817_v1, %v478_v39 }
 0x250   :  { %v3409_v15 = vadd.f32 %v857_v0, %v844_v9 }
 0x251   :  { %v936_v5 = vmul.f32 2.1237322e-06, %v3407_v13  ;;  %v947_v6 = vmul.f32 3.8918573e-05, %v3407_v13  ;;  %v3413_v17 = vadd.f32 %v831_v16, %v818_v14 }
 0x252   :  { %v3416_v18 = vmul.f32 0.70710677, %v3409_v15 }
 0x253   :  { %v937_v19 = vadd.f32 0.00028619796, %v936_v5  ;;  %v948_v20 = vadd.f32 0.001143296, %v947_v6  ;;  %v3421_v22 = vmul.f32 0.70710677, %v3413_v17 }
 0x254   :  { %v974_v21 = vmul.f32 %v3416_v18, %v3416_v18 }
 0x255   :  { %v938_v23 = vmul.f32 %v937_v19, %v3407_v13  ;;  %v949_v24 = vmul.f32 %v948_v20, %v3407_v13  ;;  %v845_v27 = vpop.f32.mrf.mxu2  ;;  %v1094_v30 = vmul.f32 %v3421_v22, %v3421_v22  ;;  %v859_v40 = vpop.f32.mrf.mxu3 }
 0x256   :  { %v3426_v29 = vmin.f32 %v974_v21, 16.0  ;;  %v846_v31 = vadd.f32 %v845_v27, %v479_v3  ;;  %v871_v32 = vpop.f32.mrf.mxu0  ;;  %v885_v54 = vpop.f32.mrf.mxu1 }
 0x257   :  { %v939_v25 = vadd.f32 0.0036580483, %v938_v23  ;;  %v950_v33 = vadd.f32 0.014752088, %v949_v24  ;;  %v3435_v37 = vmin.f32 %v1094_v30, 16.0  ;;  %v872_v43 = vadd.f32 %v871_v32, %v480_v28 }
 0x258   :  { %v976_v35 = vmul.f32 2.1237322e-06, %v3426_v29  ;;  %v987_v36 = vmul.f32 3.8918573e-05, %v3426_v29  ;;  %v3438_v42 = vadd.f32 %v859_v40, %v846_v31 }
 0x259   :  { %v951_v41 = vmul.f32 %v950_v33, %v3407_v13  ;;  %v1096_v47 = vmul.f32 2.1237322e-06, %v3435_v37  ;;  %v1107_v50 = vmul.f32 3.8918573e-05, %v3435_v37  ;;  %v940_v51 = vmul.f32 %v939_v25, %v3407_v13 }
 0x25a   :  { %v977_v45 = vadd.f32 0.00028619796, %v976_v35  ;;  %v988_v46 = vadd.f32 0.001143296, %v987_v36  ;;  %v3452_v57 = vmul.f32 0.70710677, %v3438_v42  ;;  %v3454_v26 = vadd.f32 %v885_v54, %v872_v43 }
 0x25b   :  { %v952_v49 = vadd.f32 0.112945676, %v951_v41  ;;  %v1097_v38 = vadd.f32 0.00028619796, %v1096_v47  ;;  %v1108_v56 = vadd.f32 0.001143296, %v1107_v50 }
 0x25c   :  { %v978_v52 = vmul.f32 %v977_v45, %v3426_v29  ;;  %v989_v53 = vmul.f32 %v988_v46, %v3426_v29  ;;  %v1134_v3 = vmul.f32 %v3452_v57, %v3452_v57  ;;  %v941_v7 = vadd.f32 0.05243302, %v940_v51 }
 0x25d   :  { %v953_v55 = vmul.f32 %v952_v49, %v3407_v13  ;;  %v1098_v61 = vmul.f32 %v1097_v38, %v3435_v37  ;;  %v1109_v63 = vmul.f32 %v1108_v56, %v3435_v37  ;;  %v3466_v16 = vmul.f32 0.70710677, %v3454_v26 }
 0x25e   :  { %v979_v58 = vadd.f32 0.0036580483, %v978_v52  ;;  %v990_v39 = vadd.f32 0.014752088, %v989_v53  ;;  %v3463_v14 = vmin.f32 %v1134_v3, 16.0  ;;  %v942_v23 = vmul.f32 %v941_v7, %v3407_v13 }
 0x25f   :  { %v954_v60 = vadd.f32 0.4994258, %v953_v55  ;;  %v1110_v1 = vadd.f32 0.014752088, %v1109_v63  ;;  %v1099_v19 = vadd.f32 0.0036580483, %v1098_v61  ;;  %v1014_v31 = vmul.f32 %v3466_v16, %v3466_v16 }
 0x260   :  { %v980_v8 = vmul.f32 %v979_v58, %v3426_v29  ;;  %v991_v9 = vmul.f32 %v990_v39, %v3426_v29  ;;  %v1136_v21 = vmul.f32 2.1237322e-06, %v3463_v14  ;;  %v1147_v30 = vmul.f32 3.8918573e-05, %v3463_v14 }
 0x261   :  { %v955_v0 = vmul.f32 %v954_v60, %v3407_v13  ;;  %v1111_v20 = vmul.f32 %v1110_v1, %v3435_v37  ;;  %v1100_v25 = vmul.f32 %v1099_v19, %v3435_v37  ;;  %v943_v35 = vadd.f32 0.18741608, %v942_v23 }
 0x262   :  { %v992_v5 = vadd.f32 0.112945676, %v991_v9  ;;  %v981_v24 = vadd.f32 0.05243302, %v980_v8  ;;  %v1137_v34 = vadd.f32 0.00028619796, %v1136_v21 }
 0x263   :  { %v3468_v6 = vadd.f32 1.0, %v955_v0  ;;  %v1112_v33 = vadd.f32 0.112945676, %v1111_v20  ;;  %v1148_v44 = vadd.f32 0.001143296, %v1147_v30  ;;  %v3483_v45 = vmin.f32 %v1014_v31, 16.0 }
 0x264   :  { %v993_v27 = vmul.f32 %v992_v5, %v3426_v29  ;;  %v982_v36 = vmul.f32 %v981_v24, %v3426_v29  ;;  %v1138_v43 = vmul.f32 %v1137_v34, %v3463_v14  ;;  %v1101_v48 = vadd.f32 0.05243302, %v1100_v25 }
 0x265   :  { %2624 = vrcp.f32 %v3468_v6  ;;  %v1113_v41 = vmul.f32 %v1112_v33, %v3435_v37  ;;  %v1149_v50 = vmul.f32 %v1148_v44, %v3463_v14  ;;  %v944_v53 = vmul.f32 %v943_v35, %v3407_v13 }
 0x266   :  { %v994_v32 = vadd.f32 0.4994258, %v993_v27  ;;  %v983_v52 = vadd.f32 0.18741608, %v982_v36  ;;  %v1139_v38 = vadd.f32 0.0036580483, %v1138_v43  ;;  %v1102_v60 = vmul.f32 %v1101_v48, %v3435_v37 }
 0x267   :  { %v1114_v49 = vadd.f32 0.4994258, %v1113_v41  ;;  %v1016_v54 = vmul.f32 2.1237322e-06, %v3483_v45  ;;  %v1150_v56 = vadd.f32 0.014752088, %v1149_v50  ;;  %vm962_vm13 = vweird.f32 %v3468_v6  ;;  %v913_v50 = vpop.f32.mrf.mxu3 }
 0x268   :  { %v995_v40 = vmul.f32 %v994_v32, %v3426_v29  ;;  %v1027_v58 = vmul.f32 3.8918573e-05, %v3483_v45  ;;  %v984_v61 = vmul.f32 %v983_v52, %v3426_v29  ;;  %v945_v13 = vadd.f32 1.1283791, %v944_v53  ;;  %v899_v29 = vpop.f32.mrf.mxu2 }
 0x269   :  { %v1115_v55 = vmul.f32 %v1114_v49, %v3435_v37  ;;  %v1151_v3 = vmul.f32 %v1150_v56, %v3463_v14  ;;  %v1140_v7 = vmul.f32 %v1139_v38, %v3463_v14  ;;  %v1017_v8 = vadd.f32 0.00028619796, %v1016_v54 }
 0x26a   :  { %v3485_v46 = vadd.f32 1.0, %v995_v40  ;;  %v481_v9 = vperm.slane %v3396_v10, 3  ;;  %v3505_v0 = vmul.f32 0.5, %v3399_v2  ;;  %v3508_v1 = vmul.f32 0.5, %v3409_v15  ;;  %v873_v40 = vpop.f32.mrf.mxu0 }
 0x26b   :  { %v3487_v47 = vpop.eup %2624  ;;  %v3499_v63 = vadd.f32 1.0, %v1115_v55  ;;  %v1028_v5 = vadd.f32 0.001143296, %v1027_v58  ;;  %v966_v21 = vand.u32 2147483647, %v3468_v6  ;;  %v3516_v23 = vmul.f32 0.5, %v3413_v17 }
 0x26c   :  { %v958_v51 = vmul.f32 %v3487_v47, %v3468_v6  ;;  %2626 = vrcp.f32 %v3485_v46  ;;  %v1103_v24 = vadd.f32 0.18741608, %v1102_v60  ;;  %v968_v2 = vand.u32 2147483648, %v3468_v6 }
 0x26d   :  { %2628 = vrcp.f32 %v3499_v63  ;;  %v985_v27 = vadd.f32 1.1283791, %v984_v61  ;;  %v3520_v15 = vmul.f32 0.5, %v3438_v42  ;;  %v1152_v30 = vadd.f32 0.112945676, %v1151_v3 }
 0x26e   :  { %v959_v39 = vsub.f32 1.0, %v958_v51  ;;  %v946_v31 = vmul.f32 %v945_v13, %v3403_v4  ;;  %v1141_v32 = vadd.f32 0.05243302, %v1140_v7  ;;  %v1018_v25 = vmul.f32 %v1017_v8, %v3483_v45 }
 0x26f   :  { %v900_v33 = vadd.f32 %v899_v29, %v481_v9  ;;  %v1153_v34 = vmul.f32 %v1152_v30, %v3463_v14  ;;  %v1029_v35 = vmul.f32 %v1028_v5, %v3483_v45  ;;  %vm963_vm14 = vweird.f32 %v3487_v47 }
 0x270   :  { %v960_v20 = vmul.f32 %v3487_v47, %v959_v39  ;;  %vm3533_vm15 = vcmp.eq.f32.partialorder %v966_v21, 8.507059e+37  ;;  %v1104_v36 = vmul.f32 %v1103_v24, %v3435_v37  ;;  %v969_v43 = vor.u32 1.1754944e-38, %v968_v2  ;;  %vm3550_vm0 = vmor %vm962_vm13, %vm963_vm14 }
 0x271   :  { %v3541_v44 = vmul.f32 %v985_v27, %v3416_v18  ;;  %v1154_v48 = vadd.f32 0.4994258, %v1153_v34  ;;  %v1030_v49 = vadd.f32 0.014752088, %v1029_v35  ;;  %v1142_v52 = vmul.f32 %v1141_v32, %v3463_v14  ;;  %v2244_v32 = vld [vmem:[%s4245_s5 + $0x60] sm:$0xf] }
 0x272   :  { %v3511_v19 = vpop.eup %2626  ;;  %v961_v42 = vadd.f32 %v3487_v47, %v960_v20  ;;  %v1019_v53 = vadd.f32 0.0036580483, %v1018_v25  ;;  %v3546_v38 = vadd.f32 %v913_v50, %v900_v33  ;;  %v874_v56 = vadd.f32 %v873_v40, %v480_v28  ;;  %v2559_v25 = vld [vmem:[%s4245_s5 + $0x64] sm:$0xf0]  ;;  %v2577_v34 = vld [vmem:[%s4245_s5 + $0xf4] sm:$0xf0] }
 0x273   :  { %v998_v17 = vmul.f32 %v3511_v19, %v3485_v46  ;;  %v3538_v41 = vpop.eup %2628  ;;  %v1155_v18 = vmul.f32 %v1154_v48, %v3463_v14  ;;  %v1031_v55 = vmul.f32 %v1030_v49, %v3483_v45  ;;  %v1008_v39 = vand.u32 2147483648, %v3485_v46  ;;  %v901_v48 = vpop.f32.mrf.mxu2 }
 0x274   :  { %v1118_v51 = vmul.f32 %v3538_v41, %v3499_v63  ;;  %v965_v58 = vsel %vm3550_vm0, %v3487_v47, %v961_v42  ;;  %v1105_v60 = vadd.f32 1.1283791, %v1104_v36  ;;  %vm1002_vm1 = vweird.f32 %v3485_v46  ;;  %v887_v47 = vpop.f32.mrf.mxu1 }
 0x275   :  { %v999_v54 = vsub.f32 1.0, %v998_v17  ;;  %v1006_v61 = vand.u32 2147483647, %v3485_v46  ;;  %v1126_v3 = vand.u32 2147483647, %v3499_v63  ;;  %v3565_v13 = vadd.f32 1.0, %v1155_v18 }
 0x276   :  { %v1119_v6 = vsub.f32 1.0, %v1118_v51  ;;  %v1143_v7 = vadd.f32 0.18741608, %v1142_v52  ;;  %v1020_v8 = vmul.f32 %v1019_v53, %v3483_v45  ;;  %v1032_v28 = vadd.f32 0.112945676, %v1031_v55 }
 0x277   :  { %v3569_v5 = vmul.f32 0.70710677, %v3546_v38  ;;  %v970_v29 = vsel %vm3533_vm15, %v969_v43, %v965_v58  ;;  %v1000_v20 = vmul.f32 %v3511_v19, %v999_v54  ;;  %2630 = vrcp.f32 %v3565_v13  ;;  %v2316_v17 = vld [vmem:[%s4245_s5 + $0xf0] sm:$0xf] }
 0x278   :  { %v3575_v21 = vadd.f32 %v887_v47, %v874_v56  ;;  %v1009_v24 = vor.u32 1.1754944e-38, %v1008_v39  ;;  %v3578_v2 = vmul.f32 %v1105_v60, %v3421_v22  ;;  %v1120_v27 = vmul.f32 %v3538_v41, %v1119_v6 }
 0x279   :  { %v1033_v30 = vmul.f32 %v1032_v28, %v3483_v45  ;;  %vm1003_vm2 = vweird.f32 %v3511_v19  ;;  %vm1122_vm3 = vweird.f32 %v3499_v63  ;;  %v1128_v33 = vand.u32 2147483648, %v3499_v63  ;;  %v915_v63 = vpop.f32.mrf.mxu3 }
 0x27a   :  { %v1054_v22 = vmul.f32 %v3569_v5, %v3569_v5  ;;  %v3599_v35 = vmul.f32 %v970_v29, %v946_v31  ;;  %vm3601_vm4 = vcmp.eq.f32.partialorder %v1006_v61, 8.507059e+37  ;;  %vm3605_vm5 = vcmp.eq.f32.partialorder %v1126_v3, 8.507059e+37  ;;  %vm3631_vm7 = vmor %vm1002_vm1, %vm1003_vm2 }
 0x27b   :  { %v1144_v36 = vmul.f32 %v1143_v7, %v3463_v14  ;;  %v1021_v40 = vadd.f32 0.05243302, %v1020_v8  ;;  %v1034_v43 = vadd.f32 0.4994258, %v1033_v30  ;;  %v1001_v49 = vadd.f32 %v3511_v19, %v1000_v20 }
 0x27c   :  { %v3611_v50 = vmin.f32 %v1054_v22, 16.0  ;;  %v3614_v31 = vmul.f32 0.70710677, %v3575_v21  ;;  %v2245_v51 = vor.u32 %v2559_v25, %v2244_v32  ;;  %v1121_v52 = vadd.f32 %v3538_v41, %v1120_v27 }
 0x27d   :  { %vm1123_vm6 = vweird.f32 %v3538_v41  ;;  %v1035_v53 = vmul.f32 %v1034_v43, %v3483_v45  ;;  %v2317_v37 = vor.u32 %v2577_v34, %v2316_v17  ;;  %v3619_v54 = vpop.eup %2630  ;;  %v902_v56 = vadd.f32 %v901_v48, %v481_v9  ;;  %v2236_v34 = vld [vmem:[%s4245_s5 + $0x50] sm:$0xf] }
 0x27e   :  { %v1056_v14 = vmul.f32 2.1237322e-06, %v3611_v50  ;;  %v1067_v18 = vmul.f32 3.8918573e-05, %v3611_v50  ;;  %v1174_v55 = vmul.f32 %v3614_v31, %v3614_v31  ;;  %1665 = vmatpush.bf16.msrb.mxu0 %v2245_v51  ;;  %v1129_v39 = vor.u32 1.1754944e-38, %v1128_v33  ;;  %vm3645_vm8 = vmor %vm1122_vm3, %vm1123_vm6 }
 0x27f   :  { %v1158_v60 = vmul.f32 %v3619_v54, %v3565_v13  ;;  %v1022_v6 = vmul.f32 %v1021_v40, %v3483_v45  ;;  %v3638_v61 = vadd.f32 1.0, %v1035_v53  ;;  %1678 = vmatpush.bf16.msrb.mxu1 %v2317_v37  ;;  %v2186_v10 = vclamps-f32 %v3599_v35, 1.0 }
 0x280   :  { %v1057_v9 = vadd.f32 0.00028619796, %v1056_v14  ;;  %v1068_v3 = vadd.f32 0.001143296, %v1067_v18  ;;  %v3649_v7 = vmin.f32 %v1174_v55, 16.0  ;;  %v1005_v8 = vsel %vm3631_vm7, %v3511_v19, %v1001_v49 }
 0x281   :  { %v1125_v28 = vsel %vm3645_vm8, %v3538_v41, %v1121_v52  ;;  %v1159_v47 = vsub.f32 1.0, %v1158_v60  ;;  %2632 = vrcp.f32 %v3638_v61  ;;  %v1145_v29 = vadd.f32 1.1283791, %v1144_v36  ;;  %v2557_v36 = vld [vmem:[%s4245_s5 + $0x54] sm:$0xf0] }
 0x282   :  { %v1058_v20 = vmul.f32 %v1057_v9, %v3611_v50  ;;  %v1069_v27 = vmul.f32 %v1068_v3, %v3611_v50  ;;  %v3660_v30 = vadd.f32 %v915_v63, %v902_v56  ;;  %v1023_v25 = vadd.f32 0.18741608, %v1022_v6  ;;  %v2308_v18 = vld [vmem:[%s4245_s5 + $0xe0] sm:$0xf]  ;;  %v2575_v55 = vld [vmem:[%s4245_s5 + $0xe4] sm:$0xf0] }
 0x283   :  { %v1160_v32 = vmul.f32 %v3619_v54, %v1159_v47  ;;  %v1176_v19 = vmul.f32 2.1237322e-06, %v3649_v7  ;;  %v1187_v33 = vmul.f32 3.8918573e-05, %v3649_v7  ;;  %v1010_v41 = vsel %vm3601_vm4, %v1009_v24, %v1005_v8  ;;  %v2228_v6 = vld [vmem:[%s4245_s5 + $0x40] sm:$0xf] }
 0x284   :  { %v1130_v22 = vsel %vm3605_vm5, %v1129_v39, %v1125_v28  ;;  %vm1163_vm9 = vweird.f32 %v3619_v54  ;;  %v1070_v17 = vadd.f32 0.014752088, %v1069_v27  ;;  %v1059_v43 = vadd.f32 0.0036580483, %v1058_v20  ;;  %v2573_v20 = vld [vmem:[%s4245_s5 + $0xd4] sm:$0xf0] }
 0x285   :  { %v1161_v40 = vadd.f32 %v3619_v54, %v1160_v32  ;;  %v1177_v48 = vadd.f32 0.00028619796, %v1176_v19  ;;  %v1188_v42 = vadd.f32 0.001143296, %v1187_v33  ;;  %vm1162_vm10 = vweird.f32 %v3565_v13 }
 0x286   :  { %v1168_v24 = vand.u32 2147483648, %v3565_v13  ;;  %v1071_v4 = vmul.f32 %v1070_v17, %v3611_v50  ;;  %v3681_v49 = vmul.f32 0.70710677, %v3660_v30  ;;  %v1131_v52 = vmul.f32 %v1130_v22, %v3578_v2  ;;  %vm3697_vm11 = vmor %vm1162_vm10, %vm1163_vm9 }
 0x287   :  { %v3683_v51 = vpop.eup %2632  ;;  %v1178_v53 = vmul.f32 %v1177_v48, %v3649_v7  ;;  %v1189_v37 = vmul.f32 %v1188_v42, %v3649_v7  ;;  %v2237_v14 = vor.u32 %v2557_v36, %v2236_v34  ;;  %v1011_v56 = vmul.f32 %v1010_v41, %v3541_v44  ;;  %v2555_v44 = vld [vmem:[%s4245_s5 + $0x44] sm:$0xf0] }
 0x288   :  { %v1166_v2 = vand.u32 2147483647, %v3565_v13  ;;  %v1024_v39 = vmul.f32 %v1023_v25, %v3483_v45  ;;  %v1038_v60 = vmul.f32 %v3683_v51, %v3638_v61  ;;  %v1165_v46 = vsel %vm3697_vm11, %v3619_v54, %v1161_v40  ;;  %v2300_v45 = vld [vmem:[%s4245_s5 + $0xd0] sm:$0xf] }
 0x289   :  { %v1060_v9 = vmul.f32 %v1059_v43, %v3611_v50  ;;  %v1072_v13 = vadd.f32 0.112945676, %v1071_v4  ;;  %v1190_v3 = vadd.f32 0.014752088, %v1189_v37  ;;  %1666 = vmatpush.bf16.msrb.mxu0 %v2237_v14  ;;  %v1179_v28 = vadd.f32 0.0036580483, %v1178_v53 }
 0x28a   :  { %v1039_v8 = vsub.f32 1.0, %v1038_v60  ;;  %v1214_v47 = vmul.f32 %v3681_v49, %v3681_v49  ;;  %v2309_v63 = vor.u32 %v2575_v55, %v2308_v18  ;;  %v2190_v54 = vclamps-f32 %v1131_v52, 1.0  ;;  %v2220_v14 = vld [vmem:[%s4245_s5 + $0x30] sm:$0xf] }
 0x28b   :  { %v1169_v27 = vor.u32 1.1754944e-38, %v1168_v24  ;;  %v1073_v32 = vmul.f32 %v1072_v13, %v3611_v50  ;;  %v1191_v25 = vmul.f32 %v1190_v3, %v3649_v7  ;;  %v1146_v19 = vmul.f32 %v1145_v29, %v3452_v57  ;;  %v2292_v13 = vld [vmem:[%s4245_s5 + $0xc0] sm:$0xf]  ;;  %v2571_v3 = vld [vmem:[%s4245_s5 + $0xc4] sm:$0xf0] }
 0x28c   :  { %vm1167_vm12 = vcmp.eq.f32.partialorder %v1166_v2, 8.507059e+37  ;;  %v3726_v33 = vmin.f32 %v1214_v47, 16.0  ;;  %1679 = vmatpush.bf16.msrb.mxu1 %v2309_v63  ;;  %v2229_v41 = vor.u32 %v2555_v44, %v2228_v6  ;;  %v1061_v17 = vadd.f32 0.05243302, %v1060_v9  ;;  %v2553_v2 = vld [vmem:[%s4245_s5 + $0x34] sm:$0xf0] }
 0x28d   :  { %v1170_v22 = vsel %vm1167_vm12, %v1169_v27, %v1165_v46  ;;  %v1074_v34 = vadd.f32 0.4994258, %v1073_v32  ;;  %v2301_v36 = vor.u32 %v2573_v20, %v2300_v45  ;;  %v1040_v40 = vmul.f32 %v3683_v51, %v1039_v8  ;;  %v2380_v46 = vld [vmem:[%s4245_s5 + $0x170] sm:$0xf]  ;;  %v2593_v9 = vld [vmem:[%s4245_s5 + $0x174] sm:$0xf0] }
 0x28e   :  { %v1180_v43 = vmul.f32 %v1179_v28, %v3649_v7  ;;  %v1192_v48 = vadd.f32 0.112945676, %v1191_v25  ;;  %v1216_v42 = vmul.f32 2.1237322e-06, %v3726_v33  ;;  %1667 = vmatpush.bf16.msrb.mxu0 %v2229_v41  ;;  %v2187_v24 = vclamps-f32 %v1011_v56, 1.0 }
 0x28f   :  { %v1258_v4 = vadd.f32 1.0, %v2190_v54  ;;  %v3731_v57 = vadd.f32 1.1283791, %v1024_v39  ;;  %v1075_v29 = vmul.f32 %v1074_v34, %v3611_v50  ;;  %vm1043_vm13 = vweird.f32 %v3683_v51  ;;  %v2212_v28 = vld [vmem:[%s4245_s5 + $0x20] sm:$0xf] }
 0x290   :  { %v1048_v52 = vand.u32 2147483648, %v3638_v61  ;;  %v1193_v53 = vmul.f32 %v1192_v48, %v3649_v7  ;;  %v1217_v37 = vadd.f32 0.00028619796, %v1216_v42  ;;  %1680 = vmatpush.bf16.msrb.mxu1 %v2301_v36  ;;  %v1171_v18 = vmul.f32 %v1170_v22, %v1146_v19  ;;  %v2551_v47 = vld [vmem:[%s4245_s5 + $0x24] sm:$0xf0] }
 0x291   :  { %v1062_v55 = vmul.f32 %v1061_v17, %v3611_v50  ;;  %v3741_v56 = vadd.f32 1.0, %v1075_v29  ;;  %v1227_v58 = vmul.f32 3.8918573e-05, %v3726_v33  ;;  %v1041_v39 = vadd.f32 %v3683_v51, %v1040_v40  ;;  %v2591_v27 = vld [vmem:[%s4245_s5 + $0x164] sm:$0xf0] }
 0x292   :  { %v1181_v60 = vadd.f32 0.05243302, %v1180_v43  ;;  %v1194_v6 = vadd.f32 0.4994258, %v1193_v53  ;;  %v1218_v44 = vmul.f32 %v1217_v37, %v3726_v33  ;;  %v1254_v45 = vadd.f32 1.0, %v2186_v10 }
 0x293   :  { %v1255_v8 = vadd.f32 1.0, %v2187_v24  ;;  %vm1042_vm14 = vweird.f32 %v3638_v61  ;;  %2634 = vrcp.f32 %v3741_v56  ;;  %v1266_v63 = vmul.f32 %v1258_v4, %v3516_v23  ;;  %v2372_v10 = vld [vmem:[%s4245_s5 + $0x160] sm:$0xf]  ;;  %v2284_v41 = vld [vmem:[%s4245_s5 + $0xb0] sm:$0xf] }
 0x294   :  { %v1046_v20 = vand.u32 2147483647, %v3638_v61  ;;  %v1049_v54 = vor.u32 1.1754944e-38, %v1048_v52  ;;  %v1195_v35 = vmul.f32 %v1194_v6, %v3649_v7  ;;  %v2191_v32 = vclamps-f32 %v1171_v18, 1.0  ;;  %vm3782_vm15 = vmor %vm1042_vm14, %vm1043_vm13  ;;  %v2569_v22 = vld [vmem:[%s4245_s5 + $0xb4] sm:$0xf0] }
 0x295   :  { %v1063_v23 = vadd.f32 0.18741608, %v1062_v55  ;;  %v1228_v61 = vadd.f32 0.001143296, %v1227_v58  ;;  %v2221_v19 = vor.u32 %v2553_v2, %v2220_v14  ;;  %v1045_v17 = vsel %vm3782_vm15, %v3683_v51, %v1041_v39  ;;  %v2444_v43 = vld [vmem:[%s4245_s5 + $0x1f0] sm:$0xf] }
 0x296   :  { %v1182_v34 = vmul.f32 %v1181_v60, %v3649_v7  ;;  %v3796_v36 = vadd.f32 1.0, %v1195_v35  ;;  %v1219_v40 = vadd.f32 0.0036580483, %v1218_v44  ;;  %v2381_v42 = vor.u32 %v2593_v9, %v2380_v46  ;;  %v2609_v29 = vld [vmem:[%s4245_s5 + $0x1f4] sm:$0xf0] }
 0x297   :  { %v1229_v48 = vmul.f32 %v1228_v61, %v3726_v33  ;;  %1668 = vmatpush.bf16.msrb.mxu0 %v2221_v19  ;;  %v2293_v24 = vor.u32 %v2571_v3, %v2292_v13  ;;  %v2213_v4 = vor.u32 %v2551_v47, %v2212_v28  ;;  %v2204_v51 = vld [vmem:[%s4245_s5 + $0x10] sm:$0xf]  ;;  %v2549_v52 = vld [vmem:[%s4245_s5 + $0x14] sm:$0xf0]  ;;  %v1262_v53 = vmul.f32 %v1254_v45, %v3505_v0  ;;  %v2276_v39 = vld [vmem:[%s4245_s5 + $0xa0] sm:$0xf] }
 0x298   :  { %v3813_v37 = vmul.f32 0.5, %v3454_v26  ;;  %vm1047_vm0 = vcmp.eq.f32.partialorder %v1046_v20, 8.507059e+37  ;;  %2636 = vrcp.f32 %v3796_v36  ;;  %v3819_v14 = vld [vmem:[%s4245_s5 + $0x150] sm:$0xf]  ;;  %v3824_v18 = vld [vmem:[%s4245_s5 + $0x154] sm:$0xf0]  ;;  %v1064_v26 = vmul.f32 %v1063_v23, %v3611_v50  ;;  %1692 = vmatpush.bf16.msrb.mxu2 %v2381_v42 }
 0x299   :  { %v3826_v55 = vpop.eup %2634  ;;  %v1259_v58 = vadd.f32 1.0, %v2191_v32  ;;  %v1050_v0 = vsel %vm1047_vm0, %v1049_v54, %v1045_v17  ;;  %1681 = vmatpush.bf16.msrb.mxu1 %v2293_v24  ;;  %v2373_v2 = vor.u32 %v2591_v27, %v2372_v10  ;;  %v2567_v60 = vld [vmem:[%s4245_s5 + $0xa4] sm:$0xf0]  ;;  %v1026_v6 = vmul.f32 %v3731_v57, %v3466_v16  ;;  %v2436_v50 = vld [vmem:[%s4245_s5 + $0x1e0] sm:$0xf] }
 0x29a   :  { %v1220_v44 = vmul.f32 %v1219_v40, %v3726_v33  ;;  %v1230_v46 = vadd.f32 0.014752088, %v1229_v48  ;;  %v2285_v9 = vor.u32 %v2569_v22, %v2284_v41  ;;  %v2607_v13 = vld [vmem:[%s4245_s5 + $0x1e4] sm:$0xf0]  ;;  %v1263_v3 = vmul.f32 %v1255_v8, %v3508_v1  ;;  %v2196_v16 = vld [vmem:[%s4245_s5] sm:$0xf] }
 0x29b   :  { %v3845_v45 = vpack.c.bf16 %v1266_v63, %v1262_v53  ;;  %v1183_v28 = vadd.f32 0.18741608, %v1182_v34  ;;  %1669 = vmatpush.bf16.msrb.mxu0 %v2213_v4  ;;  %v2445_v47 = vor.u32 %v2609_v29, %v2444_v43  ;;  %v2547_v57 = vld [vmem:[%s4245_s5 + $0x4] sm:$0xf0]  ;;  %v3853_v20 = vmul.f32 %v1050_v0, %v1026_v6  ;;  %v3861_v63 = vld [vmem:[%s4245_s5 + $0x140] sm:$0xf] }
 0x29c   :  { %v1078_v54 = vmul.f32 %v3826_v55, %v3741_v56  ;;  %v1231_v1 = vmul.f32 %v1230_v46, %v3726_v33  ;;  %v2205_v8 = vor.u32 %v2549_v52, %v2204_v51  ;;  %v3866_v35 = vld [vmem:[%s4245_s5 + $0x144] sm:$0xf0]  ;;  %v2560_v10 = vld [vmem:[%s4245_s5 + $0x74] sm:$0xf]  ;;  %v2254_v27 = vld [vmem:[%s4245_s5 + $0x78] sm:$0xf0]  ;;  %v1267_v25 = vmul.f32 %v1259_v58, %v3520_v15  ;;  %1693 = vmatpush.bf16.msrb.mxu2 %v2373_v2 }
 0x29d   :  { %v2268_v32 = vld [vmem:[%s4245_s5 + $0x90] sm:$0xf]  ;;  %v3878_v23 = vadd.f32 1.1283791, %v1064_v26  ;;  %1682 = vmatpush.bf16.msrb.mxu1 %v2285_v9  ;;  %v2365_v61 = vor.u32 %v3824_v18, %v3819_v14  ;;  %v2277_v19 = vor.u32 %v2567_v60, %v2276_v39  ;;  %v2565_v41 = vld [vmem:[%s4245_s5 + $0x94] sm:$0xf0]  ;;  %1706 = vmatpush.bf16.msrb.mxu3 %v2445_v47  ;;  %v2437_v43 = vor.u32 %v2607_v13, %v2436_v50 }
 0x29e   :  { %v2428_v22 = vld [vmem:[%s4245_s5 + $0x1d0] sm:$0xf]  ;;  %v3888_v17 = vpop.eup %2636  ;;  %v1086_v15 = vand.u32 2147483647, %v3741_v56  ;;  %v1221_v34 = vadd.f32 0.05243302, %v1220_v44  ;;  %v1184_v42 = vmul.f32 %v1183_v28, %v3649_v7  ;;  %v2197_v4 = vor.u32 %v2547_v57, %v2196_v16 }
 0x29f   :  { %v1232_v40 = vadd.f32 0.112945676, %v1231_v1  ;;  %v1088_v48 = vand.u32 2147483648, %v3741_v56  ;;  %v1198_v24 = vmul.f32 %v3888_v17, %v3796_v36  ;;  %1670 = vmatpush.bf16.msrb.mxu0 %v2205_v8  ;;  %v2605_v29 = vld [vmem:[%s4245_s5 + $0x1d4] sm:$0xf0]  ;;  %v2188_v52 = vclamps-f32 %v3853_v20, 1.0 }
 0x2a0   :  { %v3901_v51 = vld [vmem:[%s4245_s5 + $0x64] sm:$0xf]  ;;  %v1079_v53 = vsub.f32 1.0, %v1078_v54  ;;  %v2257_v7 = vor.u32 %v2560_v10, %v2254_v27  ;;  %v2348_v18 = vld [vmem:[%s4245_s5 + $0x130] sm:$0xf]  ;;  %v1208_v39 = vand.u32 2147483648, %v3796_v36  ;;  %1694 = vmatpush.bf16.msrb.mxu2 %v2365_v61  ;;  %v2357_v60 = vor.u32 %v3866_v35, %v3861_v63 }
 0x2a1   :  { %v1233_v14 = vmul.f32 %v1232_v40, %v3726_v33  ;;  %v2585_v58 = vld [vmem:[%s4245_s5 + $0x134] sm:$0xf0]  ;;  %v2246_v0 = vld [vmem:[%s4245_s5 + $0x68] sm:$0xf0]  ;;  %v2260_v26 = vld [vmem:[%s4245_s5 + $0x80] sm:$0xf]  ;;  %1683 = vmatpush.bf16.msrb.mxu1 %v2277_v19  ;;  %v2269_v6 = vor.u32 %v2565_v41, %v2268_v32  ;;  %v3926_v9 = vpack.c.bf16 %v1267_v25, %v1263_v3  ;;  %v1222_v50 = vmul.f32 %v1221_v34, %v3726_v33 }
 0x2a2   :  { %v1199_v2 = vsub.f32 1.0, %v1198_v24  ;;  %v2563_v44 = vld [vmem:[%s4245_s5 + $0x84] sm:$0xf0]  ;;  %v2420_v46 = vld [vmem:[%s4245_s5 + $0x1c0] sm:$0xf]  ;;  %1707 = vmatpush.bf16.msrb.mxu3 %v2437_v43  ;;  %v2429_v28 = vor.u32 %v2605_v29, %v2428_v22  ;;  %vm1203_vm1 = vweird.f32 %v3888_v17  ;;  %v1080_v8 = vmul.f32 %v3826_v55, %v1079_v53 }
 0x2a3   :  { %v1234_v13 = vadd.f32 0.4994258, %v1233_v14  ;;  %v2603_v47 = vld [vmem:[%s4245_s5 + $0x1c4] sm:$0xf0]  ;;  %v2576_v16 = vld [vmem:[%s4245_s5 + $0xf4] sm:$0xf]  ;;  %1671 = vmatpush.bf16.msrb.mxu0 %v2197_v4  ;;  %vm1202_vm2 = vweird.f32 %v3796_v36  ;;  %v2249_v35 = vor.u32 %v3901_v51, %v2246_v0  ;;  %v2349_v19 = vor.u32 %v2585_v58, %v2348_v18 }
 0x2a4   :  { %v1185_v57 = vadd.f32 1.1283791, %v1184_v42  ;;  %v1200_v54 = vmul.f32 %v3888_v17, %v1199_v2  ;;  %v1206_v3 = vand.u32 2147483647, %v3796_v36  ;;  %v2318_v1 = vld [vmem:[%s4245_s5 + $0xf8] sm:$0xf0]  ;;  %1695 = vmatpush.bf16.msrb.mxu2 %v2357_v60  ;;  %v2261_v41 = vor.u32 %v2563_v44, %v2260_v26  ;;  %vm3965_vm3 = vmor %vm1202_vm2, %vm1203_vm1 }
 0x2a5   :  { %v1235_v63 = vmul.f32 %v1234_v13, %v3726_v33  ;;  %v2340_v10 = vld [vmem:[%s4245_s5 + $0x120] sm:$0xf]  ;;  %v2583_v27 = vld [vmem:[%s4245_s5 + $0x124] sm:$0xf0]  ;;  %v2556_v32 = vld [vmem:[%s4245_s5 + $0x54] sm:$0xf]  ;;  %1684 = vmatpush.bf16.msrb.mxu1 %v2269_v6  ;;  %v2421_v24 = vor.u32 %v2603_v47, %v2420_v46  ;;  %v2321_v4 = vor.u32 %v2576_v16, %v2318_v1  ;;  %vm1083_vm4 = vweird.f32 %v3826_v55 }
 0x2a6   :  { %v1201_v25 = vadd.f32 %v3888_v17, %v1200_v54  ;;  %v1209_v61 = vor.u32 1.1754944e-38, %v1208_v39  ;;  %v2238_v22 = vld [vmem:[%s4245_s5 + $0x58] sm:$0xf0]  ;;  %v2412_v34 = vld [vmem:[%s4245_s5 + $0x1b0] sm:$0xf]  ;;  %1708 = vmatpush.bf16.msrb.mxu3 %v2429_v28  ;;  %1672 = vmatmul.bf16.vlgmr.msrb.gmra.mxu0 %v3845_v45  ;;  %v1186_v36 = vmul.f32 %v1185_v57, %v3614_v31  ;;  %vm1207_vm5 = vcmp.eq.f32.partialorder %v1206_v3, 8.507059e+37 }
 0x2a7   :  { %1720 = vmatpush.bf16.msra.mxu0 %v2257_v7  ;;  %v1223_v43 = vadd.f32 0.18741608, %v1222_v50  ;;  %v3969_v42 = vadd.f32 1.0, %v1235_v63  ;;  %v2601_v29 = vld [vmem:[%s4245_s5 + $0x1b4] sm:$0xf0]  ;;  %v1081_v7 = vadd.f32 %v3826_v55, %v1080_v8  ;;  %v2241_v31 = vor.u32 %v2556_v32, %v2238_v22 }
 0x2a8   :  { %v1205_v51 = vsel %vm3965_vm3, %v3888_v17, %v1201_v25  ;;  %v2574_v53 = vld [vmem:[%s4245_s5 + $0xe4] sm:$0xf]  ;;  %v2310_v14 = vld [vmem:[%s4245_s5 + $0xe8] sm:$0xf0]  ;;  %1696 = vmatpush.bf16.msrb.mxu2 %v2349_v19  ;;  %v2341_v17 = vor.u32 %v2583_v27, %v2340_v10  ;;  %v2332_v0 = vld [vmem:[%s4245_s5 + $0x110] sm:$0xf]  ;;  %vm1082_vm6 = vweird.f32 %v3741_v56  ;;  %v2413_v60 = vor.u32 %v2601_v29, %v2412_v34 }
 0x2a9   :  { %v1210_v18 = vsel %vm1207_vm5, %v1209_v61, %v1205_v51  ;;  %2638 = vrcp.f32 %v3969_v42  ;;  %1685 = vmatpush.bf16.msrb.mxu1 %v2261_v41  ;;  %v2554_v26 = vld [vmem:[%s4245_s5 + $0x44] sm:$0xf]  ;;  %v2230_v2 = vld [vmem:[%s4245_s5 + $0x48] sm:$0xf0]  ;;  %v1224_v39 = vmul.f32 %v1223_v43, %v3726_v33  ;;  %v2313_v6 = vor.u32 %v2574_v53, %v2310_v14  ;;  %v2581_v44 = vld [vmem:[%s4245_s5 + $0x114] sm:$0xf0] }
 0x2aa   :  { %v1211_v58 = vmul.f32 %v1210_v18, %v1186_v36  ;;  %1709 = vmatpush.bf16.msrb.mxu3 %v2421_v24  ;;  %v2404_v46 = vld [vmem:[%s4245_s5 + $0x1a0] sm:$0xf]  ;;  %v2599_v50 = vld [vmem:[%s4245_s5 + $0x1a4] sm:$0xf0]  ;;  %vm4010_vm7 = vmor %vm1082_vm6, %vm1083_vm4  ;;  %v924_v13 = vmul.f32 0.5, %v3575_v21  ;;  %vm4026_vm8 = vcmp.eq.f32.partialorder %v1086_v15, 8.507059e+37  ;;  %v2233_v3 = vor.u32 %v2554_v26, %v2230_v2 }
 0x2ab   :  { %1721 = vmatpush.bf16.msra.mxu0 %v2249_v35  ;;  %v2572_v47 = vld [vmem:[%s4245_s5 + $0xd4] sm:$0xf]  ;;  %v2302_v16 = vld [vmem:[%s4245_s5 + $0xd8] sm:$0xf0]  ;;  %v1085_v57 = vsel %vm4010_vm7, %v3826_v55, %v1081_v7  ;;  %v1089_v21 = vor.u32 1.1754944e-38, %v1088_v48  ;;  %v1256_v55 = vadd.f32 1.0, %v2188_v52  ;;  %v2333_v15 = vor.u32 %v2581_v44, %v2332_v0 }
 0x2ac   :  { %v2192_v28 = vclamps-f32 %v1211_v58, 1.0  ;;  %v2324_v1 = vld [vmem:[%s4245_s5 + $0x100] sm:$0xf]  ;;  %1686 = vmatmul.bf16.vlgmr.msrb.gmra.mxu1 %v3926_v9  ;;  %1697 = vmatpush.bf16.msrb.mxu2 %v2341_v17  ;;  %v2552_v63 = vld [vmem:[%s4245_s5 + $0x34] sm:$0xf]  ;;  %v2405_v10 = vor.u32 %v2599_v50, %v2404_v46  ;;  %v2305_v27 = vor.u32 %v2572_v47, %v2302_v16  ;;  %v1066_v22 = vmul.f32 %v3878_v23, %v3569_v5 }
 0x2ad   :  { %1734 = vmatpush.bf16.msra.mxu1 %v2321_v4  ;;  %v2222_v56 = vld [vmem:[%s4245_s5 + $0x38] sm:$0xf0]  ;;  %v1225_v35 = vadd.f32 1.1283791, %v1224_v39  ;;  %v2579_v20 = vld [vmem:[%s4245_s5 + $0x104] sm:$0xf0]  ;;  %v1090_v32 = vsel %vm4026_vm8, %v1089_v21, %v1085_v57  ;;  %v1264_v29 = vmul.f32 %v1256_v55, %v3813_v37  ;;  %vm1242_vm10 = vweird.f32 %v3969_v42 }
 0x2ae   :  { %v1260_v8 = vadd.f32 1.0, %v2192_v28  ;;  %1710 = vmatpush.bf16.msrb.mxu3 %v2413_v60  ;;  %v2592_v52 = vld [vmem:[%s4245_s5 + $0x174] sm:$0xf]  ;;  %v2382_v61 = vld [vmem:[%s4245_s5 + $0x178] sm:$0xf0]  ;;  %v2225_v40 = vor.u32 %v2552_v63, %v2222_v56  ;;  %v2325_v5 = vor.u32 %v2579_v20, %v2324_v1  ;;  %v1091_v53 = vmul.f32 %v1090_v32, %v1066_v22 }
 0x2af   :  { %1722 = vmatpush.bf16.msra.mxu0 %v2241_v31  ;;  %v4044_v48 = vpop.eup %2638  ;;  %v2396_v19 = vld [vmem:[%s4245_s5 + $0x190] sm:$0xf]  ;;  %v2597_v41 = vld [vmem:[%s4245_s5 + $0x194] sm:$0xf0]  ;;  %v2570_v43 = vld [vmem:[%s4245_s5 + $0xc4] sm:$0xf]  ;;  %v2385_v7 = vor.u32 %v2592_v52, %v2382_v61  ;;  %v1226_v50 = vmul.f32 %v1225_v35, %v3681_v49 }
 0x2b0   :  { %v1238_v25 = vmul.f32 %v4044_v48, %v3969_v42  ;;  %v1268_v34 = vmul.f32 %v1260_v8, %v924_v13  ;;  %v2294_v24 = vld [vmem:[%s4245_s5 + $0xc8] sm:$0xf0]  ;;  %v2550_v4 = vld [vmem:[%s4245_s5 + $0x24] sm:$0xf]  ;;  %1698 = vmatpush.bf16.msrb.mxu2 %v2333_v15  ;;  %v1248_v14 = vand.u32 2147483648, %v3969_v42  ;;  %v2397_v18 = vor.u32 %v2597_v41, %v2396_v19 }
 0x2b1   :  { %1735 = vmatpush.bf16.msra.mxu1 %v2313_v6  ;;  %v2214_v23 = vld [vmem:[%s4245_s5 + $0x28] sm:$0xf0]  ;;  %v2590_v51 = vld [vmem:[%s4245_s5 + $0x164] sm:$0xf]  ;;  %v2388_v31 = vld [vmem:[%s4245_s5 + $0x180] sm:$0xf]  ;;  %vm1243_vm9 = vweird.f32 %v4044_v48  ;;  %v2297_v0 = vor.u32 %v2570_v43, %v2294_v24 }
 0x2b2   :  { %v1239_v36 = vsub.f32 1.0, %v1238_v25  ;;  %1711 = vmatpush.bf16.msrb.mxu3 %v2405_v10  ;;  %v2374_v37 = vld [vmem:[%s4245_s5 + $0x168] sm:$0xf0]  ;;  %v1246_v17 = vand.u32 2147483647, %v3969_v42  ;;  %v4099_v39 = vpack.c.bf16 %v1268_v34, %v1264_v29  ;;  %v2217_v60 = vor.u32 %v2550_v4, %v2214_v23  ;;  %vm1244_vm11 = vmor %vm1242_vm10, %vm1243_vm9 }
 0x2b3   :  { %1723 = vmatpush.bf16.msra.mxu0 %v2233_v3  ;;  %v2595_v26 = vld [vmem:[%s4245_s5 + $0x184] sm:$0xf0]  ;;  %v2568_v2 = vld [vmem:[%s4245_s5 + $0xb4] sm:$0xf]  ;;  %v2286_v6 = vld [vmem:[%s4245_s5 + $0xb8] sm:$0xf0]  ;;  %v2377_v49 = vor.u32 %v2590_v51, %v2374_v37 }
 0x2b4   :  { %v1240_v58 = vmul.f32 %v4044_v48, %v1239_v36  ;;  %v2608_v44 = vld [vmem:[%s4245_s5 + $0x1f4] sm:$0xf]  ;;  %v2446_v46 = vld [vmem:[%s4245_s5 + $0x1f8] sm:$0xf0]  ;;  %1699 = vmatpush.bf16.msrb.mxu2 %v2325_v5  ;;  %v2189_v47 = vclamps-f32 %v1091_v53, 1.0  ;;  %v1249_v16 = vor.u32 1.1754944e-38, %v1248_v14  ;;  %v2389_v57 = vor.u32 %v2595_v26, %v2388_v31 }
 0x2b5   :  { %1736 = vmatpush.bf16.msra.mxu1 %v2305_v27  ;;  %v2548_v13 = vld [vmem:[%s4245_s5 + $0x14] sm:$0xf]  ;;  %v2206_v28 = vld [vmem:[%s4245_s5 + $0x18] sm:$0xf0]  ;;  %vm1247_vm12 = vcmp.eq.f32.partialorder %v1246_v17, 8.507059e+37  ;;  %v2289_v21 = vor.u32 %v2568_v2, %v2286_v6  ;;  %v2449_v3 = vor.u32 %v2608_v44, %v2446_v46  ;;  %v921_v25 = vmul.f32 0.5, %v3546_v38 }
 0x2b6   :  { %v1241_v33 = vadd.f32 %v4044_v48, %v1240_v58  ;;  %1712 = vmatpush.bf16.msrb.mxu3 %v2397_v18  ;;  %v2588_v42 = vld [vmem:[%s4245_s5 + $0x154] sm:$0xf]  ;;  %v2366_v1 = vld [vmem:[%s4245_s5 + $0x158] sm:$0xf0]  ;;  %v2566_v55 = vld [vmem:[%s4245_s5 + $0xa4] sm:$0xf]  ;;  %v2209_v15 = vor.u32 %v2548_v13, %v2206_v28 }
 0x2b7   :  { %1724 = vmatpush.bf16.msra.mxu0 %v2225_v40  ;;  %v2278_v63 = vld [vmem:[%s4245_s5 + $0xa8] sm:$0xf0]  ;;  %v2606_v56 = vld [vmem:[%s4245_s5 + $0x1e4] sm:$0xf]  ;;  %1700 = vmatmul.bf16.vlgmr.msrb.gmra.mxu2 %v4099_v39  ;;  %v1257_v20 = vadd.f32 1.0, %v2189_v47  ;;  %v2369_v52 = vor.u32 %v2588_v42, %v2366_v1  ;;  %v925_v4 = vmul.f32 0.5, %v3660_v30 }
 0x2b8   :  { %1748 = vmatpush.bf16.msra.mxu2 %v2385_v7  ;;  %v1245_v54 = vsel %vm1244_vm11, %v4044_v48, %v1241_v33  ;;  %v2438_v48 = vld [vmem:[%s4245_s5 + $0x1e8] sm:$0xf0]  ;;  %v2546_v10 = vld [vmem:[%s4245_s5 + $0x4] sm:$0xf]  ;;  %v2281_v19 = vor.u32 %v2566_v55, %v2278_v63  ;;  %v2564_v34 = vld [vmem:[%s4245_s5 + $0x94] sm:$0xf] }
 0x2b9   :  { %1737 = vmatpush.bf16.msra.mxu1 %v2297_v0  ;;  %v1250_v8 = vsel %vm1247_vm12, %v1249_v16, %v1245_v54  ;;  %v2198_v27 = vld [vmem:[%s4245_s5 + $0x8] sm:$0xf0]  ;;  %v2586_v32 = vld [vmem:[%s4245_s5 + $0x144] sm:$0xf]  ;;  %v2441_v41 = vor.u32 %v2606_v56, %v2438_v48  ;;  %v2270_v43 = vld [vmem:[%s4245_s5 + $0x98] sm:$0xf0]  ;;  %v1265_v36 = vmul.f32 %v1257_v20, %v921_v25 }
 0x2ba   :  { %v1251_v35 = vmul.f32 %v1250_v8, %v1226_v50  ;;  %1713 = vmatpush.bf16.msrb.mxu3 %v2389_v57  ;;  %v2358_v22 = vld [vmem:[%s4245_s5 + $0x148] sm:$0xf0]  ;;  %v2201_v40 = vor.u32 %v2546_v10, %v2198_v27  ;;  %v2604_v38 = vld [vmem:[%s4245_s5 + $0x1d4] sm:$0xf]  ;;  %v2430_v24 = vld [vmem:[%s4245_s5 + $0x1d8] sm:$0xf0]  ;;  %v2273_v51 = vor.u32 %v2564_v34, %v2270_v43 }
 0x2bb   :  { %1725 = vmatpush.bf16.msra.mxu0 %v2217_v60  ;;  %v2361_v5 = vor.u32 %v2586_v32, %v2358_v22  ;;  %v2433_v53 = vor.u32 %v2604_v38, %v2430_v24  ;;  %v2584_v14 = vld [vmem:[%s4245_s5 + $0x134] sm:$0xf]  ;;  %v2350_v7 = vld [vmem:[%s4245_s5 + $0x138] sm:$0xf0]  ;;  %v2562_v30 = vld [vmem:[%s4245_s5 + $0x84] sm:$0xf] }
 0x2bc   :  { %1749 = vmatpush.bf16.msra.mxu2 %v2377_v49  ;;  %v2193_v61 = vclamps-f32 %v1251_v35, 1.0  ;;  %v2262_v18 = vld [vmem:[%s4245_s5 + $0x88] sm:$0xf0]  ;;  %v2602_v37 = vld [vmem:[%s4245_s5 + $0x1c4] sm:$0xf]  ;;  %v2353_v17 = vor.u32 %v2584_v14, %v2350_v7 }
 0x2bd   :  { %1738 = vmatpush.bf16.msra.mxu1 %v2289_v21  ;;  %v2422_v31 = vld [vmem:[%s4245_s5 + $0x1c8] sm:$0xf0]  ;;  %v2265_v0 = vor.u32 %v2562_v30, %v2262_v18  ;;  %v2582_v2 = vld [vmem:[%s4245_s5 + $0x124] sm:$0xf]  ;;  %v2600_v6 = vld [vmem:[%s4245_s5 + $0x1b4] sm:$0xf] }
 0x2be   :  { %1762 = vmatpush.bf16.msra.mxu3 %v2449_v3  ;;  %v1261_v29 = vadd.f32 1.0, %v2193_v61  ;;  %v2425_v26 = vor.u32 %v2602_v37, %v2422_v31  ;;  %v2342_v60 = vld [vmem:[%s4245_s5 + $0x128] sm:$0xf0]  ;;  %v2414_v44 = vld [vmem:[%s4245_s5 + $0x1b8] sm:$0xf0] }
 0x2bf   :  { %1726 = vmatpush.bf16.msra.mxu0 %v2209_v15  ;;  %v2345_v46 = vor.u32 %v2582_v2, %v2342_v60  ;;  %v2417_v50 = vor.u32 %v2600_v6, %v2414_v44  ;;  %v2580_v33 = vld [vmem:[%s4245_s5 + $0x114] sm:$0xf]  ;;  %v2598_v13 = vld [vmem:[%s4245_s5 + $0x1a4] sm:$0xf]  ;;  %v2406_v28 = vld [vmem:[%s4245_s5 + $0x1a8] sm:$0xf0] }
 0x2c0   :  { %1750 = vmatpush.bf16.msra.mxu2 %v2369_v52  ;;  %v1269_v23 = vmul.f32 %v1261_v29, %v925_v4  ;;  %v2409_v16 = vor.u32 %v2598_v13, %v2406_v28  ;;  %v2578_v49 = vld [vmem:[%s4245_s5 + $0x104] sm:$0xf]  ;;  %v2326_v57 = vld [vmem:[%s4245_s5 + $0x108] sm:$0xf0]  ;;  %v2596_v42 = vld [vmem:[%s4245_s5 + $0x194] sm:$0xf] }
 0x2c1   :  { %1739 = vmatpush.bf16.msra.mxu1 %v2281_v19  ;;  %v2398_v54 = vld [vmem:[%s4245_s5 + $0x198] sm:$0xf0]  ;;  %v2594_v3 = vld [vmem:[%s4245_s5 + $0x184] sm:$0xf]  ;;  %v2390_v1 = vld [vmem:[%s4245_s5 + $0x188] sm:$0xf0] }
 0x2c2   :  { %1763 = vmatpush.bf16.msra.mxu3 %v2441_v41  ;;  %v1273_v58 = vpack.c.bf16 %v1269_v23, %v1265_v36  ;;  %v2401_v21 = vor.u32 %v2596_v42, %v2398_v54  ;;  %v2393_v55 = vor.u32 %v2594_v3, %v2390_v1  ;;  %v1338_v8 = vld [vmem:[%s4246_s6] sm:$0x3] }
 0x2c3   :  { %1727 = vmatpush.bf16.msra.mxu0 %v2201_v40  ;;  %v1340_v63 = vperm.slane %v1338_v8, 0  ;;  %v1341_v24 = vperm.slane %v1338_v8, 1 }
 0x2c4   :  { %1751 = vmatpush.bf16.msra.mxu2 %v2361_v5  ;;  %1714 = vmatmul.bf16.vlgmr.msrb.gmra.mxu3 %v1273_v58 }
 0x2c5   :  { %1740 = vmatpush.bf16.msra.mxu1 %v2273_v51 }
 0x2c6   :  { %1764 = vmatpush.bf16.msra.mxu3 %v2433_v53  ;;  %1728 = vmatmul.bf16.vlgmr.msra.gmra.mxu0 %v3845_v45  ;;  %v2334_v45 = vld [vmem:[%s4245_s5 + $0x118] sm:$0xf0]  ;;  %s2667_s5 = smov [#allocation2]  }
 0x2c7   :  { %v2337_v47 = vor.u32 %v2580_v33, %v2334_v45  ;;  %s1788_s6 = sshll.u32 %s2667_s5, 4  ;;  %s1789_s6 = int_to_ptr.vmem [resolvable:$true] %s1788_s6 }
 0x2c8   :  { %1752 = vmatpush.bf16.msra.mxu2 %v2353_v17 }
 0x2c9   :  { %1741 = vmatpush.bf16.msra.mxu1 %v2265_v0 }
 0x2ca   :  { %1765 = vmatpush.bf16.msra.mxu3 %v2425_v26 }
 0x2cc   :  { %1753 = vmatpush.bf16.msra.mxu2 %v2345_v46  ;;  %1742 = vmatmul.bf16.vlgmr.msra.gmra.mxu1 %v3926_v9  ;;  %v2329_v9 = vor.u32 %v2578_v49, %v2326_v57 }
 0x2ce   :  { %1766 = vmatpush.bf16.msra.mxu3 %v2417_v50 }
 0x2d0   :  { %1754 = vmatpush.bf16.msra.mxu2 %v2337_v47 }
 0x2d2   :  { %1767 = vmatpush.bf16.msra.mxu3 %v2409_v16 }
 0x2d4   :  { %1755 = vmatpush.bf16.msra.mxu2 %v2329_v9 }
 0x2d6   :  { %1768 = vmatpush.bf16.msra.mxu3 %v2401_v21 }
 0x2d7   :  { %1756 = vmatmul.bf16.vlgmr.msra.gmra.mxu2 %v4099_v39 }
 0x2da   :  { %1769 = vmatpush.bf16.msra.mxu3 %v2393_v55 }
 0x2dd   :  { %1770 = vmatmul.bf16.vlgmr.msra.gmra.mxu3 %v1273_v58 }
 0x323   :  { %v1673_v15 = vpop.f32.mrf.mxu0 }
 0x324   :  { %v1674_v35 = vadd.f32 %v1673_v15, %v1340_v63 }
 0x329   :  { %v1687_v56 = vpop.f32.mrf.mxu1 }
 0x32a   :  { %v1688_v10 = vadd.f32 %v1687_v56, %v1674_v35 }
 0x32b   :  { %v1675_v20 = vpop.f32.mrf.mxu0 }
 0x32c   :  { %v1676_v61 = vadd.f32 %v1675_v20, %v1340_v63 }
 0x331   :  { %v1689_v25 = vpop.f32.mrf.mxu1 }
 0x332   :  { %v1690_v41 = vadd.f32 %v1689_v25, %v1676_v61 }
 0x33a   :  { %v1701_v48 = vpop.f32.mrf.mxu2 }
 0x33b   :  { %v1702_v27 = vadd.f32 %v1701_v48, %v1688_v10 }
 0x342   :  { %v1703_v19 = vpop.f32.mrf.mxu2 }
 0x343   :  { %v1704_v22 = vadd.f32 %v1703_v19, %v1690_v41  ;;  %v1729_v38 = vpop.f32.mrf.mxu0 }
 0x344   :  { %v1730_v29 = vadd.f32 %v1729_v38, %v1341_v24 }
 0x347   :  { %v1715_v52 = vpop.f32.mrf.mxu3 }
 0x348   :  { %v1716_v32 = vadd.f32 %v1715_v52, %v1702_v27 }
 0x349   :  { %v1743_v4 = vpop.f32.mrf.mxu1 }
 0x34a   :  { %v1776_v39 = vadd.f32 %v1716_v32, %v2985_v59  ;;  %v1744_v5 = vadd.f32 %v1743_v4, %v1730_v29 }
 0x34b   :  { %v1731_v51 = vpop.f32.mrf.mxu0 }
 0x34c   :  { %1780 = vst [vmem:[#allocation2] sm:$0xff] %v1776_v39  ;;  %v1732_v7 = vadd.f32 %v1731_v51, %v1341_v24 }
 0x34f   :  { %v1717_v34 = vpop.f32.mrf.mxu3 }
 0x350   :  { %v1718_v40 = vadd.f32 %v1717_v34, %v1704_v22 }
 0x351   :  { %v1745_v59 = vpop.f32.mrf.mxu1 }
 0x352   :  { %v1778_v43 = vadd.f32 %v1718_v40, %v2997_v11  ;;  %v1746_v37 = vadd.f32 %v1745_v59, %v1732_v7 }
 0x354   :  { %1782 = vst [vmem:[#allocation2 + $0x10] sm:$0xff] %v1778_v43 }
 0x35a   :  { %v1757_v36 = vpop.f32.mrf.mxu2 }
 0x35b   :  { %v1758_v23 = vadd.f32 %v1757_v36, %v1744_v5 }
 0x360   :  { %v1771_v53 = vpop.f32.mrf.mxu3 }
 0x361   :  { %v1772_v14 = vadd.f32 %v1771_v53, %v1758_v23 }
 0x362   :  { %v1759_v18 = vpop.f32.mrf.mxu2 }
 0x363   :  { %v1777_v30 = vadd.f32 %v1772_v14, %v2988_v62  ;;  %v1760_v31 = vadd.f32 %v1759_v18, %v1746_v37 }
 0x365   :  { %1781 = vst [vmem:[#allocation2 + $0x8] sm:$0xff] %v1777_v30 }
 0x368   :  { %v1773_v11 = vpop.f32.mrf.mxu3 }
 0x369   :  { %v1774_v58 = vadd.f32 %v1773_v11, %v1760_v31 }
 0x36b   :  { %v1779_v17 = vadd.f32 %v1774_v58, %v3000_v12 }
 0x36d   :  { %1783 = vst [vmem:[#allocation2 + $0x18] sm:$0xff] %v1779_v17 }
 0x36e   :  { %1796 = dma.vmem_to_hbm [thread:$0]  %s1789_s6, 512, %s1791_s21, [#allocation3], %s2668_s22, %s2668_s22, %s2669_s23  }
 0x36f   :  { %2664 = dma.done.wait [#allocation3], 512  }
 0x370   :  { %2665 = vsyncadd [#allocation3], 4294966784 }
 0x371   :  { %1801 = vsyncpa [#allocation3], 1 }

// kernel: _bert_layer_2d.1
= control target key start
LH: loop header
LB: loop body
LE: loop exit
PB: predicated region body
PF: predicated region fallthrough
CT: control target
= control target key end

     0   :  { %s4240_s0 = inlined_call_operand.vmem [shape: f32[16,256], index: 0, kind: input, shape index: {}]   ;;  %s4241_s1 = inlined_call_operand.vmem [shape: bf16[256,256], index: 1, kind: input, shape index: {}]   ;;  %s4242_s2 = inlined_call_operand.vmem [shape: f32[1,256], index: 2, kind: input, shape index: {}]   ;;  %s4243_s3 = inlined_call_operand.vmem [shape: bf16[256,512], index: 3, kind: input, shape index: {}]   ;;  %s4244_s4 = inlined_call_operand.vmem [shape: f32[1,512], index: 4, kind: input, shape index: {}]   ;;  %s4245_s5 = inlined_call_operand.vmem [shape: bf16[512,256], index: 5, kind: input, shape index: {}]   ;;  %s4246_s6 = inlined_call_operand.vmem [shape: f32[1,256], index: 6, kind: input, shape index: {}]   ;;  %s4247_s7 = inlined_call_operand.hbm [shape: f32[16,256], index: 7, kind: output, shape index: {}]  }
   0x1   :  { %v2713_v0 = vld [vmem:[%s4240_s0] sm:$0xff]  ;;  %v2718_v1 = vld [vmem:[%s4240_s0 + $0x8] sm:$0xff] }
   0x2   :  { %v31_v2 = vadd.f32 %v2718_v1, %v2713_v0  ;;  %v46_v3 = vmul.f32 %v2713_v0, %v2713_v0  ;;  %v47_v4 = vmul.f32 %v2718_v1, %v2718_v1 }
   0x3   :  { %12 = vsyncpa [#allocation3], 0  ;;  %v2729_v5 = vld [vmem:[%s4240_s0 + $0x10] sm:$0xff]  ;;  %v2734_v6 = vld [vmem:[%s4240_s0 + $0x18] sm:$0xff]  ;;  %v2666_v12 = vmov 256.0   ;;  %s1790_s21 = sshll.u32 %s4247_s7, 4  ;;  %s1791_s21 = int_to_ptr.hbm [resolvable:$true] %s1790_s21 }
   0x4   :  { %32 = vadd.xlane.f32.xlu0 %v31_v2  ;;  %v50_v7 = vadd.f32 %v47_v4, %v46_v3  ;;  %v48_v8 = vmul.f32 %v2729_v5, %v2729_v5  ;;  %v49_v9 = vmul.f32 %v2734_v6, %v2734_v6  ;;  %v34_v10 = vadd.f32 %v2734_v6, %v2729_v5  ;;  %v1860_v13 = vld [vmem:[%s4241_s1 + $0x70] sm:$0xf]  ;;  %v2465_v14 = vld [vmem:[%s4241_s1 + $0x74] sm:$0xf0]  ;;  %v2464_v18 = vld [vmem:[%s4241_s1 + $0x74] sm:$0xf] }
   0x5   :  { %2614 = vrcp.f32 %v2666_v12  ;;  %v1924_v15 = vld [vmem:[%s4241_s1 + $0xf0] sm:$0xf]  ;;  %v1861_v16 = vor.u32 %v2465_v14, %v1860_v13  ;;  %v2481_v17 = vld [vmem:[%s4241_s1 + $0xf4] sm:$0xf0]  ;;  %v1862_v19 = vld [vmem:[%s4241_s1 + $0x78] sm:$0xf0] }
   0x6   :  { %51 = vadd.xlane.f32.xlu1 %v50_v7  ;;  %v53_v11 = vadd.f32 %v49_v9, %v48_v8  ;;  %v1925_v20 = vor.u32 %v2481_v17, %v1924_v15  ;;  %v1865_v21 = vor.u32 %v2464_v18, %v1862_v19  ;;  %v2480_v22 = vld [vmem:[%s4241_s1 + $0xf4] sm:$0xf]  ;;  %v1926_v23 = vld [vmem:[%s4241_s1 + $0xf8] sm:$0xf0]  ;;  %v1852_v26 = vld [vmem:[%s4241_s1 + $0x60] sm:$0xf] }
   0x7   :  { %294 = vmatpush.bf16.msra.mxu0 %v1861_v16  ;;  %v1929_v24 = vor.u32 %v2480_v22, %v1926_v23  ;;  %v2463_v27 = vld [vmem:[%s4241_s1 + $0x64] sm:$0xf0]  ;;  %v1916_v28 = vld [vmem:[%s4241_s1 + $0xe0] sm:$0xf]  ;;  %v2462_v31 = vld [vmem:[%s4241_s1 + $0x64] sm:$0xf] }
   0x8   :  { %308 = vmatpush.bf16.msra.mxu1 %v1925_v20  ;;  %322 = vmatpush.bf16.msra.mxu2 %v1865_v21  ;;  %v1853_v29 = vor.u32 %v2463_v27, %v1852_v26  ;;  %v2479_v30 = vld [vmem:[%s4241_s1 + $0xe4] sm:$0xf0]  ;;  %v1854_v32 = vld [vmem:[%s4241_s1 + $0x68] sm:$0xf0]  ;;  %v2478_v36 = vld [vmem:[%s4241_s1 + $0xe4] sm:$0xf] }
   0x9   :  { %336 = vmatpush.bf16.msra.mxu3 %v1929_v24  ;;  %v1917_v34 = vor.u32 %v2479_v30, %v1916_v28  ;;  %v1857_v35 = vor.u32 %v2462_v31, %v1854_v32  ;;  %v1918_v37 = vld [vmem:[%s4241_s1 + $0xe8] sm:$0xf0]  ;;  %v1844_v39 = vld [vmem:[%s4241_s1 + $0x50] sm:$0xf]  ;;  %v2461_v40 = vld [vmem:[%s4241_s1 + $0x54] sm:$0xf0] }
   0xa   :  { %v1921_v38 = vor.u32 %v2478_v36, %v1918_v37  ;;  %v1908_v41 = vld [vmem:[%s4241_s1 + $0xd0] sm:$0xf]  ;;  %v1845_v42 = vor.u32 %v2461_v40, %v1844_v39  ;;  %v2477_v43 = vld [vmem:[%s4241_s1 + $0xd4] sm:$0xf0]  ;;  %v2460_v44 = vld [vmem:[%s4241_s1 + $0x54] sm:$0xf] }
   0xb   :  { %v2766_v25 = vpop.eup %2614  ;;  %295 = vmatpush.bf16.msra.mxu0 %v1853_v29  ;;  %v1846_v45 = vld [vmem:[%s4241_s1 + $0x58] sm:$0xf0]  ;;  %v1909_v47 = vor.u32 %v2477_v43, %v1908_v41  ;;  %v2476_v49 = vld [vmem:[%s4241_s1 + $0xd4] sm:$0xf]  ;;  %v1836_v52 = vld [vmem:[%s4241_s1 + $0x40] sm:$0xf] }
   0xc   :  { %35 = vadd.xlane.f32.xlu0 %v34_v10  ;;  %v38_v33 = vmul.f32 256.0, %v2766_v25  ;;  %309 = vmatpush.bf16.msra.mxu1 %v1917_v34  ;;  %v1849_v48 = vor.u32 %v2460_v44, %v1846_v45  ;;  %v1910_v50 = vld [vmem:[%s4241_s1 + $0xd8] sm:$0xf0]  ;;  %v2459_v53 = vld [vmem:[%s4241_s1 + $0x44] sm:$0xf0]  ;;  %vm42_vm0 = vweird.f32 %v2766_v25  ;;  %s2668_s22 = smov 256  }
   0xd   :  { %323 = vmatpush.bf16.msra.mxu2 %v1857_v35  ;;  %337 = vmatpush.bf16.msra.mxu3 %v1921_v38  ;;  %v1913_v51 = vor.u32 %v2476_v49, %v1910_v50  ;;  %v1900_v54 = vld [vmem:[%s4241_s1 + $0xc0] sm:$0xf]  ;;  %v1837_v55 = vor.u32 %v2459_v53, %v1836_v52  ;;  %v2475_v56 = vld [vmem:[%s4241_s1 + $0xc4] sm:$0xf0]  ;;  %v2458_v57 = vld [vmem:[%s4241_s1 + $0x44] sm:$0xf] }
   0xe   :  { %54 = vadd.xlane.f32.xlu1 %v53_v11  ;;  %v39_v46 = vsub.f32 1.0, %v38_v33  ;;  %v1838_v58 = vld [vmem:[%s4241_s1 + $0x48] sm:$0xf0]  ;;  %v1901_v60 = vor.u32 %v2475_v56, %v1900_v54  ;;  %v2474_v62 = vld [vmem:[%s4241_s1 + $0xc4] sm:$0xf]  ;;  %s2669_s23 = smov 16  }
   0xf   :  { %296 = vmatpush.bf16.msra.mxu0 %v1845_v42  ;;  %v1841_v61 = vor.u32 %v2458_v57, %v1838_v58  ;;  %v1902_v63 = vld [vmem:[%s4241_s1 + $0xc8] sm:$0xf0]  ;;  %v1828_v3 = vld [vmem:[%s4241_s1 + $0x30] sm:$0xf]  ;;  %v2457_v4 = vld [vmem:[%s4241_s1 + $0x34] sm:$0xf0] }
  0x10   :  { %310 = vmatpush.bf16.msra.mxu1 %v1909_v47  ;;  %v40_v59 = vmul.f32 %v2766_v25, %v39_v46  ;;  %v1905_v2 = vor.u32 %v2474_v62, %v1902_v63  ;;  %v1892_v7 = vld [vmem:[%s4241_s1 + $0xb0] sm:$0xf]  ;;  %v1829_v8 = vor.u32 %v2457_v4, %v1828_v3  ;;  %v2473_v9 = vld [vmem:[%s4241_s1 + $0xb4] sm:$0xf0]  ;;  %v2456_v10 = vld [vmem:[%s4241_s1 + $0x34] sm:$0xf] }
  0x11   :  { %324 = vmatpush.bf16.msra.mxu2 %v1849_v48  ;;  %338 = vmatpush.bf16.msra.mxu3 %v1913_v51  ;;  %v1830_v11 = vld [vmem:[%s4241_s1 + $0x38] sm:$0xf0]  ;;  %v1893_v13 = vor.u32 %v2473_v9, %v1892_v7  ;;  %v2472_v15 = vld [vmem:[%s4241_s1 + $0xb4] sm:$0xf]  ;;  %v1820_v18 = vld [vmem:[%s4241_s1 + $0x20] sm:$0xf] }
  0x12   :  { %v41_v12 = vadd.f32 %v2766_v25, %v40_v59  ;;  %v1833_v14 = vor.u32 %v2456_v10, %v1830_v11  ;;  %v1894_v16 = vld [vmem:[%s4241_s1 + $0xb8] sm:$0xf0]  ;;  %v2455_v19 = vld [vmem:[%s4241_s1 + $0x24] sm:$0xf0]  ;;  %v1884_v20 = vld [vmem:[%s4241_s1 + $0xa0] sm:$0xf] }
  0x13   :  { %297 = vmatpush.bf16.msra.mxu0 %v1837_v55  ;;  %v1897_v17 = vor.u32 %v2472_v15, %v1894_v16  ;;  %v1821_v21 = vor.u32 %v2455_v19, %v1820_v18  ;;  %v2471_v22 = vld [vmem:[%s4241_s1 + $0xa4] sm:$0xf0]  ;;  %v2454_v23 = vld [vmem:[%s4241_s1 + $0x24] sm:$0xf]  ;;  %v1822_v24 = vld [vmem:[%s4241_s1 + $0x28] sm:$0xf0] }
  0x14   :  { %311 = vmatpush.bf16.msra.mxu1 %v1901_v60  ;;  %v2887_v26 = vsel %vm42_vm0, %v2766_v25, %v41_v12  ;;  %v1885_v27 = vor.u32 %v2471_v22, %v1884_v20  ;;  %v1825_v28 = vor.u32 %v2454_v23, %v1822_v24  ;;  %v2470_v29 = vld [vmem:[%s4241_s1 + $0xa4] sm:$0xf]  ;;  %v1886_v30 = vld [vmem:[%s4241_s1 + $0xa8] sm:$0xf0]  ;;  %v1812_v32 = vld [vmem:[%s4241_s1 + $0x10] sm:$0xf] }
  0x15   :  { %325 = vmatpush.bf16.msra.mxu2 %v1841_v61  ;;  %339 = vmatpush.bf16.msra.mxu3 %v1905_v2  ;;  %v1889_v31 = vor.u32 %v2470_v29, %v1886_v30  ;;  %v2453_v25 = vld [vmem:[%s4241_s1 + $0x14] sm:$0xf0]  ;;  %v1876_v33 = vld [vmem:[%s4241_s1 + $0x90] sm:$0xf]  ;;  %v2452_v37 = vld [vmem:[%s4241_s1 + $0x14] sm:$0xf] }
  0x16   :  { %v1813_v35 = vor.u32 %v2453_v25, %v1812_v32  ;;  %v2469_v36 = vld [vmem:[%s4241_s1 + $0x94] sm:$0xf0]  ;;  %v1814_v38 = vld [vmem:[%s4241_s1 + $0x18] sm:$0xf0]  ;;  %v2468_v42 = vld [vmem:[%s4241_s1 + $0x94] sm:$0xf] }
  0x17   :  { %298 = vmatpush.bf16.msra.mxu0 %v1829_v8  ;;  %v1877_v40 = vor.u32 %v2469_v36, %v1876_v33  ;;  %v1817_v41 = vor.u32 %v2452_v37, %v1814_v38  ;;  %v1878_v43 = vld [vmem:[%s4241_s1 + $0x98] sm:$0xf0]  ;;  %v1804_v44 = vld [vmem:[%s4241_s1] sm:$0xf]  ;;  %v2451_v47 = vld [vmem:[%s4241_s1 + $0x4] sm:$0xf0] }
  0x18   :  { %312 = vmatpush.bf16.msra.mxu1 %v1893_v13  ;;  %v1881_v46 = vor.u32 %v2468_v42, %v1878_v43  ;;  %v1868_v48 = vld [vmem:[%s4241_s1 + $0x80] sm:$0xf]  ;;  %v2467_v49 = vld [vmem:[%s4241_s1 + $0x84] sm:$0xf0]  ;;  %v2450_v52 = vld [vmem:[%s4241_s1 + $0x4] sm:$0xf]  ;;  %v1805_v55 = vor.u32 %v2451_v47, %v1804_v44 }
  0x19   :  { %326 = vmatpush.bf16.msra.mxu2 %v1833_v14  ;;  %340 = vmatpush.bf16.msra.mxu3 %v1897_v17  ;;  %v1806_v53 = vld [vmem:[%s4241_s1 + $0x8] sm:$0xf0]  ;;  %v2466_v54 = vld [vmem:[%s4241_s1 + $0x84] sm:$0xf]  ;;  %v1869_v56 = vor.u32 %v2467_v49, %v1868_v48  ;;  %v128_v36 = vld [vmem:[%s4242_s2] sm:$0x3] }
  0x1a   :  { %v1809_v57 = vor.u32 %v2450_v52, %v1806_v53  ;;  %v1870_v58 = vld [vmem:[%s4241_s1 + $0x88] sm:$0xf0]  ;;  %v2044_v37 = vld [vmem:[%s4243_s3 + $0xe0] sm:$0xf]  ;;  %v2512_v38 = vld [vmem:[%s4243_s3 + $0xec] sm:$0xf0] }
  0x1b   :  { %299 = vmatpush.bf16.msra.mxu0 %v1821_v21  ;;  %v1873_v60 = vor.u32 %v2466_v54, %v1870_v58  ;;  %v2510_v42 = vld [vmem:[%s4243_s3 + $0xe4] sm:$0xf]  ;;  %v2046_v43 = vld [vmem:[%s4243_s3 + $0xf0] sm:$0xf0]  ;;  %v130_v49 = vperm.slane %v128_v36, 0  ;;  %v131_v53 = vperm.slane %v128_v36, 1 }
  0x1c   :  { %313 = vmatpush.bf16.msra.mxu1 %v1885_v27  ;;  %v2174_v47 = vld [vmem:[%s4243_s3 + $0x1f0] sm:$0xf0] }
  0x1d   :  { %327 = vmatpush.bf16.msra.mxu2 %v1825_v28  ;;  %341 = vmatpush.bf16.msra.mxu3 %v1889_v31 }
  0x1f   :  { %300 = vmatpush.bf16.msra.mxu0 %v1813_v35 }
  0x20   :  { %314 = vmatpush.bf16.msra.mxu1 %v1877_v40  ;;  %v2045_v40 = vor.u32 %v2512_v38, %v2044_v37  ;;  %v2534_v37 = vld [vmem:[%s4243_s3 + $0x1a4] sm:$0xf]  ;;  %v2142_v38 = vld [vmem:[%s4243_s3 + $0x1b0] sm:$0xf0] }
  0x21   :  { %328 = vmatpush.bf16.msra.mxu2 %v1817_v41  ;;  %342 = vmatpush.bf16.msra.mxu3 %v1881_v46  ;;  %v2544_v41 = vld [vmem:[%s4243_s3 + $0x1ec] sm:$0xf0]  ;;  %v2542_v46 = vld [vmem:[%s4243_s3 + $0x1e4] sm:$0xf] }
  0x22   :  { %v2177_v48 = vor.u32 %v2542_v46, %v2174_v47  ;;  %v1998_v46 = vld [vmem:[%s4243_s3 + $0x90] sm:$0xf0] }
  0x23   :  { %301 = vmatpush.bf16.msra.mxu0 %v1805_v55 }
  0x24   :  { %315 = vmatpush.bf16.msra.mxu1 %v1869_v56 }
  0x25   :  { %329 = vmatpush.bf16.msra.mxu2 %v1809_v57  ;;  %343 = vmatpush.bf16.msra.mxu3 %v1873_v60 }
  0x27   :  { %806 = vmatpush.bf16.msrb.mxu0 %v2045_v40  ;;  %v1996_v40 = vld [vmem:[%s4243_s3 + $0x80] sm:$0xf] }
  0x29   :  { %848 = vmatpush.bf16.msrb.mxu3 %v2177_v48 }
  0x77   :  { %v33_v34 = vpop.xlane.xlu0 %32 }
  0x78   :  { %v2914_v39 = vmul.f32 %v2887_v26, %v33_v34 }
  0x79   :  { %v52_v45 = vpop.xlane.xlu1 %51 }
  0x7a   :  { %v56_v50 = vmul.f32 %v52_v45, %v2887_v26  ;;  %v58_v51 = vmul.f32 %v2914_v39, %v2914_v39  ;;  %v64_v24 = vsub.f32 %v2713_v0, %v2914_v39  ;;  %v65_v27 = vsub.f32 %v2718_v1, %v2914_v39  ;;  %v2172_v39 = vld [vmem:[%s4243_s3 + $0x1e0] sm:$0xf] }
  0x7b   :  { %v2173_v44 = vor.u32 %v2544_v41, %v2172_v39  ;;  %v2049_v45 = vor.u32 %v2510_v42, %v2046_v43  ;;  %v2145_v39 = vor.u32 %v2534_v37, %v2142_v38  ;;  %v2500_v41 = vld [vmem:[%s4243_s3 + $0x8c] sm:$0xf0]  ;;  %v2124_v42 = vld [vmem:[%s4243_s3 + $0x180] sm:$0xf]  ;;  %v2514_v38 = vld [vmem:[%s4243_s3 + $0x104] sm:$0xf] }
  0x7c   :  { %v60_v59 = vsub.f32 %v56_v50, %v58_v51  ;;  %v1997_v43 = vor.u32 %v2500_v41, %v1996_v40  ;;  %v2052_v40 = vld [vmem:[%s4243_s3 + $0xe8] sm:$0xf] }
  0x7d   :  { %820 = vmatpush.bf16.msrb.mxu1 %v2173_v44  ;;  %834 = vmatpush.bf16.msrb.mxu2 %v2049_v45  ;;  %v2532_v44 = vld [vmem:[%s4243_s3 + $0x18c] sm:$0xf0]  ;;  %v2498_v45 = vld [vmem:[%s4243_s3 + $0x84] sm:$0xf] }
  0x7e   :  { %v62_v61 = vmax.f32 %v60_v59, 0.0  ;;  %v2125_v47 = vor.u32 %v2532_v44, %v2124_v42  ;;  %v2001_v48 = vor.u32 %v2498_v45, %v1998_v46  ;;  %v2513_v42 = vld [vmem:[%s4243_s3 + $0xf4] sm:$0xf0] }
  0x7f   :  { %v36_v62 = vpop.xlane.xlu0 %35  ;;  %v2545_v44 = vld [vmem:[%s4243_s3 + $0x1f4] sm:$0xf0]  ;;  %v2053_v45 = vor.u32 %v2513_v42, %v2052_v40  ;;  %v1988_v40 = vld [vmem:[%s4243_s3 + $0x68] sm:$0xf] }
  0x80   :  { %v68_v63 = vadd.f32 1e-05, %v62_v61  ;;  %v45_v2 = vmul.f32 %v2887_v26, %v36_v62 }
  0x81   :  { %v55_v3 = vpop.xlane.xlu1 %54 }
  0x82   :  { %2616 = vrsqrt.f32 %v68_v63  ;;  %v57_v4 = vmul.f32 %v55_v3, %v2887_v26  ;;  %v59_v7 = vmul.f32 %v45_v2, %v45_v2  ;;  %vm76_vm2 = vweird.f32 %v68_v63 }
  0x83   :  { %v66_v28 = vsub.f32 %v2729_v5, %v45_v2  ;;  %v67_v29 = vsub.f32 %v2734_v6, %v45_v2 }
  0x84   :  { %v61_v8 = vsub.f32 %v57_v4, %v59_v7 }
  0x86   :  { %v63_v9 = vmax.f32 %v61_v8, 0.0 }
  0x88   :  { %v2617_v10 = vpop.eup %2616  ;;  %v69_v12 = vadd.f32 1e-05, %v63_v9 }
  0x89   :  { %v71_v11 = vmul.f32 %v2617_v10, %v68_v63  ;;  %vm77_vm1 = vweird.f32 %v2617_v10 }
  0x8a   :  { %2618 = vrsqrt.f32 %v69_v12  ;;  %vm78_vm4 = vmor %vm76_vm2, %vm77_vm1  ;;  %vm86_vm5 = vweird.f32 %v69_v12 }
  0x8b   :  { %v72_v13 = vmul.f32 %v2617_v10, %v71_v11 }
  0x8d   :  { %v73_v14 = vmul.f32 0.5, %v72_v13 }
  0x8f   :  { %v74_v17 = vsub.f32 1.5, %v73_v14 }
  0x90   :  { %v2619_v15 = vpop.eup %2618 }
  0x91   :  { %v81_v16 = vmul.f32 %v2619_v15, %v69_v12  ;;  %v75_v20 = vmul.f32 %v2617_v10, %v74_v17  ;;  %vm87_vm3 = vweird.f32 %v2619_v15  ;;  %v2156_v17 = vld [vmem:[%s4243_s3 + $0x1c0] sm:$0xf] }
  0x92   :  { %vm88_vm6 = vmor %vm86_vm5, %vm87_vm3 }
  0x93   :  { %v82_v18 = vmul.f32 %v2619_v15, %v81_v16  ;;  %v79_v22 = vsel %vm78_vm4, %v2617_v10, %v75_v20  ;;  %v2506_v20 = vld [vmem:[%s4243_s3 + $0xc4] sm:$0xf] }
  0x94   :  { %v90_v31 = vmul.f32 %v79_v22, %v64_v24  ;;  %v91_v25 = vmul.f32 %v79_v22, %v65_v27  ;;  %v2538_v24 = vld [vmem:[%s4243_s3 + $0x1c4] sm:$0xf]  ;;  %v2158_v27 = vld [vmem:[%s4243_s3 + $0x1d0] sm:$0xf0] }
  0x95   :  { %v83_v19 = vmul.f32 0.5, %v82_v18 }
  0x97   :  { %v84_v21 = vsub.f32 1.5, %v83_v19  ;;  %v2540_v19 = vld [vmem:[%s4243_s3 + $0x1cc] sm:$0xf0] }
  0x98   :  { %v2157_v22 = vor.u32 %v2540_v19, %v2156_v17  ;;  %v2488_v17 = vld [vmem:[%s4243_s3 + $0x2c] sm:$0xf0] }
  0x99   :  { %v85_v23 = vmul.f32 %v2619_v15, %v84_v21  ;;  %v2030_v21 = vld [vmem:[%s4243_s3 + $0xd0] sm:$0xf0] }
  0x9a   :  { %821 = vmatpush.bf16.msrb.mxu1 %v2157_v22  ;;  %v1950_v22 = vld [vmem:[%s4243_s3 + $0x30] sm:$0xf0] }
  0x9b   :  { %v89_v30 = vsel %vm88_vm6, %v2619_v15, %v85_v23  ;;  %v2033_v23 = vor.u32 %v2506_v20, %v2030_v21  ;;  %v2520_v20 = vld [vmem:[%s4243_s3 + $0x12c] sm:$0xf0]  ;;  %v2486_v21 = vld [vmem:[%s4243_s3 + $0x24] sm:$0xf] }
  0x9c   :  { %v92_v32 = vmul.f32 %v89_v30, %v66_v28  ;;  %v93_v33 = vmul.f32 %v89_v30, %v67_v29  ;;  %v2161_v28 = vor.u32 %v2538_v24, %v2158_v27  ;;  %v2012_v29 = vld [vmem:[%s4243_s3 + $0xa0] sm:$0xf]  ;;  %v2504_v30 = vld [vmem:[%s4243_s3 + $0xac] sm:$0xf0]  ;;  %v1953_v24 = vor.u32 %v2486_v21, %v1950_v22  ;;  %v2518_v27 = vld [vmem:[%s4243_s3 + $0x124] sm:$0xf] }
  0x9d   :  { %835 = vmatpush.bf16.msrb.mxu2 %v2033_v23  ;;  %v2004_v21 = vld [vmem:[%s4243_s3 + $0x88] sm:$0xf]  ;;  %v2501_v22 = vld [vmem:[%s4243_s3 + $0x94] sm:$0xf0] }
  0x9e   :  { %v94_v34 = vpack.c.bf16 %v92_v32, %v90_v31  ;;  %v95_v35 = vpack.c.bf16 %v93_v33, %v91_v25  ;;  %v2140_v31 = vld [vmem:[%s4243_s3 + $0x1a0] sm:$0xf]  ;;  %849 = vmatpush.bf16.msrb.mxu3 %v2161_v28  ;;  %v2013_v32 = vor.u32 %v2504_v30, %v2012_v29  ;;  %v2536_v25 = vld [vmem:[%s4243_s3 + $0x1ac] sm:$0xf0]  ;;  %v2502_v33 = vld [vmem:[%s4243_s3 + $0xa4] sm:$0xf] }
  0x9f   :  { %v2078_v28 = vld [vmem:[%s4243_s3 + $0x130] sm:$0xf0]  ;;  %v1932_v30 = vld [vmem:[%s4243_s3] sm:$0xf] }
  0xa0   :  { %302 = vmatmul.bf16.vlgmr.msra.gmra.mxu0 %v94_v34  ;;  %316 = vmatmul.bf16.vlgmr.msra.gmra.mxu1 %v95_v35  ;;  %v2081_v29 = vor.u32 %v2518_v27, %v2078_v28  ;;  %v2533_v27 = vld [vmem:[%s4243_s3 + $0x194] sm:$0xf0]  ;;  %v2499_v28 = vld [vmem:[%s4243_s3 + $0x8c] sm:$0xf] }
  0xa1   :  { %330 = vmatmul.bf16.vlgmr.msra.gmra.mxu2 %v94_v34  ;;  %344 = vmatmul.bf16.vlgmr.msra.gmra.mxu3 %v95_v35  ;;  %v2014_v34 = vld [vmem:[%s4243_s3 + $0xb0] sm:$0xf0]  ;;  %v2141_v35 = vor.u32 %v2536_v25, %v2140_v31  ;;  %v2484_v31 = vld [vmem:[%s4243_s3 + $0xc] sm:$0xf0] }
  0xa2   :  { %v2017_v36 = vor.u32 %v2502_v33, %v2014_v34  ;;  %850 = vmatpush.bf16.msrb.mxu3 %v2145_v39  ;;  %v1933_v25 = vor.u32 %v2484_v31, %v1932_v30  ;;  %v2516_v33 = vld [vmem:[%s4243_s3 + $0x10c] sm:$0xf0]  ;;  %v2482_v34 = vld [vmem:[%s4243_s3 + $0x4] sm:$0xf]  ;;  %v2062_v39 = vld [vmem:[%s4243_s3 + $0x110] sm:$0xf0]  ;;  %v2005_v31 = vor.u32 %v2501_v22, %v2004_v21 }
  0xa3   :  { %822 = vmatpush.bf16.msrb.mxu1 %v2141_v35  ;;  %v1934_v35 = vld [vmem:[%s4243_s3 + $0x10] sm:$0xf0]  ;;  %v2065_v41 = vor.u32 %v2514_v38, %v2062_v39 }
  0xa4   :  { %836 = vmatpush.bf16.msrb.mxu2 %v2017_v36  ;;  %v1937_v37 = vor.u32 %v2482_v34, %v1934_v35 }
  0xa7   :  { %823 = vmatpush.bf16.msrb.mxu1 %v2125_v47  ;;  %v2511_v47 = vld [vmem:[%s4243_s3 + $0xec] sm:$0xf] }
  0xa8   :  { %837 = vmatpush.bf16.msrb.mxu2 %v2001_v48  ;;  %v2054_v48 = vld [vmem:[%s4243_s3 + $0xf8] sm:$0xf0] }
 0x11d   :  { %v303_v50 = vpop.f32.mrf.mxu0  ;;  %v317_v52 = vpop.f32.mrf.mxu1 }
 0x11e   :  { %v304_v51 = vadd.f32 %v303_v50, %v130_v49  ;;  %v2126_v50 = vld [vmem:[%s4243_s3 + $0x190] sm:$0xf0] }
 0x120   :  { %v318_v54 = vadd.f32 %v317_v52, %v304_v51  ;;  %v1980_v52 = vld [vmem:[%s4243_s3 + $0x60] sm:$0xf] }
 0x122   :  { %v2985_v59 = vadd.f32 %v318_v54, %v2713_v0  ;;  %v2108_v54 = vld [vmem:[%s4243_s3 + $0x160] sm:$0xf] }
 0x124   :  { %v331_v55 = vpop.f32.mrf.mxu2  ;;  %v345_v56 = vpop.f32.mrf.mxu3  ;;  %v362_v4 = vmul.f32 %v2985_v59, %v2985_v59 }
 0x125   :  { %v332_v57 = vadd.f32 %v331_v55, %v131_v53  ;;  %v305_v58 = vpop.f32.mrf.mxu0  ;;  %v319_v63 = vpop.f32.mrf.mxu1 }
 0x126   :  { %v306_v61 = vadd.f32 %v305_v58, %v130_v49  ;;  %v2530_v49 = vld [vmem:[%s4243_s3 + $0x184] sm:$0xf]  ;;  %v1982_v58 = vld [vmem:[%s4243_s3 + $0x70] sm:$0xf0] }
 0x127   :  { %v346_v60 = vadd.f32 %v345_v56, %v332_v57  ;;  %v2129_v51 = vor.u32 %v2530_v49, %v2126_v50  ;;  %v2528_v56 = vld [vmem:[%s4243_s3 + $0x16c] sm:$0xf0]  ;;  %v2494_v57 = vld [vmem:[%s4243_s3 + $0x64] sm:$0xf]  ;;  %v2543_v49 = vld [vmem:[%s4243_s3 + $0x1ec] sm:$0xf]  ;;  %v2057_v50 = vor.u32 %v2511_v47, %v2054_v48 }
 0x128   :  { %v320_v2 = vadd.f32 %v319_v63, %v306_v61  ;;  %v1985_v61 = vor.u32 %v2494_v57, %v1982_v58  ;;  %v2526_v63 = vld [vmem:[%s4243_s3 + $0x164] sm:$0xf]  ;;  %v2541_v57 = vld [vmem:[%s4243_s3 + $0x1d4] sm:$0xf0]  ;;  %v2507_v58 = vld [vmem:[%s4243_s3 + $0xcc] sm:$0xf] }
 0x129   :  { %v2988_v62 = vadd.f32 %v346_v60, %v2718_v1  ;;  %851 = vmatpush.bf16.msrb.mxu3 %v2129_v51  ;;  %v2109_v60 = vor.u32 %v2528_v56, %v2108_v54  ;;  %v2182_v51 = vld [vmem:[%s4243_s3 + $0x1f8] sm:$0xf0]  ;;  %v2164_v56 = vld [vmem:[%s4243_s3 + $0x1c8] sm:$0xf]  ;;  %v2527_v48 = vld [vmem:[%s4243_s3 + $0x16c] sm:$0xf] }
 0x12a   :  { %v2997_v11 = vadd.f32 %v320_v2, %v2729_v5  ;;  %v2028_v5 = vld [vmem:[%s4243_s3 + $0xc0] sm:$0xf]  ;;  %v2110_v2 = vld [vmem:[%s4243_s3 + $0x170] sm:$0xf0]  ;;  %838 = vmatpush.bf16.msrb.mxu2 %v1985_v61  ;;  %v2185_v54 = vor.u32 %v2543_v49, %v2182_v51  ;;  %v2038_v61 = vld [vmem:[%s4243_s3 + $0xd8] sm:$0xf0] }
 0x12b   :  { %v354_v3 = vadd.f32 %v2988_v62, %v2985_v59  ;;  %v363_v7 = vmul.f32 %v2988_v62, %v2988_v62  ;;  %824 = vmatpush.bf16.msrb.mxu1 %v2109_v60  ;;  %v2165_v60 = vor.u32 %v2541_v57, %v2164_v56  ;;  %v1990_v47 = vld [vmem:[%s4243_s3 + $0x78] sm:$0xf0]  ;;  %v2100_v56 = vld [vmem:[%s4243_s3 + $0x148] sm:$0xf] }
 0x12c   :  { %v333_v8 = vpop.f32.mrf.mxu2  ;;  %v347_v10 = vpop.f32.mrf.mxu3  ;;  %v364_v14 = vmul.f32 %v2997_v11, %v2997_v11  ;;  %v2118_v49 = vld [vmem:[%s4243_s3 + $0x178] sm:$0xf0] }
 0x12d   :  { %v334_v9 = vadd.f32 %v333_v8, %v131_v53  ;;  %355 = vadd.xlane.f32.xlu2 %v354_v3  ;;  %v366_v0 = vadd.f32 %v363_v7, %v362_v4  ;;  %v2496_v53 = vld [vmem:[%s4243_s3 + $0x6c] sm:$0xf0]  ;;  %v2113_v3 = vor.u32 %v2526_v63, %v2110_v2  ;;  %v1964_v4 = vld [vmem:[%s4243_s3 + $0x40] sm:$0xf]  ;;  %v2539_v63 = vld [vmem:[%s4243_s3 + $0x1cc] sm:$0xf]  ;;  %v2121_v57 = vor.u32 %v2527_v48, %v2118_v49 }
 0x12e   :  { %v1981_v55 = vor.u32 %v2496_v53, %v1980_v52  ;;  %v2492_v7 = vld [vmem:[%s4243_s3 + $0x4c] sm:$0xf0]  ;;  %v2092_v8 = vld [vmem:[%s4243_s3 + $0x140] sm:$0xf]  ;;  %v2036_v52 = vld [vmem:[%s4243_s3 + $0xc8] sm:$0xf] }
 0x12f   :  { %v348_v1 = vadd.f32 %v347_v10, %v334_v9  ;;  %367 = vadd.xlane.f32.xlu0 %v366_v0  ;;  %852 = vmatpush.bf16.msrb.mxu3 %v2113_v3  ;;  %v1965_v9 = vor.u32 %v2492_v7, %v1964_v4  ;;  %v2524_v0 = vld [vmem:[%s4243_s3 + $0x14c] sm:$0xf0]  ;;  %v2490_v10 = vld [vmem:[%s4243_s3 + $0x44] sm:$0xf]  ;;  %v2509_v53 = vld [vmem:[%s4243_s3 + $0xd4] sm:$0xf0]  ;;  %v2041_v3 = vor.u32 %v2507_v58, %v2038_v61 }
 0x130   :  { %v2166_v2 = vld [vmem:[%s4243_s3 + $0x1d8] sm:$0xf0]  ;;  %v2525_v58 = vld [vmem:[%s4243_s3 + $0x154] sm:$0xf0] }
 0x131   :  { %v3000_v12 = vadd.f32 %v348_v1, %v2734_v6  ;;  %v2508_v6 = vld [vmem:[%s4243_s3 + $0xcc] sm:$0xf0]  ;;  %v1966_v1 = vld [vmem:[%s4243_s3 + $0x50] sm:$0xf0]  ;;  %v2169_v4 = vor.u32 %v2539_v63, %v2166_v2  ;;  %v1974_v61 = vld [vmem:[%s4243_s3 + $0x58] sm:$0xf0]  ;;  %v2101_v2 = vor.u32 %v2525_v58, %v2100_v56 }
 0x132   :  { %v2029_v18 = vor.u32 %v2508_v6, %v2028_v5  ;;  %v1948_v6 = vld [vmem:[%s4243_s3 + $0x20] sm:$0xf] }
 0x133   :  { %v357_v13 = vadd.f32 %v3000_v12, %v2997_v11  ;;  %v365_v15 = vmul.f32 %v3000_v12, %v3000_v12  ;;  %v1949_v19 = vor.u32 %v2488_v17, %v1948_v6  ;;  %v2535_v17 = vld [vmem:[%s4243_s3 + $0x1ac] sm:$0xf] }
 0x134   :  { %807 = vmatpush.bf16.msrb.mxu0 %v2029_v18  ;;  %v2076_v18 = vld [vmem:[%s4243_s3 + $0x120] sm:$0xf] }
 0x135   :  { %358 = vadd.xlane.f32.xlu2 %v357_v13  ;;  %v369_v16 = vadd.f32 %v365_v15, %v364_v14  ;;  %v2093_v13 = vor.u32 %v2524_v0, %v2092_v8  ;;  %v1969_v14 = vor.u32 %v2490_v10, %v1966_v1  ;;  %v2522_v15 = vld [vmem:[%s4243_s3 + $0x144] sm:$0xf]  ;;  %v2077_v23 = vor.u32 %v2520_v20, %v2076_v18  ;;  %v2020_v8 = vld [vmem:[%s4243_s3 + $0xa8] sm:$0xf]  ;;  %v2150_v18 = vld [vmem:[%s4243_s3 + $0x1b8] sm:$0xf0] }
 0x136   :  { %v2148_v0 = vld [vmem:[%s4243_s3 + $0x1a8] sm:$0xf] }
 0x137   :  { %370 = vadd.xlane.f32.xlu1 %v369_v16  ;;  %v2094_v16 = vld [vmem:[%s4243_s3 + $0x150] sm:$0xf0]  ;;  %825 = vmatpush.bf16.msrb.mxu1 %v2093_v13  ;;  %v2537_v13 = vld [vmem:[%s4243_s3 + $0x1b4] sm:$0xf0] }
 0x138   :  { %808 = vmatpush.bf16.msrb.mxu0 %v2013_v32  ;;  %v2097_v5 = vor.u32 %v2522_v15, %v2094_v16  ;;  %839 = vmatpush.bf16.msrb.mxu2 %v1969_v14  ;;  %v2060_v32 = vld [vmem:[%s4243_s3 + $0x100] sm:$0xf]  ;;  %v2503_v14 = vld [vmem:[%s4243_s3 + $0xac] sm:$0xf]  ;;  %v2022_v15 = vld [vmem:[%s4243_s3 + $0xb8] sm:$0xf0] }
 0x139   :  { %v2061_v36 = vor.u32 %v2516_v33, %v2060_v32  ;;  %v2025_v6 = vor.u32 %v2503_v14, %v2022_v15  ;;  %v2134_v33 = vld [vmem:[%s4243_s3 + $0x198] sm:$0xf0]  ;;  %v2487_v15 = vld [vmem:[%s4243_s3 + $0x2c] sm:$0xf] }
 0x13a   :  { %853 = vmatpush.bf16.msrb.mxu3 %v2097_v5  ;;  %v2149_v5 = vor.u32 %v2537_v13, %v2148_v0  ;;  %v2489_v0 = vld [vmem:[%s4243_s3 + $0x34] sm:$0xf0] }
 0x13b   :  { %826 = vmatpush.bf16.msrb.mxu1 %v2077_v23  ;;  %v2132_v23 = vld [vmem:[%s4243_s3 + $0x188] sm:$0xf]  ;;  %v2521_v13 = vld [vmem:[%s4243_s3 + $0x134] sm:$0xf0] }
 0x13c   :  { %809 = vmatpush.bf16.msrb.mxu0 %v1997_v43  ;;  %840 = vmatpush.bf16.msrb.mxu2 %v1953_v24  ;;  %v2180_v43 = vld [vmem:[%s4243_s3 + $0x1e8] sm:$0xf]  ;;  %v2153_v24 = vor.u32 %v2535_v17, %v2150_v18  ;;  %v2133_v32 = vor.u32 %v2533_v27, %v2132_v23  ;;  %v2519_v17 = vld [vmem:[%s4243_s3 + $0x12c] sm:$0xf]  ;;  %v2086_v18 = vld [vmem:[%s4243_s3 + $0x138] sm:$0xf0] }
 0x13d   :  { %v2181_v46 = vor.u32 %v2545_v44, %v2180_v43  ;;  %v2116_v44 = vld [vmem:[%s4243_s3 + $0x168] sm:$0xf]  ;;  %v2089_v27 = vor.u32 %v2519_v17, %v2086_v18 }
 0x13e   :  { %854 = vmatpush.bf16.msrb.mxu3 %v2081_v29  ;;  %v2006_v29 = vld [vmem:[%s4243_s3 + $0x98] sm:$0xf0]  ;;  %v1940_v23 = vld [vmem:[%s4243_s3 + $0x8] sm:$0xf] }
 0x13f   :  { %827 = vmatpush.bf16.msrb.mxu1 %v2061_v36  ;;  %v2009_v34 = vor.u32 %v2499_v28, %v2006_v29  ;;  %v2068_v28 = vld [vmem:[%s4243_s3 + $0x108] sm:$0xf]  ;;  %v2517_v29 = vld [vmem:[%s4243_s3 + $0x114] sm:$0xf0] }
 0x140   :  { %810 = vmatpush.bf16.msrb.mxu0 %v1981_v55  ;;  %841 = vmatpush.bf16.msrb.mxu2 %v1937_v37  ;;  %v2037_v55 = vor.u32 %v2509_v53, %v2036_v52 }
 0x142   :  { %855 = vmatpush.bf16.msrb.mxu3 %v2065_v41  ;;  %v2497_v41 = vld [vmem:[%s4243_s3 + $0x74] sm:$0xf0] }
 0x143   :  { %876 = vmatpush.bf16.msra.mxu1 %v2181_v46  ;;  %v1989_v43 = vor.u32 %v2497_v41, %v1988_v40  ;;  %v2495_v46 = vld [vmem:[%s4243_s3 + $0x6c] sm:$0xf] }
 0x144   :  { %811 = vmatpush.bf16.msrb.mxu0 %v1965_v9  ;;  %890 = vmatpush.bf16.msra.mxu2 %v2057_v50  ;;  %v2505_v9 = vld [vmem:[%s4243_s3 + $0xb4] sm:$0xf0]  ;;  %v1993_v53 = vor.u32 %v2495_v46, %v1990_v47 }
 0x145   :  { %v2021_v1 = vor.u32 %v2505_v9, %v2020_v8  ;;  %v1956_v8 = vld [vmem:[%s4243_s3 + $0x28] sm:$0xf] }
 0x146   :  { %904 = vmatpush.bf16.msra.mxu3 %v2185_v54  ;;  %v1972_v54 = vld [vmem:[%s4243_s3 + $0x48] sm:$0xf] }
 0x147   :  { %877 = vmatpush.bf16.msra.mxu1 %v2165_v60  ;;  %v2491_v60 = vld [vmem:[%s4243_s3 + $0x4c] sm:$0xf] }
 0x148   :  { %812 = vmatpush.bf16.msrb.mxu0 %v1949_v19  ;;  %891 = vmatpush.bf16.msra.mxu2 %v2041_v3  ;;  %v1977_v3 = vor.u32 %v2491_v60, %v1974_v61 }
 0x14a   :  { %905 = vmatpush.bf16.msra.mxu3 %v2169_v4  ;;  %v2523_v4 = vld [vmem:[%s4243_s3 + $0x14c] sm:$0xf] }
 0x14b   :  { %878 = vmatpush.bf16.msra.mxu1 %v2149_v5 }
 0x14c   :  { %813 = vmatpush.bf16.msrb.mxu0 %v1933_v25  ;;  %v2531_v25 = vld [vmem:[%s4243_s3 + $0x18c] sm:$0xf]  ;;  %892 = vmatpush.bf16.msra.mxu2 %v2025_v6  ;;  %v1957_v6 = vor.u32 %v2489_v0, %v1956_v8 }
 0x14d   :  { %v2137_v36 = vor.u32 %v2531_v25, %v2134_v33  ;;  %v2515_v25 = vld [vmem:[%s4243_s3 + $0x10c] sm:$0xf]  ;;  %v2070_v33 = vld [vmem:[%s4243_s3 + $0x118] sm:$0xf0] }
 0x14e   :  { %906 = vmatpush.bf16.msra.mxu3 %v2153_v24  ;;  %v2485_v24 = vld [vmem:[%s4243_s3 + $0x14] sm:$0xf0]  ;;  %v2073_v40 = vor.u32 %v2515_v25, %v2070_v33 }
 0x14f   :  { %879 = vmatpush.bf16.msra.mxu1 %v2133_v32  ;;  %v1942_v32 = vld [vmem:[%s4243_s3 + $0x18] sm:$0xf0] }
 0x150   :  { %862 = vmatpush.bf16.msra.mxu0 %v2053_v45  ;;  %893 = vmatpush.bf16.msra.mxu2 %v2009_v34  ;;  %v2529_v45 = vld [vmem:[%s4243_s3 + $0x174] sm:$0xf0]  ;;  %v1941_v34 = vor.u32 %v2485_v24, %v1940_v23 }
 0x151   :  { %v2117_v52 = vor.u32 %v2529_v45, %v2116_v44 }
 0x152   :  { %907 = vmatpush.bf16.msra.mxu3 %v2137_v36 }
 0x153   :  { %880 = vmatpush.bf16.msra.mxu1 %v2117_v52 }
 0x154   :  { %863 = vmatpush.bf16.msra.mxu0 %v2037_v55  ;;  %v2493_v55 = vld [vmem:[%s4243_s3 + $0x54] sm:$0xf0]  ;;  %894 = vmatpush.bf16.msra.mxu2 %v1993_v53 }
 0x156   :  { %908 = vmatpush.bf16.msra.mxu3 %v2121_v57 }
 0x157   :  { %881 = vmatpush.bf16.msra.mxu1 %v2101_v2 }
 0x158   :  { %864 = vmatpush.bf16.msra.mxu0 %v2021_v1  ;;  %v2084_v1 = vld [vmem:[%s4243_s3 + $0x128] sm:$0xf]  ;;  %895 = vmatpush.bf16.msra.mxu2 %v1977_v3 }
 0x159   :  { %v2085_v21 = vor.u32 %v2521_v13, %v2084_v1 }
 0x15b   :  { %882 = vmatpush.bf16.msra.mxu1 %v2085_v21 }
 0x15c   :  { %865 = vmatpush.bf16.msra.mxu0 %v2005_v31 }
 0x160   :  { %866 = vmatpush.bf16.msra.mxu0 %v1989_v43 }
 0x1a0   :  { %v356_v7 = vpop.xlane.xlu2 %355 }
 0x1a1   :  { %v3234_v10 = vmul.f32 %v356_v7, %v2887_v26  ;;  %v2102_v7 = vld [vmem:[%s4243_s3 + $0x158] sm:$0xf0] }
 0x1a2   :  { %v368_v16 = vpop.xlane.xlu0 %367  ;;  %v2105_v9 = vor.u32 %v2523_v4, %v2102_v7 }
 0x1a3   :  { %v372_v19 = vmul.f32 %v368_v16, %v2887_v26  ;;  %v374_v20 = vmul.f32 %v3234_v10, %v3234_v10  ;;  %v1958_v16 = vld [vmem:[%s4243_s3 + $0x38] sm:$0xf0] }
 0x1a4   :  { %v1961_v22 = vor.u32 %v2487_v15, %v1958_v16  ;;  %909 = vmatpush.bf16.msra.mxu3 %v2105_v9 }
 0x1a5   :  { %v376_v30 = vsub.f32 %v372_v19, %v374_v20 }
 0x1a6   :  { %896 = vmatpush.bf16.msra.mxu2 %v1961_v22 }
 0x1a7   :  { %v378_v35 = vmax.f32 %v376_v30, 0.0  ;;  %v2483_v30 = vld [vmem:[%s4243_s3 + $0xc] sm:$0xf] }
 0x1a8   :  { %v359_v37 = vpop.xlane.xlu2 %358  ;;  %v1945_v36 = vor.u32 %v2483_v30, %v1942_v32  ;;  %910 = vmatpush.bf16.msra.mxu3 %v2089_v27 }
 0x1a9   :  { %v3278_v38 = vadd.f32 1e-05, %v378_v35  ;;  %v3281_v39 = vmul.f32 %v359_v37, %v2887_v26  ;;  %v2069_v35 = vor.u32 %v2517_v29, %v2068_v28 }
 0x1aa   :  { %v371_v42 = vpop.xlane.xlu1 %370  ;;  %897 = vmatpush.bf16.msra.mxu2 %v1945_v36 }
 0x1ab   :  { %2620 = vrsqrt.f32 %v3278_v38  ;;  %v373_v50 = vmul.f32 %v371_v42, %v2887_v26  ;;  %v375_v51 = vmul.f32 %v3281_v39, %v3281_v39  ;;  %v1973_v26 = vor.u32 %v2493_v55, %v1972_v54  ;;  %883 = vmatpush.bf16.msra.mxu1 %v2069_v35 }
 0x1ac   :  { %911 = vmatpush.bf16.msra.mxu3 %v2073_v40  ;;  %vm392_vm8 = vweird.f32 %v3278_v38  ;;  %v382_v52 = vsub.f32 %v2997_v11, %v3281_v39  ;;  %v383_v53 = vsub.f32 %v3000_v12, %v3281_v39 }
 0x1ad   :  { %v377_v63 = vsub.f32 %v373_v50, %v375_v51  ;;  %867 = vmatpush.bf16.msra.mxu0 %v1973_v26  ;;  %v380_v50 = vsub.f32 %v2985_v59, %v3234_v10  ;;  %v381_v51 = vsub.f32 %v2988_v62, %v3234_v10  ;;  %v3396_v10 = vld [vmem:[%s4244_s4] sm:$0xf] }
 0x1ae   :  { %v478_v39 = vperm.slane %v3396_v10, 0  ;;  %v479_v3 = vperm.slane %v3396_v10, 1  ;;  %v480_v28 = vperm.slane %v3396_v10, 2 }
 0x1af   :  { %v379_v14 = vmax.f32 %v377_v63, 0.0 }
 0x1b1   :  { %v2621_v5 = vpop.eup %2620  ;;  %v385_v20 = vadd.f32 1e-05, %v379_v14  ;;  %868 = vmatpush.bf16.msra.mxu0 %v1957_v6 }
 0x1b2   :  { %v387_v19 = vmul.f32 %v2621_v5, %v3278_v38  ;;  %vm393_vm7 = vweird.f32 %v2621_v5 }
 0x1b3   :  { %2622 = vrsqrt.f32 %v385_v20  ;;  %vm394_vm10 = vmor %vm392_vm8, %vm393_vm7  ;;  %vm402_vm11 = vweird.f32 %v385_v20 }
 0x1b4   :  { %v388_v31 = vmul.f32 %v2621_v5, %v387_v19 }
 0x1b5   :  { %869 = vmatpush.bf16.msra.mxu0 %v1941_v34  ;;  %v2252_v34 = vld [vmem:[%s4245_s5 + $0x70] sm:$0xf] }
 0x1b6   :  { %v389_v37 = vmul.f32 0.5, %v388_v31 }
 0x1b8   :  { %v390_v42 = vsub.f32 1.5, %v389_v37 }
 0x1b9   :  { %v2623_v41 = vpop.eup %2622 }
 0x1ba   :  { %v397_v43 = vmul.f32 %v2623_v41, %v385_v20  ;;  %v391_v45 = vmul.f32 %v2621_v5, %v390_v42  ;;  %vm403_vm9 = vweird.f32 %v2623_v41 }
 0x1bb   :  { %vm404_vm12 = vmor %vm402_vm11, %vm403_vm9 }
 0x1bc   :  { %v398_v44 = vmul.f32 %v2623_v41, %v397_v43  ;;  %v395_v49 = vsel %vm394_vm10, %v2621_v5, %v391_v45 }
 0x1bd   :  { %v406_v54 = vmul.f32 %v395_v49, %v380_v50  ;;  %v407_v56 = vmul.f32 %v395_v49, %v381_v51 }
 0x1be   :  { %v399_v46 = vmul.f32 0.5, %v398_v44  ;;  %v2561_v44 = vld [vmem:[%s4245_s5 + $0x74] sm:$0xf0] }
 0x1c0   :  { %v400_v47 = vsub.f32 1.5, %v399_v46 }
 0x1c2   :  { %v401_v48 = vmul.f32 %v2623_v41, %v400_v47 }
 0x1c4   :  { %v405_v38 = vsel %vm404_vm12, %v2623_v41, %v401_v48  ;;  %v2253_v48 = vor.u32 %v2561_v44, %v2252_v34 }
 0x1c5   :  { %v408_v55 = vmul.f32 %v405_v38, %v382_v52  ;;  %v409_v57 = vmul.f32 %v405_v38, %v383_v53 }
 0x1c7   :  { %v410_v26 = vpack.c.bf16 %v408_v55, %v406_v54  ;;  %v411_v58 = vpack.c.bf16 %v409_v57, %v407_v56 }
 0x1c9   :  { %814 = vmatmul.bf16.vlgmr.msrb.gmra.mxu0 %v410_v26  ;;  %828 = vmatmul.bf16.vlgmr.msrb.gmra.mxu1 %v411_v58 }
 0x1ca   :  { %842 = vmatmul.bf16.vlgmr.msrb.gmra.mxu2 %v410_v26  ;;  %856 = vmatmul.bf16.vlgmr.msrb.gmra.mxu3 %v411_v58 }
 0x1cb   :  { %1664 = vmatpush.bf16.msrb.mxu0 %v2253_v48 }
 0x1d9   :  { %870 = vmatmul.bf16.vlgmr.msra.gmra.mxu0 %v410_v26  ;;  %884 = vmatmul.bf16.vlgmr.msra.gmra.mxu1 %v411_v58 }
 0x1da   :  { %898 = vmatmul.bf16.vlgmr.msra.gmra.mxu2 %v410_v26  ;;  %912 = vmatmul.bf16.vlgmr.msra.gmra.mxu3 %v411_v58 }
 0x246   :  { %v815_v60 = vpop.f32.mrf.mxu0  ;;  %v829_v61 = vpop.f32.mrf.mxu1 }
 0x247   :  { %v816_v63 = vadd.f32 %v815_v60, %v478_v39 }
 0x249   :  { %v3399_v2 = vadd.f32 %v829_v61, %v816_v63 }
 0x24b   :  { %v3403_v4 = vmul.f32 0.70710677, %v3399_v2 }
 0x24d   :  { %v934_v7 = vmul.f32 %v3403_v4, %v3403_v4  ;;  %v843_v8 = vpop.f32.mrf.mxu2  ;;  %v857_v0 = vpop.f32.mrf.mxu3 }
 0x24e   :  { %v844_v9 = vadd.f32 %v843_v8, %v479_v3  ;;  %v817_v1 = vpop.f32.mrf.mxu0  ;;  %v831_v16 = vpop.f32.mrf.mxu1 }
 0x24f   :  { %v3407_v13 = vmin.f32 %v934_v7, 16.0  ;;  %v818_v14 = vadd.f32 %v817_v1, %v478_v39 }
 0x250   :  { %v3409_v15 = vadd.f32 %v857_v0, %v844_v9 }
 0x251   :  { %v936_v5 = vmul.f32 2.1237322e-06, %v3407_v13  ;;  %v947_v6 = vmul.f32 3.8918573e-05, %v3407_v13  ;;  %v3413_v17 = vadd.f32 %v831_v16, %v818_v14 }
 0x252   :  { %v3416_v18 = vmul.f32 0.70710677, %v3409_v15 }
 0x253   :  { %v937_v19 = vadd.f32 0.00028619796, %v936_v5  ;;  %v948_v20 = vadd.f32 0.001143296, %v947_v6  ;;  %v3421_v22 = vmul.f32 0.70710677, %v3413_v17 }
 0x254   :  { %v974_v21 = vmul.f32 %v3416_v18, %v3416_v18 }
 0x255   :  { %v938_v23 = vmul.f32 %v937_v19, %v3407_v13  ;;  %v949_v24 = vmul.f32 %v948_v20, %v3407_v13  ;;  %v845_v27 = vpop.f32.mrf.mxu2  ;;  %v1094_v30 = vmul.f32 %v3421_v22, %v3421_v22  ;;  %v859_v40 = vpop.f32.mrf.mxu3 }
 0x256   :  { %v3426_v29 = vmin.f32 %v974_v21, 16.0  ;;  %v846_v31 = vadd.f32 %v845_v27, %v479_v3  ;;  %v871_v32 = vpop.f32.mrf.mxu0  ;;  %v885_v54 = vpop.f32.mrf.mxu1 }
 0x257   :  { %v939_v25 = vadd.f32 0.0036580483, %v938_v23  ;;  %v950_v33 = vadd.f32 0.014752088, %v949_v24  ;;  %v3435_v37 = vmin.f32 %v1094_v30, 16.0  ;;  %v872_v43 = vadd.f32 %v871_v32, %v480_v28 }
 0x258   :  { %v976_v35 = vmul.f32 2.1237322e-06, %v3426_v29  ;;  %v987_v36 = vmul.f32 3.8918573e-05, %v3426_v29  ;;  %v3438_v42 = vadd.f32 %v859_v40, %v846_v31 }
 0x259   :  { %v951_v41 = vmul.f32 %v950_v33, %v3407_v13  ;;  %v1096_v47 = vmul.f32 2.1237322e-06, %v3435_v37  ;;  %v1107_v50 = vmul.f32 3.8918573e-05, %v3435_v37  ;;  %v940_v51 = vmul.f32 %v939_v25, %v3407_v13 }
 0x25a   :  { %v977_v45 = vadd.f32 0.00028619796, %v976_v35  ;;  %v988_v46 = vadd.f32 0.001143296, %v987_v36  ;;  %v3452_v57 = vmul.f32 0.70710677, %v3438_v42  ;;  %v3454_v26 = vadd.f32 %v885_v54, %v872_v43 }
 0x25b   :  { %v952_v49 = vadd.f32 0.112945676, %v951_v41  ;;  %v1097_v38 = vadd.f32 0.00028619796, %v1096_v47  ;;  %v1108_v56 = vadd.f32 0.001143296, %v1107_v50 }
 0x25c   :  { %v978_v52 = vmul.f32 %v977_v45, %v3426_v29  ;;  %v989_v53 = vmul.f32 %v988_v46, %v3426_v29  ;;  %v1134_v3 = vmul.f32 %v3452_v57, %v3452_v57  ;;  %v941_v7 = vadd.f32 0.05243302, %v940_v51 }
 0x25d   :  { %v953_v55 = vmul.f32 %v952_v49, %v3407_v13  ;;  %v1098_v61 = vmul.f32 %v1097_v38, %v3435_v37  ;;  %v1109_v63 = vmul.f32 %v1108_v56, %v3435_v37  ;;  %v3466_v16 = vmul.f32 0.70710677, %v3454_v26 }
 0x25e   :  { %v979_v58 = vadd.f32 0.0036580483, %v978_v52  ;;  %v990_v39 = vadd.f32 0.014752088, %v989_v53  ;;  %v3463_v14 = vmin.f32 %v1134_v3, 16.0  ;;  %v942_v23 = vmul.f32 %v941_v7, %v3407_v13 }
 0x25f   :  { %v954_v60 = vadd.f32 0.4994258, %v953_v55  ;;  %v1110_v1 = vadd.f32 0.014752088, %v1109_v63  ;;  %v1099_v19 = vadd.f32 0.0036580483, %v1098_v61  ;;  %v1014_v31 = vmul.f32 %v3466_v16, %v3466_v16 }
 0x260   :  { %v980_v8 = vmul.f32 %v979_v58, %v3426_v29  ;;  %v991_v9 = vmul.f32 %v990_v39, %v3426_v29  ;;  %v1136_v21 = vmul.f32 2.1237322e-06, %v3463_v14  ;;  %v1147_v30 = vmul.f32 3.8918573e-05, %v3463_v14 }
 0x261   :  { %v955_v0 = vmul.f32 %v954_v60, %v3407_v13  ;;  %v1111_v20 = vmul.f32 %v1110_v1, %v3435_v37  ;;  %v1100_v25 = vmul.f32 %v1099_v19, %v3435_v37  ;;  %v943_v35 = vadd.f32 0.18741608, %v942_v23 }
 0x262   :  { %v992_v5 = vadd.f32 0.112945676, %v991_v9  ;;  %v981_v24 = vadd.f32 0.05243302, %v980_v8  ;;  %v1137_v34 = vadd.f32 0.00028619796, %v1136_v21 }
 0x263   :  { %v3468_v6 = vadd.f32 1.0, %v955_v0  ;;  %v1112_v33 = vadd.f32 0.112945676, %v1111_v20  ;;  %v1148_v44 = vadd.f32 0.001143296, %v1147_v30  ;;  %v3483_v45 = vmin.f32 %v1014_v31, 16.0 }
 0x264   :  { %v993_v27 = vmul.f32 %v992_v5, %v3426_v29  ;;  %v982_v36 = vmul.f32 %v981_v24, %v3426_v29  ;;  %v1138_v43 = vmul.f32 %v1137_v34, %v3463_v14  ;;  %v1101_v48 = vadd.f32 0.05243302, %v1100_v25 }
 0x265   :  { %2624 = vrcp.f32 %v3468_v6  ;;  %v1113_v41 = vmul.f32 %v1112_v33, %v3435_v37  ;;  %v1149_v50 = vmul.f32 %v1148_v44, %v3463_v14  ;;  %v944_v53 = vmul.f32 %v943_v35, %v3407_v13 }
 0x266   :  { %v994_v32 = vadd.f32 0.4994258, %v993_v27  ;;  %v983_v52 = vadd.f32 0.18741608, %v982_v36  ;;  %v1139_v38 = vadd.f32 0.0036580483, %v1138_v43  ;;  %v1102_v60 = vmul.f32 %v1101_v48, %v3435_v37 }
 0x267   :  { %v1114_v49 = vadd.f32 0.4994258, %v1113_v41  ;;  %v1016_v54 = vmul.f32 2.1237322e-06, %v3483_v45  ;;  %v1150_v56 = vadd.f32 0.014752088, %v1149_v50  ;;  %vm962_vm13 = vweird.f32 %v3468_v6  ;;  %v913_v50 = vpop.f32.mrf.mxu3 }
 0x268   :  { %v995_v40 = vmul.f32 %v994_v32, %v3426_v29  ;;  %v1027_v58 = vmul.f32 3.8918573e-05, %v3483_v45  ;;  %v984_v61 = vmul.f32 %v983_v52, %v3426_v29  ;;  %v945_v13 = vadd.f32 1.1283791, %v944_v53  ;;  %v899_v29 = vpop.f32.mrf.mxu2 }
 0x269   :  { %v1115_v55 = vmul.f32 %v1114_v49, %v3435_v37  ;;  %v1151_v3 = vmul.f32 %v1150_v56, %v3463_v14  ;;  %v1140_v7 = vmul.f32 %v1139_v38, %v3463_v14  ;;  %v1017_v8 = vadd.f32 0.00028619796, %v1016_v54 }
 0x26a   :  { %v3485_v46 = vadd.f32 1.0, %v995_v40  ;;  %v481_v9 = vperm.slane %v3396_v10, 3  ;;  %v3505_v0 = vmul.f32 0.5, %v3399_v2  ;;  %v3508_v1 = vmul.f32 0.5, %v3409_v15  ;;  %v873_v40 = vpop.f32.mrf.mxu0 }
 0x26b   :  { %v3487_v47 = vpop.eup %2624  ;;  %v3499_v63 = vadd.f32 1.0, %v1115_v55  ;;  %v1028_v5 = vadd.f32 0.001143296, %v1027_v58  ;;  %v966_v21 = vand.u32 2147483647, %v3468_v6  ;;  %v3516_v23 = vmul.f32 0.5, %v3413_v17 }
 0x26c   :  { %v958_v51 = vmul.f32 %v3487_v47, %v3468_v6  ;;  %2626 = vrcp.f32 %v3485_v46  ;;  %v1103_v24 = vadd.f32 0.18741608, %v1102_v60  ;;  %v968_v2 = vand.u32 2147483648, %v3468_v6 }
 0x26d   :  { %2628 = vrcp.f32 %v3499_v63  ;;  %v985_v27 = vadd.f32 1.1283791, %v984_v61  ;;  %v3520_v15 = vmul.f32 0.5, %v3438_v42  ;;  %v1152_v30 = vadd.f32 0.112945676, %v1151_v3 }
 0x26e   :  { %v959_v39 = vsub.f32 1.0, %v958_v51  ;;  %v946_v31 = vmul.f32 %v945_v13, %v3403_v4  ;;  %v1141_v32 = vadd.f32 0.05243302, %v1140_v7  ;;  %v1018_v25 = vmul.f32 %v1017_v8, %v3483_v45 }
 0x26f   :  { %v900_v33 = vadd.f32 %v899_v29, %v481_v9  ;;  %v1153_v34 = vmul.f32 %v1152_v30, %v3463_v14  ;;  %v1029_v35 = vmul.f32 %v1028_v5, %v3483_v45  ;;  %vm963_vm14 = vweird.f32 %v3487_v47 }
 0x270   :  { %v960_v20 = vmul.f32 %v3487_v47, %v959_v39  ;;  %vm3533_vm15 = vcmp.eq.f32.partialorder %v966_v21, 8.507059e+37  ;;  %v1104_v36 = vmul.f32 %v1103_v24, %v3435_v37  ;;  %v969_v43 = vor.u32 1.1754944e-38, %v968_v2  ;;  %vm3550_vm0 = vmor %vm962_vm13, %vm963_vm14 }
 0x271   :  { %v3541_v44 = vmul.f32 %v985_v27, %v3416_v18  ;;  %v1154_v48 = vadd.f32 0.4994258, %v1153_v34  ;;  %v1030_v49 = vadd.f32 0.014752088, %v1029_v35  ;;  %v1142_v52 = vmul.f32 %v1141_v32, %v3463_v14  ;;  %v2244_v32 = vld [vmem:[%s4245_s5 + $0x60] sm:$0xf] }
 0x272   :  { %v3511_v19 = vpop.eup %2626  ;;  %v961_v42 = vadd.f32 %v3487_v47, %v960_v20  ;;  %v1019_v53 = vadd.f32 0.0036580483, %v1018_v25  ;;  %v3546_v38 = vadd.f32 %v913_v50, %v900_v33  ;;  %v874_v56 = vadd.f32 %v873_v40, %v480_v28  ;;  %v2559_v25 = vld [vmem:[%s4245_s5 + $0x64] sm:$0xf0]  ;;  %v2577_v34 = vld [vmem:[%s4245_s5 + $0xf4] sm:$0xf0] }
 0x273   :  { %v998_v17 = vmul.f32 %v3511_v19, %v3485_v46  ;;  %v3538_v41 = vpop.eup %2628  ;;  %v1155_v18 = vmul.f32 %v1154_v48, %v3463_v14  ;;  %v1031_v55 = vmul.f32 %v1030_v49, %v3483_v45  ;;  %v1008_v39 = vand.u32 2147483648, %v3485_v46  ;;  %v901_v48 = vpop.f32.mrf.mxu2 }
 0x274   :  { %v1118_v51 = vmul.f32 %v3538_v41, %v3499_v63  ;;  %v965_v58 = vsel %vm3550_vm0, %v3487_v47, %v961_v42  ;;  %v1105_v60 = vadd.f32 1.1283791, %v1104_v36  ;;  %vm1002_vm1 = vweird.f32 %v3485_v46  ;;  %v887_v47 = vpop.f32.mrf.mxu1 }
 0x275   :  { %v999_v54 = vsub.f32 1.0, %v998_v17  ;;  %v1006_v61 = vand.u32 2147483647, %v3485_v46  ;;  %v1126_v3 = vand.u32 2147483647, %v3499_v63  ;;  %v3565_v13 = vadd.f32 1.0, %v1155_v18 }
 0x276   :  { %v1119_v6 = vsub.f32 1.0, %v1118_v51  ;;  %v1143_v7 = vadd.f32 0.18741608, %v1142_v52  ;;  %v1020_v8 = vmul.f32 %v1019_v53, %v3483_v45  ;;  %v1032_v28 = vadd.f32 0.112945676, %v1031_v55 }
 0x277   :  { %v3569_v5 = vmul.f32 0.70710677, %v3546_v38  ;;  %v970_v29 = vsel %vm3533_vm15, %v969_v43, %v965_v58  ;;  %v1000_v20 = vmul.f32 %v3511_v19, %v999_v54  ;;  %2630 = vrcp.f32 %v3565_v13  ;;  %v2316_v17 = vld [vmem:[%s4245_s5 + $0xf0] sm:$0xf] }
 0x278   :  { %v3575_v21 = vadd.f32 %v887_v47, %v874_v56  ;;  %v1009_v24 = vor.u32 1.1754944e-38, %v1008_v39  ;;  %v3578_v2 = vmul.f32 %v1105_v60, %v3421_v22  ;;  %v1120_v27 = vmul.f32 %v3538_v41, %v1119_v6 }
 0x279   :  { %v1033_v30 = vmul.f32 %v1032_v28, %v3483_v45  ;;  %vm1003_vm2 = vweird.f32 %v3511_v19  ;;  %vm1122_vm3 = vweird.f32 %v3499_v63  ;;  %v1128_v33 = vand.u32 2147483648, %v3499_v63  ;;  %v915_v63 = vpop.f32.mrf.mxu3 }
 0x27a   :  { %v1054_v22 = vmul.f32 %v3569_v5, %v3569_v5  ;;  %v3599_v35 = vmul.f32 %v970_v29, %v946_v31  ;;  %vm3601_vm4 = vcmp.eq.f32.partialorder %v1006_v61, 8.507059e+37  ;;  %vm3605_vm5 = vcmp.eq.f32.partialorder %v1126_v3, 8.507059e+37  ;;  %vm3631_vm7 = vmor %vm1002_vm1, %vm1003_vm2 }
 0x27b   :  { %v1144_v36 = vmul.f32 %v1143_v7, %v3463_v14  ;;  %v1021_v40 = vadd.f32 0.05243302, %v1020_v8  ;;  %v1034_v43 = vadd.f32 0.4994258, %v1033_v30  ;;  %v1001_v49 = vadd.f32 %v3511_v19, %v1000_v20 }
 0x27c   :  { %v3611_v50 = vmin.f32 %v1054_v22, 16.0  ;;  %v3614_v31 = vmul.f32 0.70710677, %v3575_v21  ;;  %v2245_v51 = vor.u32 %v2559_v25, %v2244_v32  ;;  %v1121_v52 = vadd.f32 %v3538_v41, %v1120_v27 }
 0x27d   :  { %vm1123_vm6 = vweird.f32 %v3538_v41  ;;  %v1035_v53 = vmul.f32 %v1034_v43, %v3483_v45  ;;  %v2317_v37 = vor.u32 %v2577_v34, %v2316_v17  ;;  %v3619_v54 = vpop.eup %2630  ;;  %v902_v56 = vadd.f32 %v901_v48, %v481_v9  ;;  %v2236_v34 = vld [vmem:[%s4245_s5 + $0x50] sm:$0xf] }
 0x27e   :  { %v1056_v14 = vmul.f32 2.1237322e-06, %v3611_v50  ;;  %v1067_v18 = vmul.f32 3.8918573e-05, %v3611_v50  ;;  %v1174_v55 = vmul.f32 %v3614_v31, %v3614_v31  ;;  %1665 = vmatpush.bf16.msrb.mxu0 %v2245_v51  ;;  %v1129_v39 = vor.u32 1.1754944e-38, %v1128_v33  ;;  %vm3645_vm8 = vmor %vm1122_vm3, %vm1123_vm6 }
 0x27f   :  { %v1158_v60 = vmul.f32 %v3619_v54, %v3565_v13  ;;  %v1022_v6 = vmul.f32 %v1021_v40, %v3483_v45  ;;  %v3638_v61 = vadd.f32 1.0, %v1035_v53  ;;  %1678 = vmatpush.bf16.msrb.mxu1 %v2317_v37  ;;  %v2186_v10 = vclamps-f32 %v3599_v35, 1.0 }
 0x280   :  { %v1057_v9 = vadd.f32 0.00028619796, %v1056_v14  ;;  %v1068_v3 = vadd.f32 0.001143296, %v1067_v18  ;;  %v3649_v7 = vmin.f32 %v1174_v55, 16.0  ;;  %v1005_v8 = vsel %vm3631_vm7, %v3511_v19, %v1001_v49 }
 0x281   :  { %v1125_v28 = vsel %vm3645_vm8, %v3538_v41, %v1121_v52  ;;  %v1159_v47 = vsub.f32 1.0, %v1158_v60  ;;  %2632 = vrcp.f32 %v3638_v61  ;;  %v1145_v29 = vadd.f32 1.1283791, %v1144_v36  ;;  %v2557_v36 = vld [vmem:[%s4245_s5 + $0x54] sm:$0xf0] }
 0x282   :  { %v1058_v20 = vmul.f32 %v1057_v9, %v3611_v50  ;;  %v1069_v27 = vmul.f32 %v1068_v3, %v3611_v50  ;;  %v3660_v30 = vadd.f32 %v915_v63, %v902_v56  ;;  %v1023_v25 = vadd.f32 0.18741608, %v1022_v6  ;;  %v2308_v18 = vld [vmem:[%s4245_s5 + $0xe0] sm:$0xf]  ;;  %v2575_v55 = vld [vmem:[%s4245_s5 + $0xe4] sm:$0xf0] }
 0x283   :  { %v1160_v32 = vmul.f32 %v3619_v54, %v1159_v47  ;;  %v1176_v19 = vmul.f32 2.1237322e-06, %v3649_v7  ;;  %v1187_v33 = vmul.f32 3.8918573e-05, %v3649_v7  ;;  %v1010_v41 = vsel %vm3601_vm4, %v1009_v24, %v1005_v8  ;;  %v2228_v6 = vld [vmem:[%s4245_s5 + $0x40] sm:$0xf] }
 0x284   :  { %v1130_v22 = vsel %vm3605_vm5, %v1129_v39, %v1125_v28  ;;  %vm1163_vm9 = vweird.f32 %v3619_v54  ;;  %v1070_v17 = vadd.f32 0.014752088, %v1069_v27  ;;  %v1059_v43 = vadd.f32 0.0036580483, %v1058_v20  ;;  %v2573_v20 = vld [vmem:[%s4245_s5 + $0xd4] sm:$0xf0] }
 0x285   :  { %v1161_v40 = vadd.f32 %v3619_v54, %v1160_v32  ;;  %v1177_v48 = vadd.f32 0.00028619796, %v1176_v19  ;;  %v1188_v42 = vadd.f32 0.001143296, %v1187_v33  ;;  %vm1162_vm10 = vweird.f32 %v3565_v13 }
 0x286   :  { %v1168_v24 = vand.u32 2147483648, %v3565_v13  ;;  %v1071_v4 = vmul.f32 %v1070_v17, %v3611_v50  ;;  %v3681_v49 = vmul.f32 0.70710677, %v3660_v30  ;;  %v1131_v52 = vmul.f32 %v1130_v22, %v3578_v2  ;;  %vm3697_vm11 = vmor %vm1162_vm10, %vm1163_vm9 }
 0x287   :  { %v3683_v51 = vpop.eup %2632  ;;  %v1178_v53 = vmul.f32 %v1177_v48, %v3649_v7  ;;  %v1189_v37 = vmul.f32 %v1188_v42, %v3649_v7  ;;  %v2237_v14 = vor.u32 %v2557_v36, %v2236_v34  ;;  %v1011_v56 = vmul.f32 %v1010_v41, %v3541_v44  ;;  %v2555_v44 = vld [vmem:[%s4245_s5 + $0x44] sm:$0xf0] }
 0x288   :  { %v1166_v2 = vand.u32 2147483647, %v3565_v13  ;;  %v1024_v39 = vmul.f32 %v1023_v25, %v3483_v45  ;;  %v1038_v60 = vmul.f32 %v3683_v51, %v3638_v61  ;;  %v1165_v46 = vsel %vm3697_vm11, %v3619_v54, %v1161_v40  ;;  %v2300_v45 = vld [vmem:[%s4245_s5 + $0xd0] sm:$0xf] }
 0x289   :  { %v1060_v9 = vmul.f32 %v1059_v43, %v3611_v50  ;;  %v1072_v13 = vadd.f32 0.112945676, %v1071_v4  ;;  %v1190_v3 = vadd.f32 0.014752088, %v1189_v37  ;;  %1666 = vmatpush.bf16.msrb.mxu0 %v2237_v14  ;;  %v1179_v28 = vadd.f32 0.0036580483, %v1178_v53 }
 0x28a   :  { %v1039_v8 = vsub.f32 1.0, %v1038_v60  ;;  %v1214_v47 = vmul.f32 %v3681_v49, %v3681_v49  ;;  %v2309_v63 = vor.u32 %v2575_v55, %v2308_v18  ;;  %v2190_v54 = vclamps-f32 %v1131_v52, 1.0  ;;  %v2220_v14 = vld [vmem:[%s4245_s5 + $0x30] sm:$0xf] }
 0x28b   :  { %v1169_v27 = vor.u32 1.1754944e-38, %v1168_v24  ;;  %v1073_v32 = vmul.f32 %v1072_v13, %v3611_v50  ;;  %v1191_v25 = vmul.f32 %v1190_v3, %v3649_v7  ;;  %v1146_v19 = vmul.f32 %v1145_v29, %v3452_v57  ;;  %v2292_v13 = vld [vmem:[%s4245_s5 + $0xc0] sm:$0xf]  ;;  %v2571_v3 = vld [vmem:[%s4245_s5 + $0xc4] sm:$0xf0] }
 0x28c   :  { %vm1167_vm12 = vcmp.eq.f32.partialorder %v1166_v2, 8.507059e+37  ;;  %v3726_v33 = vmin.f32 %v1214_v47, 16.0  ;;  %1679 = vmatpush.bf16.msrb.mxu1 %v2309_v63  ;;  %v2229_v41 = vor.u32 %v2555_v44, %v2228_v6  ;;  %v1061_v17 = vadd.f32 0.05243302, %v1060_v9  ;;  %v2553_v2 = vld [vmem:[%s4245_s5 + $0x34] sm:$0xf0] }
 0x28d   :  { %v1170_v22 = vsel %vm1167_vm12, %v1169_v27, %v1165_v46  ;;  %v1074_v34 = vadd.f32 0.4994258, %v1073_v32  ;;  %v2301_v36 = vor.u32 %v2573_v20, %v2300_v45  ;;  %v1040_v40 = vmul.f32 %v3683_v51, %v1039_v8  ;;  %v2380_v46 = vld [vmem:[%s4245_s5 + $0x170] sm:$0xf]  ;;  %v2593_v9 = vld [vmem:[%s4245_s5 + $0x174] sm:$0xf0] }
 0x28e   :  { %v1180_v43 = vmul.f32 %v1179_v28, %v3649_v7  ;;  %v1192_v48 = vadd.f32 0.112945676, %v1191_v25  ;;  %v1216_v42 = vmul.f32 2.1237322e-06, %v3726_v33  ;;  %1667 = vmatpush.bf16.msrb.mxu0 %v2229_v41  ;;  %v2187_v24 = vclamps-f32 %v1011_v56, 1.0 }
 0x28f   :  { %v1258_v4 = vadd.f32 1.0, %v2190_v54  ;;  %v3731_v57 = vadd.f32 1.1283791, %v1024_v39  ;;  %v1075_v29 = vmul.f32 %v1074_v34, %v3611_v50  ;;  %vm1043_vm13 = vweird.f32 %v3683_v51  ;;  %v2212_v28 = vld [vmem:[%s4245_s5 + $0x20] sm:$0xf] }
 0x290   :  { %v1048_v52 = vand.u32 2147483648, %v3638_v61  ;;  %v1193_v53 = vmul.f32 %v1192_v48, %v3649_v7  ;;  %v1217_v37 = vadd.f32 0.00028619796, %v1216_v42  ;;  %1680 = vmatpush.bf16.msrb.mxu1 %v2301_v36  ;;  %v1171_v18 = vmul.f32 %v1170_v22, %v1146_v19  ;;  %v2551_v47 = vld [vmem:[%s4245_s5 + $0x24] sm:$0xf0] }
 0x291   :  { %v1062_v55 = vmul.f32 %v1061_v17, %v3611_v50  ;;  %v3741_v56 = vadd.f32 1.0, %v1075_v29  ;;  %v1227_v58 = vmul.f32 3.8918573e-05, %v3726_v33  ;;  %v1041_v39 = vadd.f32 %v3683_v51, %v1040_v40  ;;  %v2591_v27 = vld [vmem:[%s4245_s5 + $0x164] sm:$0xf0] }
 0x292   :  { %v1181_v60 = vadd.f32 0.05243302, %v1180_v43  ;;  %v1194_v6 = vadd.f32 0.4994258, %v1193_v53  ;;  %v1218_v44 = vmul.f32 %v1217_v37, %v3726_v33  ;;  %v1254_v45 = vadd.f32 1.0, %v2186_v10 }
 0x293   :  { %v1255_v8 = vadd.f32 1.0, %v2187_v24  ;;  %vm1042_vm14 = vweird.f32 %v3638_v61  ;;  %2634 = vrcp.f32 %v3741_v56  ;;  %v1266_v63 = vmul.f32 %v1258_v4, %v3516_v23  ;;  %v2372_v10 = vld [vmem:[%s4245_s5 + $0x160] sm:$0xf]  ;;  %v2284_v41 = vld [vmem:[%s4245_s5 + $0xb0] sm:$0xf] }
 0x294   :  { %v1046_v20 = vand.u32 2147483647, %v3638_v61  ;;  %v1049_v54 = vor.u32 1.1754944e-38, %v1048_v52  ;;  %v1195_v35 = vmul.f32 %v1194_v6, %v3649_v7  ;;  %v2191_v32 = vclamps-f32 %v1171_v18, 1.0  ;;  %vm3782_vm15 = vmor %vm1042_vm14, %vm1043_vm13  ;;  %v2569_v22 = vld [vmem:[%s4245_s5 + $0xb4] sm:$0xf0] }
 0x295   :  { %v1063_v23 = vadd.f32 0.18741608, %v1062_v55  ;;  %v1228_v61 = vadd.f32 0.001143296, %v1227_v58  ;;  %v2221_v19 = vor.u32 %v2553_v2, %v2220_v14  ;;  %v1045_v17 = vsel %vm3782_vm15, %v3683_v51, %v1041_v39  ;;  %v2444_v43 = vld [vmem:[%s4245_s5 + $0x1f0] sm:$0xf] }
 0x296   :  { %v1182_v34 = vmul.f32 %v1181_v60, %v3649_v7  ;;  %v3796_v36 = vadd.f32 1.0, %v1195_v35  ;;  %v1219_v40 = vadd.f32 0.0036580483, %v1218_v44  ;;  %v2381_v42 = vor.u32 %v2593_v9, %v2380_v46  ;;  %v2609_v29 = vld [vmem:[%s4245_s5 + $0x1f4] sm:$0xf0] }
 0x297   :  { %v1229_v48 = vmul.f32 %v1228_v61, %v3726_v33  ;;  %1668 = vmatpush.bf16.msrb.mxu0 %v2221_v19  ;;  %v2293_v24 = vor.u32 %v2571_v3, %v2292_v13  ;;  %v2213_v4 = vor.u32 %v2551_v47, %v2212_v28  ;;  %v2204_v51 = vld [vmem:[%s4245_s5 + $0x10] sm:$0xf]  ;;  %v2549_v52 = vld [vmem:[%s4245_s5 + $0x14] sm:$0xf0]  ;;  %v1262_v53 = vmul.f32 %v1254_v45, %v3505_v0  ;;  %v2276_v39 = vld [vmem:[%s4245_s5 + $0xa0] sm:$0xf] }
 0x298   :  { %v3813_v37 = vmul.f32 0.5, %v3454_v26  ;;  %vm1047_vm0 = vcmp.eq.f32.partialorder %v1046_v20, 8.507059e+37  ;;  %2636 = vrcp.f32 %v3796_v36  ;;  %v3819_v14 = vld [vmem:[%s4245_s5 + $0x150] sm:$0xf]  ;;  %v3824_v18 = vld [vmem:[%s4245_s5 + $0x154] sm:$0xf0]  ;;  %v1064_v26 = vmul.f32 %v1063_v23, %v3611_v50  ;;  %1692 = vmatpush.bf16.msrb.mxu2 %v2381_v42 }
 0x299   :  { %v3826_v55 = vpop.eup %2634  ;;  %v1259_v58 = vadd.f32 1.0, %v2191_v32  ;;  %v1050_v0 = vsel %vm1047_vm0, %v1049_v54, %v1045_v17  ;;  %1681 = vmatpush.bf16.msrb.mxu1 %v2293_v24  ;;  %v2373_v2 = vor.u32 %v2591_v27, %v2372_v10  ;;  %v2567_v60 = vld [vmem:[%s4245_s5 + $0xa4] sm:$0xf0]  ;;  %v1026_v6 = vmul.f32 %v3731_v57, %v3466_v16  ;;  %v2436_v50 = vld [vmem:[%s4245_s5 + $0x1e0] sm:$0xf] }
 0x29a   :  { %v1220_v44 = vmul.f32 %v1219_v40, %v3726_v33  ;;  %v1230_v46 = vadd.f32 0.014752088, %v1229_v48  ;;  %v2285_v9 = vor.u32 %v2569_v22, %v2284_v41  ;;  %v2607_v13 = vld [vmem:[%s4245_s5 + $0x1e4] sm:$0xf0]  ;;  %v1263_v3 = vmul.f32 %v1255_v8, %v3508_v1  ;;  %v2196_v16 = vld [vmem:[%s4245_s5] sm:$0xf] }
 0x29b   :  { %v3845_v45 = vpack.c.bf16 %v1266_v63, %v1262_v53  ;;  %v1183_v28 = vadd.f32 0.18741608, %v1182_v34  ;;  %1669 = vmatpush.bf16.msrb.mxu0 %v2213_v4  ;;  %v2445_v47 = vor.u32 %v2609_v29, %v2444_v43  ;;  %v2547_v57 = vld [vmem:[%s4245_s5 + $0x4] sm:$0xf0]  ;;  %v3853_v20 = vmul.f32 %v1050_v0, %v1026_v6  ;;  %v3861_v63 = vld [vmem:[%s4245_s5 + $0x140] sm:$0xf] }
 0x29c   :  { %v1078_v54 = vmul.f32 %v3826_v55, %v3741_v56  ;;  %v1231_v1 = vmul.f32 %v1230_v46, %v3726_v33  ;;  %v2205_v8 = vor.u32 %v2549_v52, %v2204_v51  ;;  %v3866_v35 = vld [vmem:[%s4245_s5 + $0x144] sm:$0xf0]  ;;  %v2560_v10 = vld [vmem:[%s4245_s5 + $0x74] sm:$0xf]  ;;  %v2254_v27 = vld [vmem:[%s4245_s5 + $0x78] sm:$0xf0]  ;;  %v1267_v25 = vmul.f32 %v1259_v58, %v3520_v15  ;;  %1693 = vmatpush.bf16.msrb.mxu2 %v2373_v2 }
 0x29d   :  { %v2268_v32 = vld [vmem:[%s4245_s5 + $0x90] sm:$0xf]  ;;  %v3878_v23 = vadd.f32 1.1283791, %v1064_v26  ;;  %1682 = vmatpush.bf16.msrb.mxu1 %v2285_v9  ;;  %v2365_v61 = vor.u32 %v3824_v18, %v3819_v14  ;;  %v2277_v19 = vor.u32 %v2567_v60, %v2276_v39  ;;  %v2565_v41 = vld [vmem:[%s4245_s5 + $0x94] sm:$0xf0]  ;;  %1706 = vmatpush.bf16.msrb.mxu3 %v2445_v47  ;;  %v2437_v43 = vor.u32 %v2607_v13, %v2436_v50 }
 0x29e   :  { %v2428_v22 = vld [vmem:[%s4245_s5 + $0x1d0] sm:$0xf]  ;;  %v3888_v17 = vpop.eup %2636  ;;  %v1086_v15 = vand.u32 2147483647, %v3741_v56  ;;  %v1221_v34 = vadd.f32 0.05243302, %v1220_v44  ;;  %v1184_v42 = vmul.f32 %v1183_v28, %v3649_v7  ;;  %v2197_v4 = vor.u32 %v2547_v57, %v2196_v16 }
 0x29f   :  { %v1232_v40 = vadd.f32 0.112945676, %v1231_v1  ;;  %v1088_v48 = vand.u32 2147483648, %v3741_v56  ;;  %v1198_v24 = vmul.f32 %v3888_v17, %v3796_v36  ;;  %1670 = vmatpush.bf16.msrb.mxu0 %v2205_v8  ;;  %v2605_v29 = vld [vmem:[%s4245_s5 + $0x1d4] sm:$0xf0]  ;;  %v2188_v52 = vclamps-f32 %v3853_v20, 1.0 }
 0x2a0   :  { %v3901_v51 = vld [vmem:[%s4245_s5 + $0x64] sm:$0xf]  ;;  %v1079_v53 = vsub.f32 1.0, %v1078_v54  ;;  %v2257_v7 = vor.u32 %v2560_v10, %v2254_v27  ;;  %v2348_v18 = vld [vmem:[%s4245_s5 + $0x130] sm:$0xf]  ;;  %v1208_v39 = vand.u32 2147483648, %v3796_v36  ;;  %1694 = vmatpush.bf16.msrb.mxu2 %v2365_v61  ;;  %v2357_v60 = vor.u32 %v3866_v35, %v3861_v63 }
 0x2a1   :  { %v1233_v14 = vmul.f32 %v1232_v40, %v3726_v33  ;;  %v2585_v58 = vld [vmem:[%s4245_s5 + $0x134] sm:$0xf0]  ;;  %v2246_v0 = vld [vmem:[%s4245_s5 + $0x68] sm:$0xf0]  ;;  %v2260_v26 = vld [vmem:[%s4245_s5 + $0x80] sm:$0xf]  ;;  %1683 = vmatpush.bf16.msrb.mxu1 %v2277_v19  ;;  %v2269_v6 = vor.u32 %v2565_v41, %v2268_v32  ;;  %v3926_v9 = vpack.c.bf16 %v1267_v25, %v1263_v3  ;;  %v1222_v50 = vmul.f32 %v1221_v34, %v3726_v33 }
 0x2a2   :  { %v1199_v2 = vsub.f32 1.0, %v1198_v24  ;;  %v2563_v44 = vld [vmem:[%s4245_s5 + $0x84] sm:$0xf0]  ;;  %v2420_v46 = vld [vmem:[%s4245_s5 + $0x1c0] sm:$0xf]  ;;  %1707 = vmatpush.bf16.msrb.mxu3 %v2437_v43  ;;  %v2429_v28 = vor.u32 %v2605_v29, %v2428_v22  ;;  %vm1203_vm1 = vweird.f32 %v3888_v17  ;;  %v1080_v8 = vmul.f32 %v3826_v55, %v1079_v53 }
 0x2a3   :  { %v1234_v13 = vadd.f32 0.4994258, %v1233_v14  ;;  %v2603_v47 = vld [vmem:[%s4245_s5 + $0x1c4] sm:$0xf0]  ;;  %v2576_v16 = vld [vmem:[%s4245_s5 + $0xf4] sm:$0xf]  ;;  %1671 = vmatpush.bf16.msrb.mxu0 %v2197_v4  ;;  %vm1202_vm2 = vweird.f32 %v3796_v36  ;;  %v2249_v35 = vor.u32 %v3901_v51, %v2246_v0  ;;  %v2349_v19 = vor.u32 %v2585_v58, %v2348_v18 }
 0x2a4   :  { %v1185_v57 = vadd.f32 1.1283791, %v1184_v42  ;;  %v1200_v54 = vmul.f32 %v3888_v17, %v1199_v2  ;;  %v1206_v3 = vand.u32 2147483647, %v3796_v36  ;;  %v2318_v1 = vld [vmem:[%s4245_s5 + $0xf8] sm:$0xf0]  ;;  %1695 = vmatpush.bf16.msrb.mxu2 %v2357_v60  ;;  %v2261_v41 = vor.u32 %v2563_v44, %v2260_v26  ;;  %vm3965_vm3 = vmor %vm1202_vm2, %vm1203_vm1 }
 0x2a5   :  { %v1235_v63 = vmul.f32 %v1234_v13, %v3726_v33  ;;  %v2340_v10 = vld [vmem:[%s4245_s5 + $0x120] sm:$0xf]  ;;  %v2583_v27 = vld [vmem:[%s4245_s5 + $0x124] sm:$0xf0]  ;;  %v2556_v32 = vld [vmem:[%s4245_s5 + $0x54] sm:$0xf]  ;;  %1684 = vmatpush.bf16.msrb.mxu1 %v2269_v6  ;;  %v2421_v24 = vor.u32 %v2603_v47, %v2420_v46  ;;  %v2321_v4 = vor.u32 %v2576_v16, %v2318_v1  ;;  %vm1083_vm4 = vweird.f32 %v3826_v55 }
 0x2a6   :  { %v1201_v25 = vadd.f32 %v3888_v17, %v1200_v54  ;;  %v1209_v61 = vor.u32 1.1754944e-38, %v1208_v39  ;;  %v2238_v22 = vld [vmem:[%s4245_s5 + $0x58] sm:$0xf0]  ;;  %v2412_v34 = vld [vmem:[%s4245_s5 + $0x1b0] sm:$0xf]  ;;  %1708 = vmatpush.bf16.msrb.mxu3 %v2429_v28  ;;  %1672 = vmatmul.bf16.vlgmr.msrb.gmra.mxu0 %v3845_v45  ;;  %v1186_v36 = vmul.f32 %v1185_v57, %v3614_v31  ;;  %vm1207_vm5 = vcmp.eq.f32.partialorder %v1206_v3, 8.507059e+37 }
 0x2a7   :  { %1720 = vmatpush.bf16.msra.mxu0 %v2257_v7  ;;  %v1223_v43 = vadd.f32 0.18741608, %v1222_v50  ;;  %v3969_v42 = vadd.f32 1.0, %v1235_v63  ;;  %v2601_v29 = vld [vmem:[%s4245_s5 + $0x1b4] sm:$0xf0]  ;;  %v1081_v7 = vadd.f32 %v3826_v55, %v1080_v8  ;;  %v2241_v31 = vor.u32 %v2556_v32, %v2238_v22 }
 0x2a8   :  { %v1205_v51 = vsel %vm3965_vm3, %v3888_v17, %v1201_v25  ;;  %v2574_v53 = vld [vmem:[%s4245_s5 + $0xe4] sm:$0xf]  ;;  %v2310_v14 = vld [vmem:[%s4245_s5 + $0xe8] sm:$0xf0]  ;;  %1696 = vmatpush.bf16.msrb.mxu2 %v2349_v19  ;;  %v2341_v17 = vor.u32 %v2583_v27, %v2340_v10  ;;  %v2332_v0 = vld [vmem:[%s4245_s5 + $0x110] sm:$0xf]  ;;  %vm1082_vm6 = vweird.f32 %v3741_v56  ;;  %v2413_v60 = vor.u32 %v2601_v29, %v2412_v34 }
 0x2a9   :  { %v1210_v18 = vsel %vm1207_vm5, %v1209_v61, %v1205_v51  ;;  %2638 = vrcp.f32 %v3969_v42  ;;  %1685 = vmatpush.bf16.msrb.mxu1 %v2261_v41  ;;  %v2554_v26 = vld [vmem:[%s4245_s5 + $0x44] sm:$0xf]  ;;  %v2230_v2 = vld [vmem:[%s4245_s5 + $0x48] sm:$0xf0]  ;;  %v1224_v39 = vmul.f32 %v1223_v43, %v3726_v33  ;;  %v2313_v6 = vor.u32 %v2574_v53, %v2310_v14  ;;  %v2581_v44 = vld [vmem:[%s4245_s5 + $0x114] sm:$0xf0] }
 0x2aa   :  { %v1211_v58 = vmul.f32 %v1210_v18, %v1186_v36  ;;  %1709 = vmatpush.bf16.msrb.mxu3 %v2421_v24  ;;  %v2404_v46 = vld [vmem:[%s4245_s5 + $0x1a0] sm:$0xf]  ;;  %v2599_v50 = vld [vmem:[%s4245_s5 + $0x1a4] sm:$0xf0]  ;;  %vm4010_vm7 = vmor %vm1082_vm6, %vm1083_vm4  ;;  %v924_v13 = vmul.f32 0.5, %v3575_v21  ;;  %vm4026_vm8 = vcmp.eq.f32.partialorder %v1086_v15, 8.507059e+37  ;;  %v2233_v3 = vor.u32 %v2554_v26, %v2230_v2 }
 0x2ab   :  { %1721 = vmatpush.bf16.msra.mxu0 %v2249_v35  ;;  %v2572_v47 = vld [vmem:[%s4245_s5 + $0xd4] sm:$0xf]  ;;  %v2302_v16 = vld [vmem:[%s4245_s5 + $0xd8] sm:$0xf0]  ;;  %v1085_v57 = vsel %vm4010_vm7, %v3826_v55, %v1081_v7  ;;  %v1089_v21 = vor.u32 1.1754944e-38, %v1088_v48  ;;  %v1256_v55 = vadd.f32 1.0, %v2188_v52  ;;  %v2333_v15 = vor.u32 %v2581_v44, %v2332_v0 }
 0x2ac   :  { %v2192_v28 = vclamps-f32 %v1211_v58, 1.0  ;;  %v2324_v1 = vld [vmem:[%s4245_s5 + $0x100] sm:$0xf]  ;;  %1686 = vmatmul.bf16.vlgmr.msrb.gmra.mxu1 %v3926_v9  ;;  %1697 = vmatpush.bf16.msrb.mxu2 %v2341_v17  ;;  %v2552_v63 = vld [vmem:[%s4245_s5 + $0x34] sm:$0xf]  ;;  %v2405_v10 = vor.u32 %v2599_v50, %v2404_v46  ;;  %v2305_v27 = vor.u32 %v2572_v47, %v2302_v16  ;;  %v1066_v22 = vmul.f32 %v3878_v23, %v3569_v5 }
 0x2ad   :  { %1734 = vmatpush.bf16.msra.mxu1 %v2321_v4  ;;  %v2222_v56 = vld [vmem:[%s4245_s5 + $0x38] sm:$0xf0]  ;;  %v1225_v35 = vadd.f32 1.1283791, %v1224_v39  ;;  %v2579_v20 = vld [vmem:[%s4245_s5 + $0x104] sm:$0xf0]  ;;  %v1090_v32 = vsel %vm4026_vm8, %v1089_v21, %v1085_v57  ;;  %v1264_v29 = vmul.f32 %v1256_v55, %v3813_v37  ;;  %vm1242_vm10 = vweird.f32 %v3969_v42 }
 0x2ae   :  { %v1260_v8 = vadd.f32 1.0, %v2192_v28  ;;  %1710 = vmatpush.bf16.msrb.mxu3 %v2413_v60  ;;  %v2592_v52 = vld [vmem:[%s4245_s5 + $0x174] sm:$0xf]  ;;  %v2382_v61 = vld [vmem:[%s4245_s5 + $0x178] sm:$0xf0]  ;;  %v2225_v40 = vor.u32 %v2552_v63, %v2222_v56  ;;  %v2325_v5 = vor.u32 %v2579_v20, %v2324_v1  ;;  %v1091_v53 = vmul.f32 %v1090_v32, %v1066_v22 }
 0x2af   :  { %1722 = vmatpush.bf16.msra.mxu0 %v2241_v31  ;;  %v4044_v48 = vpop.eup %2638  ;;  %v2396_v19 = vld [vmem:[%s4245_s5 + $0x190] sm:$0xf]  ;;  %v2597_v41 = vld [vmem:[%s4245_s5 + $0x194] sm:$0xf0]  ;;  %v2570_v43 = vld [vmem:[%s4245_s5 + $0xc4] sm:$0xf]  ;;  %v2385_v7 = vor.u32 %v2592_v52, %v2382_v61  ;;  %v1226_v50 = vmul.f32 %v1225_v35, %v3681_v49 }
 0x2b0   :  { %v1238_v25 = vmul.f32 %v4044_v48, %v3969_v42  ;;  %v1268_v34 = vmul.f32 %v1260_v8, %v924_v13  ;;  %v2294_v24 = vld [vmem:[%s4245_s5 + $0xc8] sm:$0xf0]  ;;  %v2550_v4 = vld [vmem:[%s4245_s5 + $0x24] sm:$0xf]  ;;  %1698 = vmatpush.bf16.msrb.mxu2 %v2333_v15  ;;  %v1248_v14 = vand.u32 2147483648, %v3969_v42  ;;  %v2397_v18 = vor.u32 %v2597_v41, %v2396_v19 }
 0x2b1   :  { %1735 = vmatpush.bf16.msra.mxu1 %v2313_v6  ;;  %v2214_v23 = vld [vmem:[%s4245_s5 + $0x28] sm:$0xf0]  ;;  %v2590_v51 = vld [vmem:[%s4245_s5 + $0x164] sm:$0xf]  ;;  %v2388_v31 = vld [vmem:[%s4245_s5 + $0x180] sm:$0xf]  ;;  %vm1243_vm9 = vweird.f32 %v4044_v48  ;;  %v2297_v0 = vor.u32 %v2570_v43, %v2294_v24 }
 0x2b2   :  { %v1239_v36 = vsub.f32 1.0, %v1238_v25  ;;  %1711 = vmatpush.bf16.msrb.mxu3 %v2405_v10  ;;  %v2374_v37 = vld [vmem:[%s4245_s5 + $0x168] sm:$0xf0]  ;;  %v1246_v17 = vand.u32 2147483647, %v3969_v42  ;;  %v4099_v39 = vpack.c.bf16 %v1268_v34, %v1264_v29  ;;  %v2217_v60 = vor.u32 %v2550_v4, %v2214_v23  ;;  %vm1244_vm11 = vmor %vm1242_vm10, %vm1243_vm9 }
 0x2b3   :  { %1723 = vmatpush.bf16.msra.mxu0 %v2233_v3  ;;  %v2595_v26 = vld [vmem:[%s4245_s5 + $0x184] sm:$0xf0]  ;;  %v2568_v2 = vld [vmem:[%s4245_s5 + $0xb4] sm:$0xf]  ;;  %v2286_v6 = vld [vmem:[%s4245_s5 + $0xb8] sm:$0xf0]  ;;  %v2377_v49 = vor.u32 %v2590_v51, %v2374_v37 }
 0x2b4   :  { %v1240_v58 = vmul.f32 %v4044_v48, %v1239_v36  ;;  %v2608_v44 = vld [vmem:[%s4245_s5 + $0x1f4] sm:$0xf]  ;;  %v2446_v46 = vld [vmem:[%s4245_s5 + $0x1f8] sm:$0xf0]  ;;  %1699 = vmatpush.bf16.msrb.mxu2 %v2325_v5  ;;  %v2189_v47 = vclamps-f32 %v1091_v53, 1.0  ;;  %v1249_v16 = vor.u32 1.1754944e-38, %v1248_v14  ;;  %v2389_v57 = vor.u32 %v2595_v26, %v2388_v31 }
 0x2b5   :  { %1736 = vmatpush.bf16.msra.mxu1 %v2305_v27  ;;  %v2548_v13 = vld [vmem:[%s4245_s5 + $0x14] sm:$0xf]  ;;  %v2206_v28 = vld [vmem:[%s4245_s5 + $0x18] sm:$0xf0]  ;;  %vm1247_vm12 = vcmp.eq.f32.partialorder %v1246_v17, 8.507059e+37  ;;  %v2289_v21 = vor.u32 %v2568_v2, %v2286_v6  ;;  %v2449_v3 = vor.u32 %v2608_v44, %v2446_v46  ;;  %v921_v25 = vmul.f32 0.5, %v3546_v38 }
 0x2b6   :  { %v1241_v33 = vadd.f32 %v4044_v48, %v1240_v58  ;;  %1712 = vmatpush.bf16.msrb.mxu3 %v2397_v18  ;;  %v2588_v42 = vld [vmem:[%s4245_s5 + $0x154] sm:$0xf]  ;;  %v2366_v1 = vld [vmem:[%s4245_s5 + $0x158] sm:$0xf0]  ;;  %v2566_v55 = vld [vmem:[%s4245_s5 + $0xa4] sm:$0xf]  ;;  %v2209_v15 = vor.u32 %v2548_v13, %v2206_v28 }
 0x2b7   :  { %1724 = vmatpush.bf16.msra.mxu0 %v2225_v40  ;;  %v2278_v63 = vld [vmem:[%s4245_s5 + $0xa8] sm:$0xf0]  ;;  %v2606_v56 = vld [vmem:[%s4245_s5 + $0x1e4] sm:$0xf]  ;;  %1700 = vmatmul.bf16.vlgmr.msrb.gmra.mxu2 %v4099_v39  ;;  %v1257_v20 = vadd.f32 1.0, %v2189_v47  ;;  %v2369_v52 = vor.u32 %v2588_v42, %v2366_v1  ;;  %v925_v4 = vmul.f32 0.5, %v3660_v30 }
 0x2b8   :  { %1748 = vmatpush.bf16.msra.mxu2 %v2385_v7  ;;  %v1245_v54 = vsel %vm1244_vm11, %v4044_v48, %v1241_v33  ;;  %v2438_v48 = vld [vmem:[%s4245_s5 + $0x1e8] sm:$0xf0]  ;;  %v2546_v10 = vld [vmem:[%s4245_s5 + $0x4] sm:$0xf]  ;;  %v2281_v19 = vor.u32 %v2566_v55, %v2278_v63  ;;  %v2564_v34 = vld [vmem:[%s4245_s5 + $0x94] sm:$0xf] }
 0x2b9   :  { %1737 = vmatpush.bf16.msra.mxu1 %v2297_v0  ;;  %v1250_v8 = vsel %vm1247_vm12, %v1249_v16, %v1245_v54  ;;  %v2198_v27 = vld [vmem:[%s4245_s5 + $0x8] sm:$0xf0]  ;;  %v2586_v32 = vld [vmem:[%s4245_s5 + $0x144] sm:$0xf]  ;;  %v2441_v41 = vor.u32 %v2606_v56, %v2438_v48  ;;  %v2270_v43 = vld [vmem:[%s4245_s5 + $0x98] sm:$0xf0]  ;;  %v1265_v36 = vmul.f32 %v1257_v20, %v921_v25 }
 0x2ba   :  { %v1251_v35 = vmul.f32 %v1250_v8, %v1226_v50  ;;  %1713 = vmatpush.bf16.msrb.mxu3 %v2389_v57  ;;  %v2358_v22 = vld [vmem:[%s4245_s5 + $0x148] sm:$0xf0]  ;;  %v2201_v40 = vor.u32 %v2546_v10, %v2198_v27  ;;  %v2604_v38 = vld [vmem:[%s4245_s5 + $0x1d4] sm:$0xf]  ;;  %v2430_v24 = vld [vmem:[%s4245_s5 + $0x1d8] sm:$0xf0]  ;;  %v2273_v51 = vor.u32 %v2564_v34, %v2270_v43 }
 0x2bb   :  { %1725 = vmatpush.bf16.msra.mxu0 %v2217_v60  ;;  %v2361_v5 = vor.u32 %v2586_v32, %v2358_v22  ;;  %v2433_v53 = vor.u32 %v2604_v38, %v2430_v24  ;;  %v2584_v14 = vld [vmem:[%s4245_s5 + $0x134] sm:$0xf]  ;;  %v2350_v7 = vld [vmem:[%s4245_s5 + $0x138] sm:$0xf0]  ;;  %v2562_v30 = vld [vmem:[%s4245_s5 + $0x84] sm:$0xf] }
 0x2bc   :  { %1749 = vmatpush.bf16.msra.mxu2 %v2377_v49  ;;  %v2193_v61 = vclamps-f32 %v1251_v35, 1.0  ;;  %v2262_v18 = vld [vmem:[%s4245_s5 + $0x88] sm:$0xf0]  ;;  %v2602_v37 = vld [vmem:[%s4245_s5 + $0x1c4] sm:$0xf]  ;;  %v2353_v17 = vor.u32 %v2584_v14, %v2350_v7 }
 0x2bd   :  { %1738 = vmatpush.bf16.msra.mxu1 %v2289_v21  ;;  %v2422_v31 = vld [vmem:[%s4245_s5 + $0x1c8] sm:$0xf0]  ;;  %v2265_v0 = vor.u32 %v2562_v30, %v2262_v18  ;;  %v2582_v2 = vld [vmem:[%s4245_s5 + $0x124] sm:$0xf]  ;;  %v2600_v6 = vld [vmem:[%s4245_s5 + $0x1b4] sm:$0xf] }
 0x2be   :  { %1762 = vmatpush.bf16.msra.mxu3 %v2449_v3  ;;  %v1261_v29 = vadd.f32 1.0, %v2193_v61  ;;  %v2425_v26 = vor.u32 %v2602_v37, %v2422_v31  ;;  %v2342_v60 = vld [vmem:[%s4245_s5 + $0x128] sm:$0xf0]  ;;  %v2414_v44 = vld [vmem:[%s4245_s5 + $0x1b8] sm:$0xf0] }
 0x2bf   :  { %1726 = vmatpush.bf16.msra.mxu0 %v2209_v15  ;;  %v2345_v46 = vor.u32 %v2582_v2, %v2342_v60  ;;  %v2417_v50 = vor.u32 %v2600_v6, %v2414_v44  ;;  %v2580_v33 = vld [vmem:[%s4245_s5 + $0x114] sm:$0xf]  ;;  %v2598_v13 = vld [vmem:[%s4245_s5 + $0x1a4] sm:$0xf]  ;;  %v2406_v28 = vld [vmem:[%s4245_s5 + $0x1a8] sm:$0xf0] }
 0x2c0   :  { %1750 = vmatpush.bf16.msra.mxu2 %v2369_v52  ;;  %v1269_v23 = vmul.f32 %v1261_v29, %v925_v4  ;;  %v2409_v16 = vor.u32 %v2598_v13, %v2406_v28  ;;  %v2578_v49 = vld [vmem:[%s4245_s5 + $0x104] sm:$0xf]  ;;  %v2326_v57 = vld [vmem:[%s4245_s5 + $0x108] sm:$0xf0]  ;;  %v2596_v42 = vld [vmem:[%s4245_s5 + $0x194] sm:$0xf] }
 0x2c1   :  { %1739 = vmatpush.bf16.msra.mxu1 %v2281_v19  ;;  %v2398_v54 = vld [vmem:[%s4245_s5 + $0x198] sm:$0xf0]  ;;  %v2594_v3 = vld [vmem:[%s4245_s5 + $0x184] sm:$0xf]  ;;  %v2390_v1 = vld [vmem:[%s4245_s5 + $0x188] sm:$0xf0] }
 0x2c2   :  { %1763 = vmatpush.bf16.msra.mxu3 %v2441_v41  ;;  %v1273_v58 = vpack.c.bf16 %v1269_v23, %v1265_v36  ;;  %v2401_v21 = vor.u32 %v2596_v42, %v2398_v54  ;;  %v2393_v55 = vor.u32 %v2594_v3, %v2390_v1  ;;  %v1338_v8 = vld [vmem:[%s4246_s6] sm:$0x3] }
 0x2c3   :  { %1727 = vmatpush.bf16.msra.mxu0 %v2201_v40  ;;  %v1340_v63 = vperm.slane %v1338_v8, 0  ;;  %v1341_v24 = vperm.slane %v1338_v8, 1 }
 0x2c4   :  { %1751 = vmatpush.bf16.msra.mxu2 %v2361_v5  ;;  %1714 = vmatmul.bf16.vlgmr.msrb.gmra.mxu3 %v1273_v58 }
 0x2c5   :  { %1740 = vmatpush.bf16.msra.mxu1 %v2273_v51 }
 0x2c6   :  { %1764 = vmatpush.bf16.msra.mxu3 %v2433_v53  ;;  %1728 = vmatmul.bf16.vlgmr.msra.gmra.mxu0 %v3845_v45  ;;  %v2334_v45 = vld [vmem:[%s4245_s5 + $0x118] sm:$0xf0]  ;;  %s2667_s5 = smov [#allocation2]  }
 0x2c7   :  { %v2337_v47 = vor.u32 %v2580_v33, %v2334_v45  ;;  %s1788_s6 = sshll.u32 %s2667_s5, 4  ;;  %s1789_s6 = int_to_ptr.vmem [resolvable:$true] %s1788_s6 }
 0x2c8   :  { %1752 = vmatpush.bf16.msra.mxu2 %v2353_v17 }
 0x2c9   :  { %1741 = vmatpush.bf16.msra.mxu1 %v2265_v0 }
 0x2ca   :  { %1765 = vmatpush.bf16.msra.mxu3 %v2425_v26 }
 0x2cc   :  { %1753 = vmatpush.bf16.msra.mxu2 %v2345_v46  ;;  %1742 = vmatmul.bf16.vlgmr.msra.gmra.mxu1 %v3926_v9  ;;  %v2329_v9 = vor.u32 %v2578_v49, %v2326_v57 }
 0x2ce   :  { %1766 = vmatpush.bf16.msra.mxu3 %v2417_v50 }
 0x2d0   :  { %1754 = vmatpush.bf16.msra.mxu2 %v2337_v47 }
 0x2d2   :  { %1767 = vmatpush.bf16.msra.mxu3 %v2409_v16 }
 0x2d4   :  { %1755 = vmatpush.bf16.msra.mxu2 %v2329_v9 }
 0x2d6   :  { %1768 = vmatpush.bf16.msra.mxu3 %v2401_v21 }
 0x2d7   :  { %1756 = vmatmul.bf16.vlgmr.msra.gmra.mxu2 %v4099_v39 }
 0x2da   :  { %1769 = vmatpush.bf16.msra.mxu3 %v2393_v55 }
 0x2dd   :  { %1770 = vmatmul.bf16.vlgmr.msra.gmra.mxu3 %v1273_v58 }
 0x323   :  { %v1673_v15 = vpop.f32.mrf.mxu0 }
 0x324   :  { %v1674_v35 = vadd.f32 %v1673_v15, %v1340_v63 }
 0x329   :  { %v1687_v56 = vpop.f32.mrf.mxu1 }
 0x32a   :  { %v1688_v10 = vadd.f32 %v1687_v56, %v1674_v35 }
 0x32b   :  { %v1675_v20 = vpop.f32.mrf.mxu0 }
 0x32c   :  { %v1676_v61 = vadd.f32 %v1675_v20, %v1340_v63 }
 0x331   :  { %v1689_v25 = vpop.f32.mrf.mxu1 }
 0x332   :  { %v1690_v41 = vadd.f32 %v1689_v25, %v1676_v61 }
 0x33a   :  { %v1701_v48 = vpop.f32.mrf.mxu2 }
 0x33b   :  { %v1702_v27 = vadd.f32 %v1701_v48, %v1688_v10 }
 0x342   :  { %v1703_v19 = vpop.f32.mrf.mxu2 }
 0x343   :  { %v1704_v22 = vadd.f32 %v1703_v19, %v1690_v41  ;;  %v1729_v38 = vpop.f32.mrf.mxu0 }
 0x344   :  { %v1730_v29 = vadd.f32 %v1729_v38, %v1341_v24 }
 0x347   :  { %v1715_v52 = vpop.f32.mrf.mxu3 }
 0x348   :  { %v1716_v32 = vadd.f32 %v1715_v52, %v1702_v27 }
 0x349   :  { %v1743_v4 = vpop.f32.mrf.mxu1 }
 0x34a   :  { %v1776_v39 = vadd.f32 %v1716_v32, %v2985_v59  ;;  %v1744_v5 = vadd.f32 %v1743_v4, %v1730_v29 }
 0x34b   :  { %v1731_v51 = vpop.f32.mrf.mxu0 }
 0x34c   :  { %1780 = vst [vmem:[#allocation2] sm:$0xff] %v1776_v39  ;;  %v1732_v7 = vadd.f32 %v1731_v51, %v1341_v24 }
 0x34f   :  { %v1717_v34 = vpop.f32.mrf.mxu3 }
 0x350   :  { %v1718_v40 = vadd.f32 %v1717_v34, %v1704_v22 }
 0x351   :  { %v1745_v59 = vpop.f32.mrf.mxu1 }
 0x352   :  { %v1778_v43 = vadd.f32 %v1718_v40, %v2997_v11  ;;  %v1746_v37 = vadd.f32 %v1745_v59, %v1732_v7 }
 0x354   :  { %1782 = vst [vmem:[#allocation2 + $0x10] sm:$0xff] %v1778_v43 }
 0x35a   :  { %v1757_v36 = vpop.f32.mrf.mxu2 }
 0x35b   :  { %v1758_v23 = vadd.f32 %v1757_v36, %v1744_v5 }
 0x360   :  { %v1771_v53 = vpop.f32.mrf.mxu3 }
 0x361   :  { %v1772_v14 = vadd.f32 %v1771_v53, %v1758_v23 }
 0x362   :  { %v1759_v18 = vpop.f32.mrf.mxu2 }
 0x363   :  { %v1777_v30 = vadd.f32 %v1772_v14, %v2988_v62  ;;  %v1760_v31 = vadd.f32 %v1759_v18, %v1746_v37 }
 0x365   :  { %1781 = vst [vmem:[#allocation2 + $0x8] sm:$0xff] %v1777_v30 }
 0x368   :  { %v1773_v11 = vpop.f32.mrf.mxu3 }
 0x369   :  { %v1774_v58 = vadd.f32 %v1773_v11, %v1760_v31 }
 0x36b   :  { %v1779_v17 = vadd.f32 %v1774_v58, %v3000_v12 }
 0x36d   :  { %1783 = vst [vmem:[#allocation2 + $0x18] sm:$0xff] %v1779_v17 }
 0x36e   :  { %1796 = dma.vmem_to_hbm [thread:$0]  %s1789_s6, 512, %s1791_s21, [#allocation3], %s2668_s22, %s2668_s22, %s2669_s23  }
 0x36f   :  { %2664 = dma.done.wait [#allocation3], 512  }
 0x370   :  { %2665 = vsyncadd [#allocation3], 4294966784 }
 0x371   :  { %1801 = vsyncpa [#allocation3], 1 }

</bundles_post_ra>
